<compile_context>
chip_gen: v7x
topology: tpu7x:2x2x1
jax: 0.10.0
libtpu: 0.0.40
codegen_flags: <defaults>
</compile_context>

<pallas_src>
import numpy as np
import jax
import jax.numpy as jnp
from jax.experimental import pallas as pl
from jax.experimental.pallas import tpu as pltpu

D_PROT_IN = 64       # enzyme_attn_model.output_dim
D_MODEL = 32         # rxn_attn_model.node_out_dim
N_HEADS = 8          # GlobalMultiHeadAttention heads
D_HEAD = D_MODEL // N_HEADS
N_LAYERS = 3         # GlobalMultiHeadAttention n_layers
N_SITE_TYPES = 6     # num_active_site_type
N_SITE_PAD = 8       # padded class dim (sublane aligned)
LN_EPS = 1e-6
LP_TILE_MAX = 512    # residue tile for long proteins (bounds VMEM, enables megacore)


def _gelu(x):
    # TODO(synk): easifa defines a custom GELU class (source not provided);
    # the standard tanh approximation is used here (same in the reference).
    c = np.float32(np.sqrt(2.0 / np.pi))
    return 0.5 * x * (1.0 + jnp.tanh(c * (x + 0.044715 * x * x * x)))


def _layernorm_fm(x, gamma, beta):
    """LayerNorm in feature-major layout: x [F, N], gamma/beta [F, 1]."""
    mu = jnp.mean(x, axis=0, keepdims=True)
    var = jnp.mean((x - mu) ** 2, axis=0, keepdims=True)
    return (x - mu) * jax.lax.rsqrt(var + LN_EPS) * gamma + beta


# --------------------------------------------------------------- fused kernel
def _fused_kernel(protT_ref, sub_ref, subT_ref, smask_ref, kmask_ref,
                  w1bT_ref, w2bT_ref, bvec_ref,
                  wqT_ref, wk_ref, bk_ref, wvTh_ref, bvTh_ref,
                  woTh_ref, avec_ref,
                  w1sT_ref, w2sT_ref, svec_ref,
                  o_ref):
    f32 = jnp.float32

    # ---- brige FeedForward (64 -> 32), feature-major: [feat, residues] -----
    bvec = bvec_ref[...]
    gb, bb = bvec[0:64], bvec[64:128]
    b1b, b2b = bvec[128:256], bvec[256:288]
    xp = protT_ref[0]                                          # [64, TL]
    xn = _layernorm_fm(xp, gb, bb)
    h = _gelu(jnp.dot(w1bT_ref[...], xn, preferred_element_type=f32) + b1b)
    x = jnp.dot(w2bT_ref[...], h, preferred_element_type=f32) + b2b   # [32, TL]
    tl = x.shape[-1]

    # ---- substrate-side projections, hoisted across the 3 layers -----------
    tgt = sub_ref[0]                                           # [Ls, 32]
    tgtT = subT_ref[0]                                         # [32, Ls]
    ls = tgt.shape[0]
    # K for every layer in one matmul: [Ls, 3*32]
    k_all = jnp.dot(tgt, wk_ref[...], preferred_element_type=f32) + bk_ref[...]
    # Tile K over heads (rows) and mask to each head's own feature columns so
    # that a single [H*Ls, 32] @ [32, TL] matmul produces all heads' scores.
    k_tiled = jnp.concatenate([k_all] * N_HEADS, axis=0)       # [H*Ls, 96]
    kbd_all = k_tiled * kmask_ref[...]                         # block-diag per head
    # Per-head V^T for every layer: [H, 3*dh, Ls]  (tgt is small; the 8x
    # broadcast here is hoisted and residue-count independent).
    tgtT_b = jnp.broadcast_to(tgtT[None], (N_HEADS, D_MODEL, ls))
    vhT_all = jnp.einsum('hfd,hdk->hfk', wvTh_ref[...], tgtT_b,
                         preferred_element_type=f32) + bvTh_ref[...]
    neg = (1.0 - smask_ref[0]) * np.float32(1e9)               # [Ls, 1]
    negb = neg[None]                                           # [1, Ls, 1]

    # ---- 3 masked multi-head cross-attention layers (fused) ----------------
    # TODO(synk): GlobalMultiHeadAttention internals are not in the source
    # excerpt; modeled as post-LN residual masked cross-attention (src -> tgt).
    for l in range(N_LAYERS):
        av = avec_ref[l]                                       # [32, 4]
        bq, bo = av[:, 0:1], av[:, 1:2]
        ga, ba = av[:, 2:3], av[:, 3:4]
        # full-width query projection (1/sqrt(dh) folded into wq/bq on host)
        qT = jnp.dot(wqT_ref[l], x, preferred_element_type=f32) + bq   # [32, TL]
        # all-heads scores in one matmul: [H*Ls, TL], residues on lanes
        s2 = jnp.dot(kbd_all[:, l * D_MODEL:(l + 1) * D_MODEL], qT,
                     preferred_element_type=f32)
        s3 = s2.reshape(N_HEADS, ls, tl) - negb                # [H, Ls, TL]
        m = jnp.max(s3, axis=1, keepdims=True)                 # [H, 1, TL]
        e3 = jnp.exp(s3 - m)
        inv = pl.reciprocal(jnp.sum(e3, axis=1, keepdims=True), approx=False)
        e3 = e3 * inv                                          # softmax over keys
        # fold Wo into V (small, TL-independent), then one K=Ls matmul / head
        ov = jnp.einsum('hde,hek->hdk', woTh_ref[l],
                        vhT_all[:, l * D_HEAD:(l + 1) * D_HEAD, :],
                        preferred_element_type=f32)            # [H, 32, Ls]
        attn_h = jnp.einsum('hdk,hkq->hdq', ov, e3,
                            preferred_element_type=f32)        # [H, 32, TL]
        attn_out = jnp.sum(attn_h, axis=0) + bo                # [32, TL]
        x = _layernorm_fm(x + attn_out, ga, ba)

    # ---- active_site_type FeedForward (32 -> 6, padded to 8 classes) -------
    svec = svec_ref[...]
    gs, bs = svec[0:32], svec[32:64]
    b1s, b2s = svec[64:128], svec[128:136]
    xn = _layernorm_fm(x, gs, bs)
    h = _gelu(jnp.dot(w1sT_ref[...], xn, preferred_element_type=f32) + b1s)
    o_ref[0] = jnp.dot(w2sT_ref[...], h, preferred_element_type=f32) + b2s  # [8, TL]


# -------------------------------------------------------------- host weights
def prepare_fused_params(params):
    """Transpose to feature-major, fold the attention scale, stack layers and
    consolidate small vectors so the kernel sees 13 constant arrays."""
    br, st, layers = params["brige"], params["site"], params["interaction"]
    scale = np.float32(1.0 / np.sqrt(D_HEAD))

    w1bT = br["w1"].T                                           # [128, 64]
    w2bT = br["w2"].T                                           # [32, 128]
    brige_vec = jnp.concatenate(
        [br["gamma"].T, br["beta"].T, br["b1"].T, br["b2"].T], axis=0)  # [288,1]

    wqT = jnp.stack([(lp["wq"] * scale).T for lp in layers])    # [3,32,32]
    wk_all = jnp.concatenate([lp["wk"] for lp in layers], axis=1)   # [32,96]
    bk_all = jnp.concatenate([lp["bk"] for lp in layers], axis=1)   # [1,96]
    wvT_heads = jnp.concatenate(
        [lp["wv"].T.reshape(N_HEADS, D_HEAD, D_MODEL) for lp in layers],
        axis=1)                                                 # [8, 12, 32]
    bvT_heads = jnp.concatenate(
        [lp["bv"].T.reshape(N_HEADS, D_HEAD, 1) for lp in layers],
        axis=1)                                                 # [8, 12, 1]
    woT_heads = jnp.stack(
        [lp["wo"].T.reshape(D_MODEL, N_HEADS, D_HEAD).transpose(1, 0, 2)
         for lp in layers])                                     # [3, 8, 32, 4]
    attn_vec = jnp.stack([
        jnp.concatenate([(lp["bq"] * scale).T, lp["bo"].T,
                         lp["gamma"].T, lp["beta"].T], axis=1)
        for lp in layers])                                      # [3, 32, 4]

    w1sT = st["w1"].T                                           # [64, 32]
    w2sT_pad = jnp.zeros((N_SITE_PAD, 2 * D_MODEL), jnp.float32
                         ).at[:N_SITE_TYPES].set(st["w2"].T)    # [8, 64]
    b2sT_pad = jnp.zeros((N_SITE_PAD, 1), jnp.float32
                         ).at[:N_SITE_TYPES].set(st["b2"].T)    # [8, 1]
    site_vec = jnp.concatenate(
        [st["gamma"].T, st["beta"].T, st["b1"].T, b2sT_pad], axis=0)  # [136,1]

    return [w1bT, w2bT, brige_vec,
            wqT, wk_all, bk_all, wvT_heads, bvT_heads, woT_heads, attn_vec,
            w1sT, w2sT_pad, site_vec]


# ------------------------------------------------------------------ launcher
def fused_forward(protT, sub, subT, smask3, kmask, weights, lp_tile):
    B, _, lp_pad = protT.shape
    ls_pad = sub.shape[1]
    n_tiles = lp_pad // lp_tile

    def const_spec(w):
        nd = w.ndim
        return pl.BlockSpec(w.shape, lambda b, t, _nd=nd: (0,) * _nd)

    in_specs = ([pl.BlockSpec((1, D_PROT_IN, lp_tile), lambda b, t: (b, 0, t)),
                 pl.BlockSpec((1, ls_pad, D_MODEL), lambda b, t: (b, 0, 0)),
                 pl.BlockSpec((1, D_MODEL, ls_pad), lambda b, t: (b, 0, 0)),
                 pl.BlockSpec((1, ls_pad, 1), lambda b, t: (b, 0, 0)),
                 pl.BlockSpec((N_HEADS * ls_pad, N_LAYERS * D_MODEL),
                              lambda b, t: (0, 0))]
                + [const_spec(w) for w in weights])

    return pl.pallas_call(
        _fused_kernel,
        grid=(B, n_tiles),
        in_specs=in_specs,
        out_specs=pl.BlockSpec((1, N_SITE_PAD, lp_tile), lambda b, t: (b, 0, t)),
        out_shape=jax.ShapeDtypeStruct((B, N_SITE_PAD, lp_pad), jnp.float32),
        compiler_params=pltpu.CompilerParams(
            dimension_semantics=("parallel", "parallel")),
    )(protT, sub, subT, smask3, kmask, *weights)


# -------------------------------------------------------------------- params
def _init_linear(key, din, dout):
    wk, bk = jax.random.split(key)
    lim = 1.0 / np.sqrt(din)
    w = jax.random.uniform(wk, (din, dout), jnp.float32, -lim, lim)
    b = jax.random.uniform(bk, (1, dout), jnp.float32, -lim, lim)
    return w, b


def _init_feedforward(key, din, dout):
    k1, k2 = jax.random.split(key)
    w1, b1 = _init_linear(k1, din, 2 * din)
    w2, b2 = _init_linear(k2, 2 * din, dout)
    return dict(gamma=jnp.ones((1, din), jnp.float32),
                beta=jnp.zeros((1, din), jnp.float32),
                w1=w1, b1=b1, w2=w2, b2=b2)


def _init_attn_layer(key, d):
    ks = jax.random.split(key, 4)
    wq, bq = _init_linear(ks[0], d, d)
    wk, bk = _init_linear(ks[1], d, d)
    wv, bv = _init_linear(ks[2], d, d)
    wo, bo = _init_linear(ks[3], d, d)
    return dict(wq=wq, bq=bq, wk=wk, bk=bk, wv=wv, bv=bv, wo=wo, bo=bo,
                gamma=jnp.ones((1, d), jnp.float32),
                beta=jnp.zeros((1, d), jnp.float32))


def init_params(key):
    kb, ki, ks = jax.random.split(key, 3)
    return dict(
        brige=_init_feedforward(kb, D_PROT_IN, D_MODEL),
        interaction=[_init_attn_layer(k, D_MODEL)
                     for k in jax.random.split(ki, N_LAYERS)],
        site=_init_feedforward(ks, D_MODEL, N_SITE_TYPES),
    )


# ------------------------------------------------------------------- forward
def enzyme_active_site_forward(params, batch):
    # TODO(synk): enzyme_attn_model / rxn_attn_model are external graph
    # encoders (definitions not provided); their outputs are supplied in batch.
    protein_node_feature = batch["protein_node_feature"]        # [total_res, 64]
    num_residues = list(batch["num_residues"])                  # static python list
    sub = batch["substrate_node_feature"]                       # [B, Ls, 32]
    smask = batch["substrate_mask"]                             # [B, Ls]

    B = len(num_residues)
    total_res = int(sum(num_residues))
    lmax = int(max(num_residues))
    ls = sub.shape[1]
    ls_pad = max(8, -(-ls // 8) * 8)

    # Residue tiling: one tile for short proteins, 512-row tiles otherwise
    # (bounds per-step VMEM on v7x/v5e and lets megacore split long proteins).
    if lmax <= LP_TILE_MAX:
        lp_tile = max(8, -(-lmax // 8) * 8)
        lp_pad = lp_tile
    else:
        lp_tile = LP_TILE_MAX
        lp_pad = -(-lmax // LP_TILE_MAX) * LP_TILE_MAX

    # Static host-side index construction: no device->host sync anywhere.
    offsets = np.cumsum([0] + num_residues)[:-1]
    row_idx = np.full((B, lp_pad), total_res, dtype=np.int32)   # -> zero row
    mask_np = np.zeros((B, lmax), dtype=np.uint8)
    valid_rows = []
    for i, n in enumerate(num_residues):
        row_idx[i, :n] = offsets[i] + np.arange(n, dtype=np.int32)
        mask_np[i, :n] = 1
        valid_rows.append(i * lp_pad + np.arange(n, dtype=np.int32))
    valid_idx = jnp.asarray(np.concatenate(valid_rows))
    protein_mask = jnp.asarray(mask_np)

    # pack_residue_feats as a single gather (zero row appended for padding),
    # delivered to the kernel feature-major ([B, 64, Lp]).
    flat_pad = jnp.concatenate(
        [protein_node_feature,
         jnp.zeros((1, protein_node_feature.shape[1]), protein_node_feature.dtype)],
        axis=0)
    prot_padded = jnp.take(flat_pad, jnp.asarray(row_idx.reshape(-1)), axis=0)
    protT = prot_padded.reshape(B, lp_pad, D_PROT_IN).transpose(0, 2, 1)

    if ls_pad != ls:
        sub = jnp.pad(sub, ((0, 0), (0, ls_pad - ls), (0, 0)))
        smask = jnp.pad(smask, ((0, 0), (0, ls_pad - ls)))
    subT = sub.transpose(0, 2, 1)                               # [B, 32, Ls]
    smask3 = smask.astype(jnp.float32).reshape(B, ls_pad, 1)

    # Static block-diagonal head mask: row h*Ls+k keeps only head-h's feature
    # columns of each layer's 32-wide K block.
    rows = np.arange(N_HEADS * ls_pad)[:, None] // ls_pad
    cols = (np.arange(N_LAYERS * D_MODEL)[None, :] % D_MODEL) // D_HEAD
    kmask = jnp.asarray((rows == cols).astype(np.float32))

    weights = prepare_fused_params(params)
    logitsT = fused_forward(protT, sub, subT, smask3, kmask, weights, lp_tile)

    # protein_node_feature[protein_mask.bool()] (row-major over batch, seq)
    logits = logitsT.transpose(0, 2, 1).reshape(B * lp_pad, N_SITE_PAD)
    out = jnp.take(logits, valid_idx, axis=0)[:, :N_SITE_TYPES]
    return out, protein_mask


# --------------------------------------------------------- pure-JAX reference
def _reference_forward(params, batch):
    prot = batch["protein_node_feature"]
    num_residues = list(batch["num_residues"])
    sub = batch["substrate_node_feature"]
    smask = batch["substrate_mask"].astype(jnp.float32)

    def ff(x, p):
        xn = (x - jnp.mean(x, -1, keepdims=True)) * jax.lax.rsqrt(
            jnp.var(x, -1, keepdims=True) + LN_EPS) * p["gamma"] + p["beta"]
        h = _gelu(xn @ p["w1"] + p["b1"])
        return h @ p["w2"] + p["b2"]

    def ln(x, g, b):
        return (x - jnp.mean(x, -1, keepdims=True)) * jax.lax.rsqrt(
            jnp.var(x, -1, keepdims=True) + LN_EPS) * g + b

    x = ff(prot, params["brige"])
    B, lmax = len(num_residues), max(num_residues)
    padded = jnp.zeros((B, lmax, D_MODEL), jnp.float32)
    off = 0
    for i, n in enumerate(num_residues):
        padded = padded.at[i, :n].set(x[off:off + n])
        off += n
    x = padded
    neg = (1.0 - smask)[:, None, None, :] * 1e9
    for lp in params["interaction"]:
        q = x @ lp["wq"] + lp["bq"]
        k = sub @ lp["wk"] + lp["bk"]
        v = sub @ lp["wv"] + lp["bv"]
        qh = q.reshape(B, -1, N_HEADS, D_HEAD).transpose(0, 2, 1, 3)
        kh = k.reshape(B, -1, N_HEADS, D_HEAD).transpose(0, 2, 1, 3)
        vh = v.reshape(B, -1, N_HEADS, D_HEAD).transpose(0, 2, 1, 3)
        s = jnp.einsum('bhqe,bhke->bhqk', qh, kh) / np.sqrt(D_HEAD) - neg
        a = jax.nn.softmax(s, axis=-1)
        ctx = jnp.einsum('bhqk,bhke->bhqe', a, vh)
        ctx = ctx.transpose(0, 2, 1, 3).reshape(B, -1, D_MODEL)
        x = ln(x + ctx @ lp["wo"] + lp["bo"], lp["gamma"], lp["beta"])
    logits = ff(x, params["site"])
    return jnp.concatenate([logits[i, :n] for i, n in enumerate(num_residues)], 0)


# ---------------------------------------------------------------------- main
if __name__ == "__main__":
    key = jax.random.PRNGKey(0)
    k_prot, k_sub, k_par = jax.random.split(key, 3)

    num_residues = [10, 14]
    total_res = sum(num_residues)
    B, Ls = 2, 8

    protein_node_feature = jax.random.normal(k_prot, (total_res, D_PROT_IN), jnp.float32)
    substrate_node_feature = jax.random.normal(k_sub, (B, Ls, D_MODEL), jnp.float32)
    substrate_mask = np.ones((B, Ls), dtype=np.uint8)
    substrate_mask[1, 6:] = 0                       # second reaction graph is shorter
    substrate_mask = jnp.asarray(substrate_mask)

    params = init_params(k_par)
    batch = dict(protein_node_feature=protein_node_feature,
                 num_residues=num_residues,
                 substrate_node_feature=substrate_node_feature,
                 substrate_mask=substrate_mask)

    out, protein_mask = enzyme_active_site_forward(params, batch)
    jax.block_until_ready(out)
    jax.block_until_ready(protein_mask)
    assert out.shape == (total_res, N_SITE_TYPES)
    assert protein_mask.shape == (B, max(num_residues))

    ref = _reference_forward(params, batch)
    err = float(jnp.max(jnp.abs(out - ref)))
    assert np.isfinite(err) and err < 5e-2, f"max |err| = {err}"
    print("KERNEL_OK")
</pallas_src>

<mosaic_0001>
module attributes {stable_mosaic.version = 11 : i64} {
  func.func @_fused_kernel(%arg0: i32, %arg1: i32, %arg2: memref<1x64x16xf32, #tpu.memory_space<vmem>>, %arg3: memref<1x8x32xf32, #tpu.memory_space<vmem>>, %arg4: memref<1x32x8xf32, #tpu.memory_space<vmem>>, %arg5: memref<1x8x1xf32, #tpu.memory_space<vmem>>, %arg6: memref<64x96xf32, #tpu.memory_space<vmem>>, %arg7: memref<128x64xf32, #tpu.memory_space<vmem>>, %arg8: memref<32x128xf32, #tpu.memory_space<vmem>>, %arg9: memref<288x1xf32, #tpu.memory_space<vmem>>, %arg10: memref<3x32x32xf32, #tpu.memory_space<vmem>>, %arg11: memref<32x96xf32, #tpu.memory_space<vmem>>, %arg12: memref<1x96xf32, #tpu.memory_space<vmem>>, %arg13: memref<8x12x32xf32, #tpu.memory_space<vmem>>, %arg14: memref<8x12x1xf32, #tpu.memory_space<vmem>>, %arg15: memref<3x8x32x4xf32, #tpu.memory_space<vmem>>, %arg16: memref<3x32x4xf32, #tpu.memory_space<vmem>>, %arg17: memref<64x32xf32, #tpu.memory_space<vmem>>, %arg18: memref<8x64xf32, #tpu.memory_space<vmem>>, %arg19: memref<136x1xf32, #tpu.memory_space<vmem>>, %arg20: memref<1x8x16xf32, #tpu.memory_space<vmem>>) attributes {dimension_semantics = [#tpu.dimension_semantics<parallel>, #tpu.dimension_semantics<parallel>], iteration_bounds = array<i64: 2, 1>, scalar_prefetch = 0 : i64, scratch_operands = 0 : i64, tpu.core_type = #tpu.core_type<tc>, window_params = [{transform_indices = @transform_0, window_bounds = array<i64: 1, 64, 16>}, {transform_indices = @transform_1, window_bounds = array<i64: 1, 8, 32>}, {transform_indices = @transform_2, window_bounds = array<i64: 1, 32, 8>}, {transform_indices = @transform_3, window_bounds = array<i64: 1, 8, 1>}, {pipeline_mode = #tpu.pipeline_mode<synchronous>, transform_indices = @transform_4, window_bounds = array<i64: 64, 96>}, {pipeline_mode = #tpu.pipeline_mode<synchronous>, transform_indices = @transform_5, window_bounds = array<i64: 128, 64>}, {pipeline_mode = #tpu.pipeline_mode<synchronous>, transform_indices = @transform_6, window_bounds = array<i64: 32, 128>}, {pipeline_mode = #tpu.pipeline_mode<synchronous>, transform_indices = @transform_7, window_bounds = array<i64: 288, 1>}, {pipeline_mode = #tpu.pipeline_mode<synchronous>, transform_indices = @transform_8, window_bounds = array<i64: 3, 32, 32>}, {pipeline_mode = #tpu.pipeline_mode<synchronous>, transform_indices = @transform_9, window_bounds = array<i64: 32, 96>}, {pipeline_mode = #tpu.pipeline_mode<synchronous>, transform_indices = @transform_10, window_bounds = array<i64: 1, 96>}, {pipeline_mode = #tpu.pipeline_mode<synchronous>, transform_indices = @transform_11, window_bounds = array<i64: 8, 12, 32>}, {pipeline_mode = #tpu.pipeline_mode<synchronous>, transform_indices = @transform_12, window_bounds = array<i64: 8, 12, 1>}, {pipeline_mode = #tpu.pipeline_mode<synchronous>, transform_indices = @transform_13, window_bounds = array<i64: 3, 8, 32, 4>}, {pipeline_mode = #tpu.pipeline_mode<synchronous>, transform_indices = @transform_14, window_bounds = array<i64: 3, 32, 4>}, {pipeline_mode = #tpu.pipeline_mode<synchronous>, transform_indices = @transform_15, window_bounds = array<i64: 64, 32>}, {pipeline_mode = #tpu.pipeline_mode<synchronous>, transform_indices = @transform_16, window_bounds = array<i64: 8, 64>}, {pipeline_mode = #tpu.pipeline_mode<synchronous>, transform_indices = @transform_17, window_bounds = array<i64: 136, 1>}, {transform_indices = @transform_18, window_bounds = array<i64: 1, 8, 16>}]} {
    %c0 = arith.constant 0 : index
    %c0_0 = arith.constant 0 : index
    %0 = vector.load %arg9[%c0, %c0_0] : memref<288x1xf32, #tpu.memory_space<vmem>>, vector<288x1xf32>
    %1 = vector.extract_strided_slice %0 {offsets = [0, 0], sizes = [64, 1], strides = [1, 1]} : vector<288x1xf32> to vector<64x1xf32>
    %2 = vector.extract_strided_slice %0 {offsets = [64, 0], sizes = [64, 1], strides = [1, 1]} : vector<288x1xf32> to vector<64x1xf32>
    %3 = vector.extract_strided_slice %0 {offsets = [128, 0], sizes = [128, 1], strides = [1, 1]} : vector<288x1xf32> to vector<128x1xf32>
    %4 = vector.extract_strided_slice %0 {offsets = [256, 0], sizes = [32, 1], strides = [1, 1]} : vector<288x1xf32> to vector<32x1xf32>
    %c0_1 = arith.constant 0 : index
    %c0_2 = arith.constant 0 : index
    %c0_3 = arith.constant 0 : index
    %5 = vector.load %arg2[%c0_1, %c0_2, %c0_3] : memref<1x64x16xf32, #tpu.memory_space<vmem>>, vector<1x64x16xf32>
    %6 = vector.shape_cast %5 : vector<1x64x16xf32> to vector<64x16xf32>
    %cst = arith.constant dense<0.000000e+00> : vector<16xf32>
    %7 = vector.multi_reduction <add>, %6, %cst [0] : vector<64x16xf32> to vector<16xf32>
    %8 = vector.shape_cast %7 : vector<16xf32> to vector<1x16xf32>
    %cst_4 = arith.constant 6.400000e+01 : f32
    %9 = vector.broadcast %cst_4 : f32 to vector<1x16xf32>
    %10 = arith.divf %8, %9 : vector<1x16xf32>
    %11 = vector.broadcast %10 : vector<1x16xf32> to vector<64x16xf32>
    %12 = arith.subf %6, %11 : vector<64x16xf32>
    %13 = arith.mulf %12, %12 : vector<64x16xf32>
    %cst_5 = arith.constant dense<0.000000e+00> : vector<16xf32>
    %14 = vector.multi_reduction <add>, %13, %cst_5 [0] : vector<64x16xf32> to vector<16xf32>
    %15 = vector.shape_cast %14 : vector<16xf32> to vector<1x16xf32>
    %cst_6 = arith.constant 6.400000e+01 : f32
    %16 = vector.broadcast %cst_6 : f32 to vector<1x16xf32>
    %17 = arith.divf %15, %16 : vector<1x16xf32>
    %18 = vector.broadcast %10 : vector<1x16xf32> to vector<64x16xf32>
    %19 = arith.subf %6, %18 : vector<64x16xf32>
    %cst_7 = arith.constant 9.99999997E-7 : f32
    %20 = vector.broadcast %cst_7 : f32 to vector<1x16xf32>
    %21 = arith.addf %17, %20 : vector<1x16xf32>
    %22 = math.rsqrt %21 : vector<1x16xf32>
    %23 = vector.broadcast %22 : vector<1x16xf32> to vector<64x16xf32>
    %24 = arith.mulf %19, %23 : vector<64x16xf32>
    %25 = vector.broadcast %1 : vector<64x1xf32> to vector<64x16xf32>
    %26 = arith.mulf %24, %25 : vector<64x16xf32>
    %27 = vector.broadcast %2 : vector<64x1xf32> to vector<64x16xf32>
    %28 = arith.addf %26, %27 : vector<64x16xf32>
    %c0_8 = arith.constant 0 : index
    %c0_9 = arith.constant 0 : index
    %29 = vector.load %arg7[%c0_8, %c0_9] : memref<128x64xf32, #tpu.memory_space<vmem>>, vector<128x64xf32>
    %cst_10 = arith.constant dense<0.000000e+00> : vector<128x16xf32>
    %30 = tpu.matmul %29, %28, %cst_10 {dimension_numbers = #tpu.dot_dimension_numbers<[1], [0], [0], [1], [0, 0, 1, 1], [], []>} : vector<128x64xf32>, vector<64x16xf32>, vector<128x16xf32> -> vector<128x16xf32>
    %31 = vector.broadcast %3 : vector<128x1xf32> to vector<128x16xf32>
    %32 = arith.addf %30, %31 : vector<128x16xf32>
    %cst_11 = arith.constant 5.000000e-01 : f32
    %33 = vector.broadcast %cst_11 : f32 to vector<128x16xf32>
    %34 = arith.mulf %33, %32 : vector<128x16xf32>
    %cst_12 = arith.constant 4.471500e-02 : f32
    %35 = vector.broadcast %cst_12 : f32 to vector<128x16xf32>
    %36 = arith.mulf %35, %32 : vector<128x16xf32>
    %37 = arith.mulf %36, %32 : vector<128x16xf32>
    %38 = arith.mulf %37, %32 : vector<128x16xf32>
    %39 = arith.addf %32, %38 : vector<128x16xf32>
    %cst_13 = arith.constant 0.797884583 : f32
    %40 = vector.broadcast %cst_13 : f32 to vector<128x16xf32>
    %41 = arith.mulf %40, %39 : vector<128x16xf32>
    %42 = math.tanh %41 : vector<128x16xf32>
    %cst_14 = arith.constant 1.000000e+00 : f32
    %43 = vector.broadcast %cst_14 : f32 to vector<128x16xf32>
    %44 = arith.addf %43, %42 : vector<128x16xf32>
    %45 = arith.mulf %34, %44 : vector<128x16xf32>
    %c0_15 = arith.constant 0 : index
    %c0_16 = arith.constant 0 : index
    %46 = vector.load %arg8[%c0_15, %c0_16] : memref<32x128xf32, #tpu.memory_space<vmem>>, vector<32x128xf32>
    %cst_17 = arith.constant dense<0.000000e+00> : vector<32x16xf32>
    %47 = tpu.matmul %46, %45, %cst_17 {dimension_numbers = #tpu.dot_dimension_numbers<[1], [0], [0], [1], [0, 0, 1, 1], [], []>} : vector<32x128xf32>, vector<128x16xf32>, vector<32x16xf32> -> vector<32x16xf32>
    %48 = vector.broadcast %4 : vector<32x1xf32> to vector<32x16xf32>
    %49 = arith.addf %47, %48 : vector<32x16xf32>
    %c0_18 = arith.constant 0 : index
    %c0_19 = arith.constant 0 : index
    %c0_20 = arith.constant 0 : index
    %50 = vector.load %arg3[%c0_18, %c0_19, %c0_20] : memref<1x8x32xf32, #tpu.memory_space<vmem>>, vector<1x8x32xf32>
    %51 = vector.shape_cast %50 : vector<1x8x32xf32> to vector<8x32xf32>
    %c0_21 = arith.constant 0 : index
    %c0_22 = arith.constant 0 : index
    %c0_23 = arith.constant 0 : index
    %52 = vector.load %arg4[%c0_21, %c0_22, %c0_23] : memref<1x32x8xf32, #tpu.memory_space<vmem>>, vector<1x32x8xf32>
    %53 = vector.shape_cast %52 : vector<1x32x8xf32> to vector<32x8xf32>
    %c0_24 = arith.constant 0 : index
    %c0_25 = arith.constant 0 : index
    %54 = vector.load %arg11[%c0_24, %c0_25] : memref<32x96xf32, #tpu.memory_space<vmem>>, vector<32x96xf32>
    %cst_26 = arith.constant dense<0.000000e+00> : vector<8x96xf32>
    %55 = tpu.matmul %51, %54, %cst_26 {dimension_numbers = #tpu.dot_dimension_numbers<[1], [0], [0], [1], [0, 0, 1, 1], [], []>} : vector<8x32xf32>, vector<32x96xf32>, vector<8x96xf32> -> vector<8x96xf32>
    %c0_27 = arith.constant 0 : index
    %c0_28 = arith.constant 0 : index
    %56 = vector.load %arg12[%c0_27, %c0_28] : memref<1x96xf32, #tpu.memory_space<vmem>>, vector<1x96xf32>
    %57 = vector.broadcast %56 : vector<1x96xf32> to vector<8x96xf32>
    %58 = arith.addf %55, %57 : vector<8x96xf32>
    %59 = tpu.concatenate %58, %58, %58, %58, %58, %58, %58, %58 in 0 : vector<8x96xf32>, vector<8x96xf32>, vector<8x96xf32>, vector<8x96xf32>, vector<8x96xf32>, vector<8x96xf32>, vector<8x96xf32>, vector<8x96xf32> -> vector<64x96xf32>
    %c0_29 = arith.constant 0 : index
    %c0_30 = arith.constant 0 : index
    %60 = vector.load %arg6[%c0_29, %c0_30] : memref<64x96xf32, #tpu.memory_space<vmem>>, vector<64x96xf32>
    %61 = arith.mulf %59, %60 : vector<64x96xf32>
    %62 = vector.shape_cast %53 : vector<32x8xf32> to vector<1x32x8xf32>
    %63 = vector.shape_cast %62 : vector<1x32x8xf32> to vector<1x32x8xf32>
    %64 = vector.broadcast %63 : vector<1x32x8xf32> to vector<8x32x8xf32>
    %c0_31 = arith.constant 0 : index
    %c0_32 = arith.constant 0 : index
    %c0_33 = arith.constant 0 : index
    %65 = vector.load %arg13[%c0_31, %c0_32, %c0_33] : memref<8x12x32xf32, #tpu.memory_space<vmem>>, vector<8x12x32xf32>
    "tpu.trace_start"() <{level = 10 : i32, message = "hfd,hdk->hfk"}> : () -> ()
    %cst_34 = arith.constant dense<0.000000e+00> : vector<8x12x8xf32>
    %66 = tpu.matmul %65, %64, %cst_34 {dimension_numbers = #tpu.dot_dimension_numbers<[2], [1], [1], [2], [0, 0, 0, 1, 1, 2], [0], [0]>} : vector<8x12x32xf32>, vector<8x32x8xf32>, vector<8x12x8xf32> -> vector<8x12x8xf32>
    "tpu.trace_stop"() : () -> ()
    %c0_35 = arith.constant 0 : index
    %c0_36 = arith.constant 0 : index
    %c0_37 = arith.constant 0 : index
    %67 = vector.load %arg14[%c0_35, %c0_36, %c0_37] : memref<8x12x1xf32, #tpu.memory_space<vmem>>, vector<8x12x1xf32>
    %68 = vector.broadcast %67 : vector<8x12x1xf32> to vector<8x12x8xf32>
    %69 = arith.addf %66, %68 : vector<8x12x8xf32>
    %c0_38 = arith.constant 0 : index
    %c0_39 = arith.constant 0 : index
    %c0_40 = arith.constant 0 : index
    %70 = vector.load %arg5[%c0_38, %c0_39, %c0_40] : memref<1x8x1xf32, #tpu.memory_space<vmem>>, vector<1x8x1xf32>
    %71 = vector.shape_cast %70 : vector<1x8x1xf32> to vector<8x1xf32>
    %cst_41 = arith.constant 1.000000e+00 : f32
    %72 = vector.broadcast %cst_41 : f32 to vector<8x1xf32>
    %73 = arith.subf %72, %71 : vector<8x1xf32>
    %cst_42 = arith.constant 1.000000e+09 : f32
    %74 = vector.broadcast %cst_42 : f32 to vector<8x1xf32>
    %75 = arith.mulf %73, %74 : vector<8x1xf32>
    %76 = vector.shape_cast %75 : vector<8x1xf32> to vector<1x8x1xf32>
    %c0_43 = arith.constant 0 : index
    %c0_44 = arith.constant 0 : index
    %c0_45 = arith.constant 0 : index
    %77 = vector.load %arg16[%c0_43, %c0_44, %c0_45] : memref<3x32x4xf32, #tpu.memory_space<vmem>>, vector<1x32x4xf32>
    %78 = vector.shape_cast %77 : vector<1x32x4xf32> to vector<32x4xf32>
    %79 = vector.extract_strided_slice %78 {offsets = [0, 0], sizes = [32, 1], strides = [1, 1]} : vector<32x4xf32> to vector<32x1xf32>
    %80 = vector.extract_strided_slice %78 {offsets = [0, 1], sizes = [32, 1], strides = [1, 1]} : vector<32x4xf32> to vector<32x1xf32>
    %81 = vector.extract_strided_slice %78 {offsets = [0, 2], sizes = [32, 1], strides = [1, 1]} : vector<32x4xf32> to vector<32x1xf32>
    %82 = vector.extract_strided_slice %78 {offsets = [0, 3], sizes = [32, 1], strides = [1, 1]} : vector<32x4xf32> to vector<32x1xf32>
    %c0_46 = arith.constant 0 : index
    %c0_47 = arith.constant 0 : index
    %c0_48 = arith.constant 0 : index
    %83 = vector.load %arg10[%c0_46, %c0_47, %c0_48] : memref<3x32x32xf32, #tpu.memory_space<vmem>>, vector<1x32x32xf32>
    %84 = vector.shape_cast %83 : vector<1x32x32xf32> to vector<32x32xf32>
    %cst_49 = arith.constant dense<0.000000e+00> : vector<32x16xf32>
    %85 = tpu.matmul %84, %49, %cst_49 {dimension_numbers = #tpu.dot_dimension_numbers<[1], [0], [0], [1], [0, 0, 1, 1], [], []>} : vector<32x32xf32>, vector<32x16xf32>, vector<32x16xf32> -> vector<32x16xf32>
    %86 = vector.broadcast %79 : vector<32x1xf32> to vector<32x16xf32>
    %87 = arith.addf %85, %86 : vector<32x16xf32>
    %88 = vector.extract_strided_slice %61 {offsets = [0, 0], sizes = [64, 32], strides = [1, 1]} : vector<64x96xf32> to vector<64x32xf32>
    %cst_50 = arith.constant dense<0.000000e+00> : vector<64x16xf32>
    %89 = tpu.matmul %88, %87, %cst_50 {dimension_numbers = #tpu.dot_dimension_numbers<[1], [0], [0], [1], [0, 0, 1, 1], [], []>} : vector<64x32xf32>, vector<32x16xf32>, vector<64x16xf32> -> vector<64x16xf32>
    %90 = vector.shape_cast %89 : vector<64x16xf32> to vector<8x8x16xf32>
    %91 = vector.broadcast %76 : vector<1x8x1xf32> to vector<8x8x16xf32>
    %92 = arith.subf %90, %91 : vector<8x8x16xf32>
    %cst_51 = arith.constant dense<0xFF800000> : vector<8x16xf32>
    %93 = vector.multi_reduction <maximumf>, %92, %cst_51 [1] : vector<8x8x16xf32> to vector<8x16xf32>
    %94 = vector.shape_cast %93 : vector<8x16xf32> to vector<8x1x16xf32>
    %95 = vector.broadcast %94 : vector<8x1x16xf32> to vector<8x8x16xf32>
    %96 = arith.subf %92, %95 : vector<8x8x16xf32>
    %97 = math.exp %96 : vector<8x8x16xf32>
    %cst_52 = arith.constant dense<0.000000e+00> : vector<8x16xf32>
    %98 = vector.multi_reduction <add>, %97, %cst_52 [1] : vector<8x8x16xf32> to vector<8x16xf32>
    %99 = vector.shape_cast %98 : vector<8x16xf32> to vector<8x1x16xf32>
    %100 = tpu.reciprocal %99 : vector<8x1x16xf32> -> vector<8x1x16xf32>
    %101 = vector.broadcast %100 : vector<8x1x16xf32> to vector<8x8x16xf32>
    %102 = arith.mulf %97, %101 : vector<8x8x16xf32>
    %c0_53 = arith.constant 0 : index
    %c0_54 = arith.constant 0 : index
    %c0_55 = arith.constant 0 : index
    %c0_56 = arith.constant 0 : index
    %103 = vector.load %arg15[%c0_53, %c0_54, %c0_55, %c0_56] : memref<3x8x32x4xf32, #tpu.memory_space<vmem>>, vector<1x8x32x4xf32>
    %104 = vector.shape_cast %103 : vector<1x8x32x4xf32> to vector<8x32x4xf32>
    %105 = vector.extract_strided_slice %69 {offsets = [0, 0, 0], sizes = [8, 4, 8], strides = [1, 1, 1]} : vector<8x12x8xf32> to vector<8x4x8xf32>
    "tpu.trace_start"() <{level = 10 : i32, message = "hde,hek->hdk"}> : () -> ()
    %cst_57 = arith.constant dense<0.000000e+00> : vector<8x32x8xf32>
    %106 = tpu.matmul %104, %105, %cst_57 {dimension_numbers = #tpu.dot_dimension_numbers<[2], [1], [1], [2], [0, 0, 0, 1, 1, 2], [0], [0]>} : vector<8x32x4xf32>, vector<8x4x8xf32>, vector<8x32x8xf32> -> vector<8x32x8xf32>
    "tpu.trace_stop"() : () -> ()
    "tpu.trace_start"() <{level = 10 : i32, message = "hdk,hkq->hdq"}> : () -> ()
    %cst_58 = arith.constant dense<0.000000e+00> : vector<8x32x16xf32>
    %107 = tpu.matmul %106, %102, %cst_58 {dimension_numbers = #tpu.dot_dimension_numbers<[2], [1], [1], [2], [0, 0, 0, 1, 1, 2], [0], [0]>} : vector<8x32x8xf32>, vector<8x8x16xf32>, vector<8x32x16xf32> -> vector<8x32x16xf32>
    "tpu.trace_stop"() : () -> ()
    %cst_59 = arith.constant dense<0.000000e+00> : vector<32x16xf32>
    %108 = vector.multi_reduction <add>, %107, %cst_59 [0] : vector<8x32x16xf32> to vector<32x16xf32>
    %109 = vector.broadcast %80 : vector<32x1xf32> to vector<32x16xf32>
    %110 = arith.addf %108, %109 : vector<32x16xf32>
    %111 = arith.addf %49, %110 : vector<32x16xf32>
    %cst_60 = arith.constant dense<0.000000e+00> : vector<16xf32>
    %112 = vector.multi_reduction <add>, %111, %cst_60 [0] : vector<32x16xf32> to vector<16xf32>
    %113 = vector.shape_cast %112 : vector<16xf32> to vector<1x16xf32>
    %cst_61 = arith.constant 3.200000e+01 : f32
    %114 = vector.broadcast %cst_61 : f32 to vector<1x16xf32>
    %115 = arith.divf %113, %114 : vector<1x16xf32>
    %116 = vector.broadcast %115 : vector<1x16xf32> to vector<32x16xf32>
    %117 = arith.subf %111, %116 : vector<32x16xf32>
    %118 = arith.mulf %117, %117 : vector<32x16xf32>
    %cst_62 = arith.constant dense<0.000000e+00> : vector<16xf32>
    %119 = vector.multi_reduction <add>, %118, %cst_62 [0] : vector<32x16xf32> to vector<16xf32>
    %120 = vector.shape_cast %119 : vector<16xf32> to vector<1x16xf32>
    %cst_63 = arith.constant 3.200000e+01 : f32
    %121 = vector.broadcast %cst_63 : f32 to vector<1x16xf32>
    %122 = arith.divf %120, %121 : vector<1x16xf32>
    %123 = vector.broadcast %115 : vector<1x16xf32> to vector<32x16xf32>
    %124 = arith.subf %111, %123 : vector<32x16xf32>
    %cst_64 = arith.constant 9.99999997E-7 : f32
    %125 = vector.broadcast %cst_64 : f32 to vector<1x16xf32>
    %126 = arith.addf %122, %125 : vector<1x16xf32>
    %127 = math.rsqrt %126 : vector<1x16xf32>
    %128 = vector.broadcast %127 : vector<1x16xf32> to vector<32x16xf32>
    %129 = arith.mulf %124, %128 : vector<32x16xf32>
    %130 = vector.broadcast %81 : vector<32x1xf32> to vector<32x16xf32>
    %131 = arith.mulf %129, %130 : vector<32x16xf32>
    %132 = vector.broadcast %82 : vector<32x1xf32> to vector<32x16xf32>
    %133 = arith.addf %131, %132 : vector<32x16xf32>
    %c1 = arith.constant 1 : index
    %c0_65 = arith.constant 0 : index
    %c0_66 = arith.constant 0 : index
    %134 = vector.load %arg16[%c1, %c0_65, %c0_66] : memref<3x32x4xf32, #tpu.memory_space<vmem>>, vector<1x32x4xf32>
    %135 = vector.shape_cast %134 : vector<1x32x4xf32> to vector<32x4xf32>
    %136 = vector.extract_strided_slice %135 {offsets = [0, 0], sizes = [32, 1], strides = [1, 1]} : vector<32x4xf32> to vector<32x1xf32>
    %137 = vector.extract_strided_slice %135 {offsets = [0, 1], sizes = [32, 1], strides = [1, 1]} : vector<32x4xf32> to vector<32x1xf32>
    %138 = vector.extract_strided_slice %135 {offsets = [0, 2], sizes = [32, 1], strides = [1, 1]} : vector<32x4xf32> to vector<32x1xf32>
    %139 = vector.extract_strided_slice %135 {offsets = [0, 3], sizes = [32, 1], strides = [1, 1]} : vector<32x4xf32> to vector<32x1xf32>
    %c1_67 = arith.constant 1 : index
    %c0_68 = arith.constant 0 : index
    %c0_69 = arith.constant 0 : index
    %140 = vector.load %arg10[%c1_67, %c0_68, %c0_69] : memref<3x32x32xf32, #tpu.memory_space<vmem>>, vector<1x32x32xf32>
    %141 = vector.shape_cast %140 : vector<1x32x32xf32> to vector<32x32xf32>
    %cst_70 = arith.constant dense<0.000000e+00> : vector<32x16xf32>
    %142 = tpu.matmul %141, %133, %cst_70 {dimension_numbers = #tpu.dot_dimension_numbers<[1], [0], [0], [1], [0, 0, 1, 1], [], []>} : vector<32x32xf32>, vector<32x16xf32>, vector<32x16xf32> -> vector<32x16xf32>
    %143 = vector.broadcast %136 : vector<32x1xf32> to vector<32x16xf32>
    %144 = arith.addf %142, %143 : vector<32x16xf32>
    %145 = vector.extract_strided_slice %61 {offsets = [0, 32], sizes = [64, 32], strides = [1, 1]} : vector<64x96xf32> to vector<64x32xf32>
    %cst_71 = arith.constant dense<0.000000e+00> : vector<64x16xf32>
    %146 = tpu.matmul %145, %144, %cst_71 {dimension_numbers = #tpu.dot_dimension_numbers<[1], [0], [0], [1], [0, 0, 1, 1], [], []>} : vector<64x32xf32>, vector<32x16xf32>, vector<64x16xf32> -> vector<64x16xf32>
    %147 = vector.shape_cast %146 : vector<64x16xf32> to vector<8x8x16xf32>
    %148 = vector.broadcast %76 : vector<1x8x1xf32> to vector<8x8x16xf32>
    %149 = arith.subf %147, %148 : vector<8x8x16xf32>
    %cst_72 = arith.constant dense<0xFF800000> : vector<8x16xf32>
    %150 = vector.multi_reduction <maximumf>, %149, %cst_72 [1] : vector<8x8x16xf32> to vector<8x16xf32>
    %151 = vector.shape_cast %150 : vector<8x16xf32> to vector<8x1x16xf32>
    %152 = vector.broadcast %151 : vector<8x1x16xf32> to vector<8x8x16xf32>
    %153 = arith.subf %149, %152 : vector<8x8x16xf32>
    %154 = math.exp %153 : vector<8x8x16xf32>
    %cst_73 = arith.constant dense<0.000000e+00> : vector<8x16xf32>
    %155 = vector.multi_reduction <add>, %154, %cst_73 [1] : vector<8x8x16xf32> to vector<8x16xf32>
    %156 = vector.shape_cast %155 : vector<8x16xf32> to vector<8x1x16xf32>
    %157 = tpu.reciprocal %156 : vector<8x1x16xf32> -> vector<8x1x16xf32>
    %158 = vector.broadcast %157 : vector<8x1x16xf32> to vector<8x8x16xf32>
    %159 = arith.mulf %154, %158 : vector<8x8x16xf32>
    %c1_74 = arith.constant 1 : index
    %c0_75 = arith.constant 0 : index
    %c0_76 = arith.constant 0 : index
    %c0_77 = arith.constant 0 : index
    %160 = vector.load %arg15[%c1_74, %c0_75, %c0_76, %c0_77] : memref<3x8x32x4xf32, #tpu.memory_space<vmem>>, vector<1x8x32x4xf32>
    %161 = vector.shape_cast %160 : vector<1x8x32x4xf32> to vector<8x32x4xf32>
    %162 = vector.extract_strided_slice %69 {offsets = [0, 4, 0], sizes = [8, 4, 8], strides = [1, 1, 1]} : vector<8x12x8xf32> to vector<8x4x8xf32>
    "tpu.trace_start"() <{level = 10 : i32, message = "hde,hek->hdk"}> : () -> ()
    %cst_78 = arith.constant dense<0.000000e+00> : vector<8x32x8xf32>
    %163 = tpu.matmul %161, %162, %cst_78 {dimension_numbers = #tpu.dot_dimension_numbers<[2], [1], [1], [2], [0, 0, 0, 1, 1, 2], [0], [0]>} : vector<8x32x4xf32>, vector<8x4x8xf32>, vector<8x32x8xf32> -> vector<8x32x8xf32>
    "tpu.trace_stop"() : () -> ()
    "tpu.trace_start"() <{level = 10 : i32, message = "hdk,hkq->hdq"}> : () -> ()
    %cst_79 = arith.constant dense<0.000000e+00> : vector<8x32x16xf32>
    %164 = tpu.matmul %163, %159, %cst_79 {dimension_numbers = #tpu.dot_dimension_numbers<[2], [1], [1], [2], [0, 0, 0, 1, 1, 2], [0], [0]>} : vector<8x32x8xf32>, vector<8x8x16xf32>, vector<8x32x16xf32> -> vector<8x32x16xf32>
    "tpu.trace_stop"() : () -> ()
    %cst_80 = arith.constant dense<0.000000e+00> : vector<32x16xf32>
    %165 = vector.multi_reduction <add>, %164, %cst_80 [0] : vector<8x32x16xf32> to vector<32x16xf32>
    %166 = vector.broadcast %137 : vector<32x1xf32> to vector<32x16xf32>
    %167 = arith.addf %165, %166 : vector<32x16xf32>
    %168 = arith.addf %133, %167 : vector<32x16xf32>
    %cst_81 = arith.constant dense<0.000000e+00> : vector<16xf32>
    %169 = vector.multi_reduction <add>, %168, %cst_81 [0] : vector<32x16xf32> to vector<16xf32>
    %170 = vector.shape_cast %169 : vector<16xf32> to vector<1x16xf32>
    %cst_82 = arith.constant 3.200000e+01 : f32
    %171 = vector.broadcast %cst_82 : f32 to vector<1x16xf32>
    %172 = arith.divf %170, %171 : vector<1x16xf32>
    %173 = vector.broadcast %172 : vector<1x16xf32> to vector<32x16xf32>
    %174 = arith.subf %168, %173 : vector<32x16xf32>
    %175 = arith.mulf %174, %174 : vector<32x16xf32>
    %cst_83 = arith.constant dense<0.000000e+00> : vector<16xf32>
    %176 = vector.multi_reduction <add>, %175, %cst_83 [0] : vector<32x16xf32> to vector<16xf32>
    %177 = vector.shape_cast %176 : vector<16xf32> to vector<1x16xf32>
    %cst_84 = arith.constant 3.200000e+01 : f32
    %178 = vector.broadcast %cst_84 : f32 to vector<1x16xf32>
    %179 = arith.divf %177, %178 : vector<1x16xf32>
    %180 = vector.broadcast %172 : vector<1x16xf32> to vector<32x16xf32>
    %181 = arith.subf %168, %180 : vector<32x16xf32>
    %cst_85 = arith.constant 9.99999997E-7 : f32
    %182 = vector.broadcast %cst_85 : f32 to vector<1x16xf32>
    %183 = arith.addf %179, %182 : vector<1x16xf32>
    %184 = math.rsqrt %183 : vector<1x16xf32>
    %185 = vector.broadcast %184 : vector<1x16xf32> to vector<32x16xf32>
    %186 = arith.mulf %181, %185 : vector<32x16xf32>
    %187 = vector.broadcast %138 : vector<32x1xf32> to vector<32x16xf32>
    %188 = arith.mulf %186, %187 : vector<32x16xf32>
    %189 = vector.broadcast %139 : vector<32x1xf32> to vector<32x16xf32>
    %190 = arith.addf %188, %189 : vector<32x16xf32>
    %c2 = arith.constant 2 : index
    %c0_86 = arith.constant 0 : index
    %c0_87 = arith.constant 0 : index
    %191 = vector.load %arg16[%c2, %c0_86, %c0_87] : memref<3x32x4xf32, #tpu.memory_space<vmem>>, vector<1x32x4xf32>
    %192 = vector.shape_cast %191 : vector<1x32x4xf32> to vector<32x4xf32>
    %193 = vector.extract_strided_slice %192 {offsets = [0, 0], sizes = [32, 1], strides = [1, 1]} : vector<32x4xf32> to vector<32x1xf32>
    %194 = vector.extract_strided_slice %192 {offsets = [0, 1], sizes = [32, 1], strides = [1, 1]} : vector<32x4xf32> to vector<32x1xf32>
    %195 = vector.extract_strided_slice %192 {offsets = [0, 2], sizes = [32, 1], strides = [1, 1]} : vector<32x4xf32> to vector<32x1xf32>
    %196 = vector.extract_strided_slice %192 {offsets = [0, 3], sizes = [32, 1], strides = [1, 1]} : vector<32x4xf32> to vector<32x1xf32>
    %c2_88 = arith.constant 2 : index
    %c0_89 = arith.constant 0 : index
    %c0_90 = arith.constant 0 : index
    %197 = vector.load %arg10[%c2_88, %c0_89, %c0_90] : memref<3x32x32xf32, #tpu.memory_space<vmem>>, vector<1x32x32xf32>
    %198 = vector.shape_cast %197 : vector<1x32x32xf32> to vector<32x32xf32>
    %cst_91 = arith.constant dense<0.000000e+00> : vector<32x16xf32>
    %199 = tpu.matmul %198, %190, %cst_91 {dimension_numbers = #tpu.dot_dimension_numbers<[1], [0], [0], [1], [0, 0, 1, 1], [], []>} : vector<32x32xf32>, vector<32x16xf32>, vector<32x16xf32> -> vector<32x16xf32>
    %200 = vector.broadcast %193 : vector<32x1xf32> to vector<32x16xf32>
    %201 = arith.addf %199, %200 : vector<32x16xf32>
    %202 = vector.extract_strided_slice %61 {offsets = [0, 64], sizes = [64, 32], strides = [1, 1]} : vector<64x96xf32> to vector<64x32xf32>
    %cst_92 = arith.constant dense<0.000000e+00> : vector<64x16xf32>
    %203 = tpu.matmul %202, %201, %cst_92 {dimension_numbers = #tpu.dot_dimension_numbers<[1], [0], [0], [1], [0, 0, 1, 1], [], []>} : vector<64x32xf32>, vector<32x16xf32>, vector<64x16xf32> -> vector<64x16xf32>
    %204 = vector.shape_cast %203 : vector<64x16xf32> to vector<8x8x16xf32>
    %205 = vector.broadcast %76 : vector<1x8x1xf32> to vector<8x8x16xf32>
    %206 = arith.subf %204, %205 : vector<8x8x16xf32>
    %cst_93 = arith.constant dense<0xFF800000> : vector<8x16xf32>
    %207 = vector.multi_reduction <maximumf>, %206, %cst_93 [1] : vector<8x8x16xf32> to vector<8x16xf32>
    %208 = vector.shape_cast %207 : vector<8x16xf32> to vector<8x1x16xf32>
    %209 = vector.broadcast %208 : vector<8x1x16xf32> to vector<8x8x16xf32>
    %210 = arith.subf %206, %209 : vector<8x8x16xf32>
    %211 = math.exp %210 : vector<8x8x16xf32>
    %cst_94 = arith.constant dense<0.000000e+00> : vector<8x16xf32>
    %212 = vector.multi_reduction <add>, %211, %cst_94 [1] : vector<8x8x16xf32> to vector<8x16xf32>
    %213 = vector.shape_cast %212 : vector<8x16xf32> to vector<8x1x16xf32>
    %214 = tpu.reciprocal %213 : vector<8x1x16xf32> -> vector<8x1x16xf32>
    %215 = vector.broadcast %214 : vector<8x1x16xf32> to vector<8x8x16xf32>
    %216 = arith.mulf %211, %215 : vector<8x8x16xf32>
    %c2_95 = arith.constant 2 : index
    %c0_96 = arith.constant 0 : index
    %c0_97 = arith.constant 0 : index
    %c0_98 = arith.constant 0 : index
    %217 = vector.load %arg15[%c2_95, %c0_96, %c0_97, %c0_98] : memref<3x8x32x4xf32, #tpu.memory_space<vmem>>, vector<1x8x32x4xf32>
    %218 = vector.shape_cast %217 : vector<1x8x32x4xf32> to vector<8x32x4xf32>
    %219 = vector.extract_strided_slice %69 {offsets = [0, 8, 0], sizes = [8, 4, 8], strides = [1, 1, 1]} : vector<8x12x8xf32> to vector<8x4x8xf32>
    "tpu.trace_start"() <{level = 10 : i32, message = "hde,hek->hdk"}> : () -> ()
    %cst_99 = arith.constant dense<0.000000e+00> : vector<8x32x8xf32>
    %220 = tpu.matmul %218, %219, %cst_99 {dimension_numbers = #tpu.dot_dimension_numbers<[2], [1], [1], [2], [0, 0, 0, 1, 1, 2], [0], [0]>} : vector<8x32x4xf32>, vector<8x4x8xf32>, vector<8x32x8xf32> -> vector<8x32x8xf32>
    "tpu.trace_stop"() : () -> ()
    "tpu.trace_start"() <{level = 10 : i32, message = "hdk,hkq->hdq"}> : () -> ()
    %cst_100 = arith.constant dense<0.000000e+00> : vector<8x32x16xf32>
    %221 = tpu.matmul %220, %216, %cst_100 {dimension_numbers = #tpu.dot_dimension_numbers<[2], [1], [1], [2], [0, 0, 0, 1, 1, 2], [0], [0]>} : vector<8x32x8xf32>, vector<8x8x16xf32>, vector<8x32x16xf32> -> vector<8x32x16xf32>
    "tpu.trace_stop"() : () -> ()
    %cst_101 = arith.constant dense<0.000000e+00> : vector<32x16xf32>
    %222 = vector.multi_reduction <add>, %221, %cst_101 [0] : vector<8x32x16xf32> to vector<32x16xf32>
    %223 = vector.broadcast %194 : vector<32x1xf32> to vector<32x16xf32>
    %224 = arith.addf %222, %223 : vector<32x16xf32>
    %225 = arith.addf %190, %224 : vector<32x16xf32>
    %cst_102 = arith.constant dense<0.000000e+00> : vector<16xf32>
    %226 = vector.multi_reduction <add>, %225, %cst_102 [0] : vector<32x16xf32> to vector<16xf32>
    %227 = vector.shape_cast %226 : vector<16xf32> to vector<1x16xf32>
    %cst_103 = arith.constant 3.200000e+01 : f32
    %228 = vector.broadcast %cst_103 : f32 to vector<1x16xf32>
    %229 = arith.divf %227, %228 : vector<1x16xf32>
    %230 = vector.broadcast %229 : vector<1x16xf32> to vector<32x16xf32>
    %231 = arith.subf %225, %230 : vector<32x16xf32>
    %232 = arith.mulf %231, %231 : vector<32x16xf32>
    %cst_104 = arith.constant dense<0.000000e+00> : vector<16xf32>
    %233 = vector.multi_reduction <add>, %232, %cst_104 [0] : vector<32x16xf32> to vector<16xf32>
    %234 = vector.shape_cast %233 : vector<16xf32> to vector<1x16xf32>
    %cst_105 = arith.constant 3.200000e+01 : f32
    %235 = vector.broadcast %cst_105 : f32 to vector<1x16xf32>
    %236 = arith.divf %234, %235 : vector<1x16xf32>
    %237 = vector.broadcast %229 : vector<1x16xf32> to vector<32x16xf32>
    %238 = arith.subf %225, %237 : vector<32x16xf32>
    %cst_106 = arith.constant 9.99999997E-7 : f32
    %239 = vector.broadcast %cst_106 : f32 to vector<1x16xf32>
    %240 = arith.addf %236, %239 : vector<1x16xf32>
    %241 = math.rsqrt %240 : vector<1x16xf32>
    %242 = vector.broadcast %241 : vector<1x16xf32> to vector<32x16xf32>
    %243 = arith.mulf %238, %242 : vector<32x16xf32>
    %244 = vector.broadcast %195 : vector<32x1xf32> to vector<32x16xf32>
    %245 = arith.mulf %243, %244 : vector<32x16xf32>
    %246 = vector.broadcast %196 : vector<32x1xf32> to vector<32x16xf32>
    %247 = arith.addf %245, %246 : vector<32x16xf32>
    %c0_107 = arith.constant 0 : index
    %c0_108 = arith.constant 0 : index
    %248 = vector.load %arg19[%c0_107, %c0_108] : memref<136x1xf32, #tpu.memory_space<vmem>>, vector<136x1xf32>
    %249 = vector.extract_strided_slice %248 {offsets = [0, 0], sizes = [32, 1], strides = [1, 1]} : vector<136x1xf32> to vector<32x1xf32>
    %250 = vector.extract_strided_slice %248 {offsets = [32, 0], sizes = [32, 1], strides = [1, 1]} : vector<136x1xf32> to vector<32x1xf32>
    %251 = vector.extract_strided_slice %248 {offsets = [64, 0], sizes = [64, 1], strides = [1, 1]} : vector<136x1xf32> to vector<64x1xf32>
    %252 = vector.extract_strided_slice %248 {offsets = [128, 0], sizes = [8, 1], strides = [1, 1]} : vector<136x1xf32> to vector<8x1xf32>
    %cst_109 = arith.constant dense<0.000000e+00> : vector<16xf32>
    %253 = vector.multi_reduction <add>, %247, %cst_109 [0] : vector<32x16xf32> to vector<16xf32>
    %254 = vector.shape_cast %253 : vector<16xf32> to vector<1x16xf32>
    %cst_110 = arith.constant 3.200000e+01 : f32
    %255 = vector.broadcast %cst_110 : f32 to vector<1x16xf32>
    %256 = arith.divf %254, %255 : vector<1x16xf32>
    %257 = vector.broadcast %256 : vector<1x16xf32> to vector<32x16xf32>
    %258 = arith.subf %247, %257 : vector<32x16xf32>
    %259 = arith.mulf %258, %258 : vector<32x16xf32>
    %cst_111 = arith.constant dense<0.000000e+00> : vector<16xf32>
    %260 = vector.multi_reduction <add>, %259, %cst_111 [0] : vector<32x16xf32> to vector<16xf32>
    %261 = vector.shape_cast %260 : vector<16xf32> to vector<1x16xf32>
    %cst_112 = arith.constant 3.200000e+01 : f32
    %262 = vector.broadcast %cst_112 : f32 to vector<1x16xf32>
    %263 = arith.divf %261, %262 : vector<1x16xf32>
    %264 = vector.broadcast %256 : vector<1x16xf32> to vector<32x16xf32>
    %265 = arith.subf %247, %264 : vector<32x16xf32>
    %cst_113 = arith.constant 9.99999997E-7 : f32
    %266 = vector.broadcast %cst_113 : f32 to vector<1x16xf32>
    %267 = arith.addf %263, %266 : vector<1x16xf32>
    %268 = math.rsqrt %267 : vector<1x16xf32>
    %269 = vector.broadcast %268 : vector<1x16xf32> to vector<32x16xf32>
    %270 = arith.mulf %265, %269 : vector<32x16xf32>
    %271 = vector.broadcast %249 : vector<32x1xf32> to vector<32x16xf32>
    %272 = arith.mulf %270, %271 : vector<32x16xf32>
    %273 = vector.broadcast %250 : vector<32x1xf32> to vector<32x16xf32>
    %274 = arith.addf %272, %273 : vector<32x16xf32>
    %c0_114 = arith.constant 0 : index
    %c0_115 = arith.constant 0 : index
    %275 = vector.load %arg17[%c0_114, %c0_115] : memref<64x32xf32, #tpu.memory_space<vmem>>, vector<64x32xf32>
    %cst_116 = arith.constant dense<0.000000e+00> : vector<64x16xf32>
    %276 = tpu.matmul %275, %274, %cst_116 {dimension_numbers = #tpu.dot_dimension_numbers<[1], [0], [0], [1], [0, 0, 1, 1], [], []>} : vector<64x32xf32>, vector<32x16xf32>, vector<64x16xf32> -> vector<64x16xf32>
    %277 = vector.broadcast %251 : vector<64x1xf32> to vector<64x16xf32>
    %278 = arith.addf %276, %277 : vector<64x16xf32>
    %cst_117 = arith.constant 5.000000e-01 : f32
    %279 = vector.broadcast %cst_117 : f32 to vector<64x16xf32>
    %280 = arith.mulf %279, %278 : vector<64x16xf32>
    %cst_118 = arith.constant 4.471500e-02 : f32
    %281 = vector.broadcast %cst_118 : f32 to vector<64x16xf32>
    %282 = arith.mulf %281, %278 : vector<64x16xf32>
    %283 = arith.mulf %282, %278 : vector<64x16xf32>
    %284 = arith.mulf %283, %278 : vector<64x16xf32>
    %285 = arith.addf %278, %284 : vector<64x16xf32>
    %cst_119 = arith.constant 0.797884583 : f32
    %286 = vector.broadcast %cst_119 : f32 to vector<64x16xf32>
    %287 = arith.mulf %286, %285 : vector<64x16xf32>
    %288 = math.tanh %287 : vector<64x16xf32>
    %cst_120 = arith.constant 1.000000e+00 : f32
    %289 = vector.broadcast %cst_120 : f32 to vector<64x16xf32>
    %290 = arith.addf %289, %288 : vector<64x16xf32>
    %291 = arith.mulf %280, %290 : vector<64x16xf32>
    %c0_121 = arith.constant 0 : index
    %c0_122 = arith.constant 0 : index
    %292 = vector.load %arg18[%c0_121, %c0_122] : memref<8x64xf32, #tpu.memory_space<vmem>>, vector<8x64xf32>
    %cst_123 = arith.constant dense<0.000000e+00> : vector<8x16xf32>
    %293 = tpu.matmul %292, %291, %cst_123 {dimension_numbers = #tpu.dot_dimension_numbers<[1], [0], [0], [1], [0, 0, 1, 1], [], []>} : vector<8x64xf32>, vector<64x16xf32>, vector<8x16xf32> -> vector<8x16xf32>
    %294 = vector.broadcast %252 : vector<8x1xf32> to vector<8x16xf32>
    %295 = arith.addf %293, %294 : vector<8x16xf32>
    %c0_124 = arith.constant 0 : index
    %c0_125 = arith.constant 0 : index
    %c0_126 = arith.constant 0 : index
    %296 = vector.load %arg20[%c0_124, %c0_125, %c0_126] : memref<1x8x16xf32, #tpu.memory_space<vmem>>, vector<1x8x16xf32>
    %297 = vector.shape_cast %296 : vector<1x8x16xf32> to vector<8x16xf32>
    %298 = vector.shape_cast %295 : vector<8x16xf32> to vector<1x8x16xf32>
    tpu.vector_store %arg20[%c0_124, %c0_125, %c0_126], %298 {strides = array<i32>} : memref<1x8x16xf32, #tpu.memory_space<vmem>>, vector<1x8x16xf32>,
    return
  }
  func.func @transform_0(%arg0: i32, %arg1: i32) -> (i32, i32, i32) {
    %c0_i32 = arith.constant 0 : i32
    %c0_i32_0 = arith.constant 0 : i32
    return %arg0, %c0_i32, %arg1 : i32, i32, i32
  }
  func.func @transform_1(%arg0: i32, %arg1: i32) -> (i32, i32, i32) {
    %c0_i32 = arith.constant 0 : i32
    %c0_i32_0 = arith.constant 0 : i32
    %c0_i32_1 = arith.constant 0 : i32
    return %arg0, %c0_i32, %c0_i32_0 : i32, i32, i32
  }
  func.func @transform_2(%arg0: i32, %arg1: i32) -> (i32, i32, i32) {
    %c0_i32 = arith.constant 0 : i32
    %c0_i32_0 = arith.constant 0 : i32
    %c0_i32_1 = arith.constant 0 : i32
    return %arg0, %c0_i32, %c0_i32_0 : i32, i32, i32
  }
  func.func @transform_3(%arg0: i32, %arg1: i32) -> (i32, i32, i32) {
    %c0_i32 = arith.constant 0 : i32
    %c0_i32_0 = arith.constant 0 : i32
    %c0_i32_1 = arith.constant 0 : i32
    return %arg0, %c0_i32, %c0_i32_0 : i32, i32, i32
  }
  func.func @transform_4(%arg0: i32, %arg1: i32) -> (i32, i32) {
    %c0_i32 = arith.constant 0 : i32
    %c0_i32_0 = arith.constant 0 : i32
    %c0_i32_1 = arith.constant 0 : i32
    return %c0_i32, %c0_i32_0 : i32, i32
  }
  func.func @transform_5(%arg0: i32, %arg1: i32) -> (i32, i32) {
    %c0_i32 = arith.constant 0 : i32
    %c0_i32_0 = arith.constant 0 : i32
    %c0_i32_1 = arith.constant 0 : i32
    return %c0_i32, %c0_i32_0 : i32, i32
  }
  func.func @transform_6(%arg0: i32, %arg1: i32) -> (i32, i32) {
    %c0_i32 = arith.constant 0 : i32
    %c0_i32_0 = arith.constant 0 : i32
    %c0_i32_1 = arith.constant 0 : i32
    return %c0_i32, %c0_i32_0 : i32, i32
  }
  func.func @transform_7(%arg0: i32, %arg1: i32) -> (i32, i32) {
    %c0_i32 = arith.constant 0 : i32
    %c0_i32_0 = arith.constant 0 : i32
    %c0_i32_1 = arith.constant 0 : i32
    return %c0_i32, %c0_i32_0 : i32, i32
  }
  func.func @transform_8(%arg0: i32, %arg1: i32) -> (i32, i32, i32) {
    %c0_i32 = arith.constant 0 : i32
    %c0_i32_0 = arith.constant 0 : i32
    %c0_i32_1 = arith.constant 0 : i32
    %c0_i32_2 = arith.constant 0 : i32
    return %c0_i32, %c0_i32_0, %c0_i32_1 : i32, i32, i32
  }
  func.func @transform_9(%arg0: i32, %arg1: i32) -> (i32, i32) {
    %c0_i32 = arith.constant 0 : i32
    %c0_i32_0 = arith.constant 0 : i32
    %c0_i32_1 = arith.constant 0 : i32
    return %c0_i32, %c0_i32_0 : i32, i32
  }
  func.func @transform_10(%arg0: i32, %arg1: i32) -> (i32, i32) {
    %c0_i32 = arith.constant 0 : i32
    %c0_i32_0 = arith.constant 0 : i32
    %c0_i32_1 = arith.constant 0 : i32
    return %c0_i32, %c0_i32_0 : i32, i32
  }
  func.func @transform_11(%arg0: i32, %arg1: i32) -> (i32, i32, i32) {
    %c0_i32 = arith.constant 0 : i32
    %c0_i32_0 = arith.constant 0 : i32
    %c0_i32_1 = arith.constant 0 : i32
    %c0_i32_2 = arith.constant 0 : i32
    return %c0_i32, %c0_i32_0, %c0_i32_1 : i32, i32, i32
  }
  func.func @transform_12(%arg0: i32, %arg1: i32) -> (i32, i32, i32) {
    %c0_i32 = arith.constant 0 : i32
    %c0_i32_0 = arith.constant 0 : i32
    %c0_i32_1 = arith.constant 0 : i32
    %c0_i32_2 = arith.constant 0 : i32
    return %c0_i32, %c0_i32_0, %c0_i32_1 : i32, i32, i32
  }
  func.func @transform_13(%arg0: i32, %arg1: i32) -> (i32, i32, i32, i32) {
    %c0_i32 = arith.constant 0 : i32
    %c0_i32_0 = arith.constant 0 : i32
    %c0_i32_1 = arith.constant 0 : i32
    %c0_i32_2 = arith.constant 0 : i32
    %c0_i32_3 = arith.constant 0 : i32
    return %c0_i32, %c0_i32_0, %c0_i32_1, %c0_i32_2 : i32, i32, i32, i32
  }
  func.func @transform_14(%arg0: i32, %arg1: i32) -> (i32, i32, i32) {
    %c0_i32 = arith.constant 0 : i32
    %c0_i32_0 = arith.constant 0 : i32
    %c0_i32_1 = arith.constant 0 : i32
    %c0_i32_2 = arith.constant 0 : i32
    return %c0_i32, %c0_i32_0, %c0_i32_1 : i32, i32, i32
  }
  func.func @transform_15(%arg0: i32, %arg1: i32) -> (i32, i32) {
    %c0_i32 = arith.constant 0 : i32
    %c0_i32_0 = arith.constant 0 : i32
    %c0_i32_1 = arith.constant 0 : i32
    return %c0_i32, %c0_i32_0 : i32, i32
  }
  func.func @transform_16(%arg0: i32, %arg1: i32) -> (i32, i32) {
    %c0_i32 = arith.constant 0 : i32
    %c0_i32_0 = arith.constant 0 : i32
    %c0_i32_1 = arith.constant 0 : i32
    return %c0_i32, %c0_i32_0 : i32, i32
  }
  func.func @transform_17(%arg0: i32, %arg1: i32) -> (i32, i32) {
    %c0_i32 = arith.constant 0 : i32
    %c0_i32_0 = arith.constant 0 : i32
    %c0_i32_1 = arith.constant 0 : i32
    return %c0_i32, %c0_i32_0 : i32, i32
  }
  func.func @transform_18(%arg0: i32, %arg1: i32) -> (i32, i32, i32) {
    %c0_i32 = arith.constant 0 : i32
    %c0_i32_0 = arith.constant 0 : i32
    return %arg0, %c0_i32, %arg1 : i32, i32, i32
  }
}

</mosaic_0001>

<bundles_post_ra>
// kernel: tpu_custom_call.1
= control target key start
LH: loop header
LB: loop body
LE: loop exit
PB: predicated region body
PF: predicated region fallthrough
CT: control target
= control target key end

     0   :  { %s14029_s0 = inlined_call_operand.vmem [shape: f32[2,64,16], index: 0, kind: input, shape index: {}]   ;;  %s14030_s1 = inlined_call_operand.vmem [shape: f32[2,8,32], index: 1, kind: input, shape index: {}]   ;;  %s14031_s2 = inlined_call_operand.vmem [shape: f32[2,32,8], index: 2, kind: input, shape index: {}]   ;;  %s14032_s3 = inlined_call_operand.vmem [shape: f32[2,8,1], index: 3, kind: input, shape index: {}]   ;;  %s14033_s4 = inlined_call_operand.vmem [shape: f32[64,96], index: 4, kind: input, shape index: {}]   ;;  %s14034_s5 = inlined_call_operand.vmem [shape: f32[128,64], index: 5, kind: input, shape index: {}]   ;;  %s14035_s6 = inlined_call_operand.vmem [shape: f32[32,128], index: 6, kind: input, shape index: {}]   ;;  %s14036_s7 = inlined_call_operand.vmem [shape: f32[288,1], index: 7, kind: input, shape index: {}]   ;;  %s14037_s8 = inlined_call_operand.vmem [shape: f32[3,32,32], index: 8, kind: input, shape index: {}]   ;;  %s14038_s9 = inlined_call_operand.vmem [shape: f32[32,96], index: 9, kind: input, shape index: {}]   ;;  %s14039_s10 = inlined_call_operand.vmem [shape: f32[1,96], index: 10, kind: input, shape index: {}]   ;;  %s14040_s11 = inlined_call_operand.vmem [shape: f32[8,12,32], index: 11, kind: input, shape index: {}]   ;;  %s14041_s12 = inlined_call_operand.vmem [shape: f32[8,12,1], index: 12, kind: input, shape index: {}]   ;;  %s14042_s13 = inlined_call_operand.vmem [shape: f32[3,8,32,4], index: 13, kind: input, shape index: {}]   ;;  %s14043_s14 = inlined_call_operand.vmem [shape: f32[3,32,4], index: 14, kind: input, shape index: {}]   ;;  %s14044_s15 = inlined_call_operand.vmem [shape: f32[64,32], index: 15, kind: input, shape index: {}]   ;;  %s14045_s16 = inlined_call_operand.vmem [shape: f32[8,64], index: 16, kind: input, shape index: {}]   ;;  %s14046_s17 = inlined_call_operand.vmem [shape: f32[136,1], index: 17, kind: input, shape index: {}]   ;;  %s14047_s18 = inlined_call_operand.hbm [shape: f32[2,8,16], index: 18, kind: output, shape index: {}]  }
   0x1   :  { %14082 = sst [smem:[#allocation36_spill]] %s14029_s0 }
   0x2   :  { %14083 = sst [smem:[#allocation37_spill]] %s14030_s1 }
   0x3   :  { %14084 = sst [smem:[#allocation38_spill]] %s14031_s2 }
   0x4   :  { %14085 = sst [smem:[#allocation39_spill]] %s14047_s18 }
   0x5   :  { %23 = vsyncpa [#allocation3], 0 }
   0x6   :  { %25 = vsyncpa [#allocation3 + $0x1], 0  ;;  %s11567_s27 = smov 0   ;;  %s11569_s28 = smov 0  }
   0x7   :  { %s11571_s29 = smov 0   ;;  %s11573_s30 = smov 0  }
   0x8   :  { %s11575_s0 = smov 0   ;;  %s11577_s19 = smov 0  }
   0x9 LB: > { %14086 = sst [smem:[#allocation5_spill]] %s11440_s27  ;;  %s9433_s1 = sadd.s32 4294967295, %s11460_s19   ;;  %s11460_s19 = sphi %s11577_s19, %s31_s19   ;;  %s11456_s0 = sphi %s11575_s0, %s14181_s0   ;;  %s11452_s30 = sphi %s11573_s30, %s14177_s30   ;;  %s11448_s29 = sphi %s11571_s29, %s14176_s29   ;;  %s11444_s28 = sphi %s11569_s28, %s14180_s28   ;;  %s11440_s27 = sphi %s11567_s27, %s14179_s27  }
   0xa   : > { %14087 = sst [smem:[#allocation6_spill]] %s11448_s29  ;;  %s9434_s20 = sadd.s32 4294967294, %s11460_s19  }
   0xb   : > { %14088 = sst [smem:[#allocation7_spill]] %s11456_s0  ;;  %s43_s21 = sadd.s32 1, %s11456_s0 }
   0xc   : > { %14089 = sst [smem:[#allocation8_spill]] %s11460_s19  ;;  %s452_s22 = sadd.s32 1, %s11448_s29 }
   0xd   : > { %p45_p0 = scmp.ge.s32.totalorder %s43_s21, 2  ;;  %p462_p1 = scmp.ne.s32.totalorder %s11448_s29, %s11444_s28 }
   0xe   : > { %p463_p2 = scmp.eq.s32.totalorder %s9433_s1, 1  ;;  %p468_p3 = scmp.ne.s32.totalorder %s11444_s28, %s11440_s27 }
   0xf   : > { %s14183_s21 = smov (%p45_p0, %s43_s21), 0  ;;  %p469_p5 = scmp.eq.s32.totalorder %s9434_s20, 1 }
  0x10   : > { %14090 = sst [smem:[#allocation9_spill]] %s14183_s21  ;;  %p11607_p4 = por %p463_p2, %p462_p1 }
  0x11   : > { %s447_s23 = ssub.s32 %s11456_s0, %s14183_s21  ;;  %p9437_p6 = scmp.ge.s32.totalorder %s11460_s19, 1 }
  0x12   : > { %p450_p7 = scmp.eq.s32.totalorder %s447_s23, 0  ;;  %p11614_p8 = por %p469_p5, %p468_p3 }
  0x13   : > { %p562_p9 = scmp.lt.s32.totalorder %s11460_s19, 3 }
  0x14   : > { %s14092_s24 = scalar_select %p11614_p8, 1, 0 }
  0x15   : > { %s11620_s25 = scalar_select %p450_p7, %s11448_s29, %s452_s22  }
  0x16   : > { %14093 = sst [smem:[#allocation10_spill]] %s14092_s24  ;;  %p563_p10 = pnand %p9437_p6, %p562_p9 }
  0x17   : > { %14094 = sst [smem:[#allocation11_spill]] %s11620_s25 }
  0x18   : > { %566 = sbr.rel (%p563_p10) target bundleno = 3709 (0xe7d), region = 92 }
  0x1f   : > { %v661_v0 = vld [vmem:[%s14036_s7 + $0x40] sm:$0xff]  ;;  %v11462_v2 = vmov 0   ;;  %v662_v3 = vld [vmem:[%s14036_s7 + $0x48] sm:$0xff]  ;;  %p632_p11 = scmp.lt.s32.totalorder %s11452_s30, 1  ;;  %v656_v5 = vld [vmem:[%s14036_s7 + $0x18] sm:$0xff]  ;;  %s14095_s18 = sld [smem:[#allocation36_spill]] }
  0x20   : > { %v653_v1 = vld [vmem:[%s14036_s7] sm:$0xff]  ;;  %11197 = vset.pattern.permute.xlu1 %v11462_v2  ;;  %11196 = vset.pattern.permute.xlu0 %v11462_v2  ;;  %v654_v4 = vld [vmem:[%s14036_s7 + $0x8] sm:$0xff]  ;;  %v655_v6 = vld [vmem:[%s14036_s7 + $0x10] sm:$0xff]  ;;  %vm697_vm0 = vcmask 130048   ;;  %vm961_vm1 = vcmask 523264   ;;  %s14096_s26 = sld [smem:[#allocation38_spill]] }
  0x21   : > { %819 = vperm.xlu1 %11197, %v661_v0   ;;  %771 = vperm.xlu0 %11196, %v653_v1   ;;  %s11644_s25 = scalar_select %p632_p11, %s11452_s30, 1  ;;  %v664_v7 = vld [vmem:[%s14036_s7 + $0x58] sm:$0xff]  ;;  %v663_v8 = vld [vmem:[%s14036_s7 + $0x50] sm:$0xff]  ;;  %v658_v9 = vld [vmem:[%s14036_s7 + $0x28] sm:$0xff]  ;;  %vm1424_vm2 = vcmask 261120   ;;  %vm11467_vm3 = vmmov 0  }
  0x22   : > { %v657_v10 = vld [vmem:[%s14036_s7 + $0x20] sm:$0xff]  ;;  %v666_v14 = vld [vmem:[%s14036_s7 + $0x68] sm:$0xff]  ;;  %v660_v25 = vld [vmem:[%s14036_s7 + $0x38] sm:$0xff]  ;;  %vm2741_vm4 = vcmask 1043456   ;;  %vm2728_vm5 = vcmask 31744   ;;  %s11470_s0 = smov 64  }
  0x23   : > { %s9824_s29 = sshll.u32 %s11644_s25, 6  ;;  %v665_v15 = vld [vmem:[%s14036_s7 + $0x60] sm:$0xff]  ;;  %v659_v26 = vld [vmem:[%s14036_s7 + $0x30] sm:$0xff]  ;;  %v668_v33 = vld [vmem:[%s14036_s7 + $0x78] sm:$0xff]  ;;  %s9441_s19 = sshll.u32 %s11644_s25, 3  ;;  %vm3530_vm6 = vcmask 64512  }
  0x24   : > { %v667_v34 = vld [vmem:[%s14036_s7 + $0x70] sm:$0xff]  ;;  %v670_v39 = vld [vmem:[%s14036_s7 + $0x88] sm:$0xff]  ;;  %v669_v40 = vld [vmem:[%s14036_s7 + $0x80] sm:$0xff]  ;;  %s652_s21 = scalar_lea.vmem %s14032_s3, %s9441_s19  ;;  %s9825_s23 = sshll.u32 %s11644_s25, 5 }
  0x25   : > { %824 = vperm.xlu1 %11197, %v662_v3   ;;  %776 = vperm.xlu0 %11196, %v654_v4   ;;  %s639_s22 = scalar_lea.vmem %s14095_s18, %s9824_s29  ;;  %v672_v43 = vld [vmem:[%s14036_s7 + $0x98] sm:$0xff]  ;;  %v671_v44 = vld [vmem:[%s14036_s7 + $0x90] sm:$0xff]  ;;  %v865_v45 = vld [vmem:[%s14034_s5] sm:$0xff]  ;;  %s11469_s29 = smov 96  }
  0x26   : > { %v11662_v11 = vld [vmem:[%s639_s22] sm:$0xff]  ;;  %v11664_v12 = vld [vmem:[%s639_s22 + $0x8] sm:$0xff]  ;;  %v11666_v13 = vld [vmem:[%s639_s22 + $0x10] sm:$0xff]  ;;  %10260 = vmatprep.mubr.msk.f32.mxu0 %vm961_vm1, %v865_v45  ;;  %s648_s27 = scalar_lea.vmem %s14096_s26, %s9825_s23  ;;  %s14101_s26 = sld [smem:[#allocation37_spill]] }
  0x27   : > { %v11674_v16 = vld [vmem:[%s639_s22 + $0x18] sm:$0xff]  ;;  %v698_v17 = vsel %vm697_vm0, %v11662_v11, 0.0  ;;  %v699_v18 = vsel %vm697_vm0, %v11664_v12, 0.0  ;;  %v701_v19 = vsel %vm697_vm0, %v11666_v13, 0.0  ;;  %v11682_v20 = vld [vmem:[%s639_s22 + $0x20] sm:$0xff]  ;;  %v11686_v23 = vld [vmem:[%s639_s22 + $0x28] sm:$0xff] }
  0x28   : > { %v700_v21 = vadd.f32 %v699_v18, %v698_v17  ;;  %v703_v22 = vsel %vm697_vm0, %v11674_v16, 0.0  ;;  %v705_v27 = vsel %vm697_vm0, %v11682_v20, 0.0  ;;  %v11696_v28 = vld [vmem:[%s639_s22 + $0x30] sm:$0xff]  ;;  %v707_v30 = vsel %vm697_vm0, %v11686_v23, 0.0  ;;  %v11700_v31 = vld [vmem:[%s639_s22 + $0x38] sm:$0xff]  ;;  %v674_v48 = vld [vmem:[%s14036_s7 + $0xa8] sm:$0xff] }
  0x29   : > { %786 = vperm.xlu1 %11197, %v656_v5   ;;  %781 = vperm.xlu0 %11196, %v655_v6   ;;  %v709_v35 = vsel %vm697_vm0, %v11696_v28, 0.0  ;;  %v711_v37 = vsel %vm697_vm0, %v11700_v31, 0.0  ;;  %v673_v49 = vld [vmem:[%s14036_s7 + $0xa0] sm:$0xff]  ;;  %v676_v52 = vld [vmem:[%s14036_s7 + $0xb8] sm:$0xff]  ;;  %v675_v53 = vld [vmem:[%s14036_s7 + $0xb0] sm:$0xff]  ;;  %s14171_s20 = sld [smem:[#allocation39_spill]] }
  0x2a   : > { %v702_v24 = vadd.f32 %v701_v19, %v700_v21  ;;  %v678_v56 = vld [vmem:[%s14036_s7 + $0xc8] sm:$0xff]  ;;  %v677_v57 = vld [vmem:[%s14036_s7 + $0xc0] sm:$0xff]  ;;  %v680_v63 = vld [vmem:[%s14036_s7 + $0xd8] sm:$0xff] }
  0x2b   : > { %v679_v0 = vld [vmem:[%s14036_s7 + $0xd0] sm:$0xff]  ;;  %v682_v6 = vld [vmem:[%s14036_s7 + $0xe8] sm:$0xff]  ;;  %v685_v19 = vld [vmem:[%s14036_s7 + $0x100] sm:$0xff] }
  0x2c   : > { %v704_v29 = vadd.f32 %v703_v22, %v702_v24  ;;  %v686_v18 = vld [vmem:[%s14036_s7 + $0x108] sm:$0xff]  ;;  %v688_v24 = vld [vmem:[%s14036_s7 + $0x118] sm:$0xff]  ;;  %v1540_v45 = vld [vmem:[%s14041_s12 + $0x50] sm:$0xff] }
  0x2d   : > { %834 = vperm.xlu1 %11197, %v664_v7   ;;  %829 = vperm.xlu0 %11196, %v663_v8   ;;  %v681_v7 = vld [vmem:[%s14036_s7 + $0xe0] sm:$0xff] }
  0x2e   : > { %v706_v32 = vadd.f32 %v705_v27, %v704_v29 }
  0x30   : > { %v708_v36 = vadd.f32 %v707_v30, %v706_v32  ;;  %v11823_v30 = vld [vmem:[%s14043_s14 + $0x8] sm:$0xff]  ;;  %v11828_v32 = vld [vmem:[%s14043_s14] sm:$0xff] }
  0x31   : > { %796 = vperm.xlu1 %11197, %v658_v9   ;;  %791 = vperm.xlu0 %11196, %v657_v10  }
  0x32   : > { %v710_v38 = vadd.f32 %v709_v35, %v708_v36  ;;  %v11838_v35 = vld [vmem:[%s14043_s14 + $0x18] sm:$0xff]  ;;  %v11843_v36 = vld [vmem:[%s14043_s14 + $0x10] sm:$0xff] }
  0x34   : > { %v712_v41 = vadd.f32 %v711_v37, %v710_v38 }
  0x35   : > { %844 = vperm.xlu1 %11197, %v666_v14   ;;  %839 = vperm.xlu0 %11196, %v665_v15  }
  0x36   : > { %v713_v42 = vrot.slane %v712_v41, 4 }
  0x38   : > { %v714_v46 = vadd.f32 %v713_v42, %v712_v41  ;;  %v1536_v42 = vld [vmem:[%s14041_s12 + $0x30] sm:$0xff] }
  0x39   : > { %806 = vperm.xlu1 %11197, %v660_v25   ;;  %801 = vperm.xlu0 %11196, %v659_v26   ;;  %v687_v25 = vld [vmem:[%s14036_s7 + $0x110] sm:$0xff] }
  0x3a   : > { %v715_v47 = vrot.slane %v714_v46, 2 }
  0x3c   : > { %v716_v50 = vadd.f32 %v715_v47, %v714_v46  ;;  %v1538_v46 = vld [vmem:[%s14041_s12 + $0x40] sm:$0xff] }
  0x3d   : > { %854 = vperm.xlu1 %11197, %v668_v33   ;;  %849 = vperm.xlu0 %11196, %v667_v34   ;;  %v2274_v47 = vld [vmem:[%s652_s21] sm:$0xff]  ;;  %s11471_s21 = smov [#allocation2]  }
  0x3e   : > { %v717_v51 = vrot.slane %v716_v50, 1 }
  0x40   : > { %v718_v54 = vadd.f32 %v717_v51, %v716_v50  ;;  %v1544_v50 = vld [vmem:[%s14041_s12 + $0x70] sm:$0xff]  ;;  %v1542_v51 = vld [vmem:[%s14041_s12 + $0x60] sm:$0xff] }
  0x41   : > { %888 = vperm.xlu1 %11197, %v670_v39   ;;  %883 = vperm.xlu0 %11196, %v669_v40   ;;  %v1532_v39 = vld [vmem:[%s14041_s12 + $0x10] sm:$0xff]  ;;  %v1530_v40 = vld [vmem:[%s14041_s12] sm:$0xff] }
  0x42   : > { %v720_v55 = vmul.f32 0.015625, %v718_v54 }
  0x44   : > { %v11747_v58 = vsub.f32 %v11662_v11, %v720_v55  ;;  %v11750_v59 = vsub.f32 %v11664_v12, %v720_v55  ;;  %v11753_v60 = vsub.f32 %v11666_v13, %v720_v55  ;;  %v11766_v1 = vsub.f32 %v11674_v16, %v720_v55  ;;  %v684_v12 = vld [vmem:[%s14036_s7 + $0xf8] sm:$0xff]  ;;  %v683_v13 = vld [vmem:[%s14036_s7 + $0xf0] sm:$0xff] }
  0x45   : > { %898 = vperm.xlu1 %11197, %v672_v43   ;;  %893 = vperm.xlu0 %11196, %v671_v44   ;;  %v11779_v9 = vsub.f32 %v11682_v20, %v720_v55  ;;  %v11791_v15 = vsub.f32 %v11686_v23, %v720_v55  ;;  %v11803_v21 = vsub.f32 %v11696_v28, %v720_v55  ;;  %v1534_v43 = vld [vmem:[%s14041_s12 + $0x20] sm:$0xff] }
  0x46   : > { %v729_v61 = vmul.f32 %v11747_v58, %v11747_v58  ;;  %v730_v62 = vmul.f32 %v11750_v59, %v11750_v59  ;;  %v731_v3 = vmul.f32 %v11753_v60, %v11753_v60  ;;  %v732_v10 = vmul.f32 %v11766_v1, %v11766_v1 }
  0x47   : > { %v733_v16 = vmul.f32 %v11779_v9, %v11779_v9  ;;  %v734_v22 = vmul.f32 %v11791_v15, %v11791_v15  ;;  %v11815_v27 = vsub.f32 %v11700_v31, %v720_v55  ;;  %v735_v28 = vmul.f32 %v11803_v21, %v11803_v21 }
  0x48   : > { %v737_v4 = vsel %vm697_vm0, %v729_v61, 0.0  ;;  %v738_v5 = vsel %vm697_vm0, %v730_v62, 0.0  ;;  %v740_v11 = vsel %vm697_vm0, %v731_v3, 0.0  ;;  %v742_v17 = vsel %vm697_vm0, %v732_v10, 0.0 }
  0x49   : > { %908 = vperm.xlu1 %11197, %v674_v48   ;;  %903 = vperm.xlu0 %11196, %v673_v49   ;;  %v739_v8 = vadd.f32 %v738_v5, %v737_v4  ;;  %v744_v23 = vsel %vm697_vm0, %v733_v16, 0.0  ;;  %v746_v29 = vsel %vm697_vm0, %v734_v22, 0.0  ;;  %v736_v33 = vmul.f32 %v11815_v27, %v11815_v27 }
  0x4a   : > { %v748_v34 = vsel %vm697_vm0, %v735_v28, 0.0  ;;  %v2275_v49 = vsub.f32 1.0, %v2274_v47 }
  0x4b   : > { %v741_v14 = vadd.f32 %v740_v11, %v739_v8  ;;  %v750_v38 = vsel %vm697_vm0, %v736_v33, 0.0 }
  0x4d   : > { %918 = vperm.xlu1 %11197, %v676_v52   ;;  %913 = vperm.xlu0 %11196, %v675_v53   ;;  %v743_v20 = vadd.f32 %v742_v17, %v741_v14  ;;  %v2276_v53 = vmul.f32 1e+09, %v2275_v49  ;;  %v1412_v49 = vld [vmem:[%s648_s27 + $0x18] sm:$0xff] }
  0x4f   : > { %v745_v26 = vadd.f32 %v744_v23, %v743_v20 }
  0x51   : > { %928 = vperm.xlu1 %11197, %v678_v56   ;;  %923 = vperm.xlu0 %11196, %v677_v57   ;;  %v747_v31 = vadd.f32 %v746_v29, %v745_v26 }
  0x53   : > { %v749_v37 = vadd.f32 %v748_v34, %v747_v31 }
  0x55   : > { %938 = vperm.xlu1 %11197, %v680_v63   ;;  %933 = vperm.xlu0 %11196, %v679_v0   ;;  %v751_v41 = vadd.f32 %v750_v38, %v749_v37 }
  0x57   : > { %v752_v44 = vrot.slane %v751_v41, 4 }
  0x59   : > { %948 = vperm.xlu1 %11197, %v682_v6   ;;  %943 = vperm.xlu0 %11196, %v681_v7   ;;  %v753_v48 = vadd.f32 %v752_v44, %v751_v41 }
  0x5b   : > { %v754_v52 = vrot.slane %v753_v48, 2 }
  0x5d   : > { %958 = vperm.xlu1 %11197, %v684_v12   ;;  %953 = vperm.xlu0 %11196, %v683_v13   ;;  %v755_v54 = vadd.f32 %v754_v52, %v753_v48  ;;  %v867_v52 = vld [vmem:[%s14034_s5 + $0x10] sm:$0xff] }
  0x5f   : > { %v756_v55 = vrot.slane %v755_v54, 1 }
  0x61   : > { %1310 = vperm.xlu1 %11197, %v686_v18   ;;  %1305 = vperm.xlu0 %11196, %v685_v19   ;;  %v757_v56 = vadd.f32 %v756_v55, %v755_v54  ;;  %v869_v54 = vld [vmem:[%s14034_s5 + $0x20] sm:$0xff]  ;;  %v870_v55 = vld [vmem:[%s14034_s5 + $0x28] sm:$0xff] }
  0x63   : > { %v758_v57 = vmul.f32 0.015625, %v757_v56  ;;  %v871_v56 = vld [vmem:[%s14034_s5 + $0x30] sm:$0xff] }
  0x65   : > { %1320 = vperm.xlu1 %11197, %v688_v24   ;;  %1315 = vperm.xlu0 %11196, %v687_v25   ;;  %v759_v61 = vadd.f32 1e-06, %v758_v57  ;;  %v872_v57 = vld [vmem:[%s14034_s5 + $0x38] sm:$0xff] }
  0x67   : > { %11228 = vrsqrt.f32 %v759_v61  ;;  %v873_v61 = vld [vmem:[%s14034_s5 + $0x40] sm:$0xff] }
  0x69   : > { %2292 = vperm.xlu1 %11197, %v11823_v30   ;;  %2287 = vperm.xlu0 %11196, %v11828_v32  }
  0x6d   : > { %2302 = vperm.xlu1 %11197, %v11838_v35   ;;  %2297 = vperm.xlu0 %11196, %v11843_v36  }
  0x71   : > { %1558 = vperm.xlu1 %11197, %v1532_v39   ;;  %1548 = vperm.xlu0 %11196, %v1530_v40   ;;  %v11229_v62 = vpop.eup %11228 }
  0x72   : > { %v761_v63 = vmul.f32 %v11229_v62, %v11747_v58  ;;  %v762_v4 = vmul.f32 %v11229_v62, %v11750_v59  ;;  %v764_v10 = vmul.f32 %v11229_v62, %v11766_v1  ;;  %v763_v11 = vmul.f32 %v11229_v62, %v11753_v60 }
  0x73   : > { %v766_v24 = vmul.f32 %v11229_v62, %v11791_v15  ;;  %v765_v1 = vmul.f32 %v11229_v62, %v11779_v9  ;;  %v768_v38 = vmul.f32 %v11229_v62, %v11815_v27  ;;  %v767_v39 = vmul.f32 %v11229_v62, %v11803_v21  ;;  %v1411_v21 = vld [vmem:[%s648_s27 + $0x10] sm:$0xff]  ;;  %v874_v62 = vld [vmem:[%s14034_s5 + $0x48] sm:$0xff] }
  0x75   : > { %1578 = vperm.xlu1 %11197, %v1536_v42   ;;  %1568 = vperm.xlu0 %11196, %v1534_v43   ;;  %v1409_v42 = vld [vmem:[%s648_s27] sm:$0xff]  ;;  %v1410_v43 = vld [vmem:[%s648_s27 + $0x8] sm:$0xff]  ;;  %s643_s27 = scalar_lea.vmem %s14101_s26, %s9441_s19  ;;  %s11386_s26 = sshll.u32 %s11471_s21, 4  ;;  %s11387_s26 = int_to_ptr.vmem [resolvable:$false] %s11386_s26 }
  0x76   : > { %v11890_v48 = vpack.c.bf16 %v1410_v43, %v1409_v42 }
  0x79   : > { %1598 = vperm.xlu1 %11197, %v1540_v45   ;;  %1588 = vperm.xlu0 %11196, %v1538_v46  }
  0x7d   : > { %1618 = vperm.xlu1 %11197, %v1544_v50   ;;  %1608 = vperm.xlu0 %11196, %v1542_v51   ;;  %v866_v50 = vld [vmem:[%s14034_s5 + $0x8] sm:$0xff]  ;;  %v11895_v51 = vpack.c.bf16 %v1412_v49, %v1411_v21 }
  0x81   : > { %2533 = vperm.xlu0 %11196, %v2276_v53   ;;  %v868_v53 = vld [vmem:[%s14034_s5 + $0x18] sm:$0xff] }
  0xa0   : > { %v820_v0 = vpop.permute.xlu1 %819  ;;  %v772_v3 = vpop.permute.xlu0 %771 }
  0xa1   : > { %v809_v5 = vmul.f32 %v772_v3, %v761_v63  ;;  %v875_v63 = vld [vmem:[%s14034_s5 + $0x50] sm:$0xff]  ;;  %v877_v3 = vld [vmem:[%s14034_s5 + $0x60] sm:$0xff] }
  0xa3   : > { %v857_v12 = vadd.f32 %v820_v0, %v809_v5  ;;  %v876_v0 = vld [vmem:[%s14034_s5 + $0x58] sm:$0xff]  ;;  %v879_v5 = vld [vmem:[%s14034_s5 + $0x70] sm:$0xff] }
  0xa4   : > { %v825_v6 = vpop.permute.xlu1 %824  ;;  %v777_v7 = vpop.permute.xlu0 %776 }
  0xa5   : > { %v810_v8 = vmul.f32 %v777_v7, %v762_v4  ;;  %v878_v4 = vld [vmem:[%s14034_s5 + $0x68] sm:$0xff]  ;;  %v1514_v7 = vld [vmem:[%s14040_s11] sm:$0xff] }
  0xa7   : > { %v858_v13 = vadd.f32 %v825_v6, %v810_v8  ;;  %v880_v6 = vld [vmem:[%s14034_s5 + $0x78] sm:$0xff]  ;;  %v1515_v8 = vld [vmem:[%s14040_s11 + $0x8] sm:$0xf] }
  0xa8   : > { %v787_v14 = vpop.permute.xlu1 %786  ;;  %v782_v16 = vpop.permute.xlu0 %781 }
  0xa9   : > { %v10946_v17 = vpack.c.bf16 %v858_v13, %v857_v12  ;;  %v812_v18 = vmul.f32 %v787_v14, %v764_v10  ;;  %v811_v19 = vmul.f32 %v782_v16, %v763_v11  ;;  %v1518_v10 = vld [vmem:[%s14040_s11 + $0x20] sm:$0xff]  ;;  %v1519_v11 = vld [vmem:[%s14040_s11 + $0x28] sm:$0xf] }
  0xaa   : > { %v1522_v12 = vld [vmem:[%s14040_s11 + $0x40] sm:$0xff]  ;;  %v1523_v13 = vld [vmem:[%s14040_s11 + $0x48] sm:$0xf] }
  0xab   : > { %10947 = vmatprep.subr.bf16.mxu0 %v10946_v17  ;;  %v1526_v14 = vld [vmem:[%s14040_s11 + $0x60] sm:$0xff]  ;;  %v1527_v16 = vld [vmem:[%s14040_s11 + $0x68] sm:$0xf] }
  0xac   : > { %v835_v58 = vpop.permute.xlu1 %834  ;;  %v830_v20 = vpop.permute.xlu0 %829  ;;  %10949 = vmatpush3.bf16.msra.mxu0 %v10946_v17  ;;  %v1299_v17 = vld [vmem:[%s14035_s6] sm:$0xff] }
  0xad   : > { %v860_v59 = vadd.f32 %v835_v58, %v812_v18  ;;  %v859_v22 = vadd.f32 %v830_v20, %v811_v19  ;;  %10316 = vmatprep.mubr.f32.mxu1 %v1299_v17  ;;  %v11463_v18 = vmov 1   ;;  %v11464_v20 = vmov 2  }
  0xae   : > { %11198 = vset.pattern.permute.xlu1 %v11463_v18  ;;  %11199 = vset.pattern.permute.xlu0 %v11463_v18 }
  0xaf   : > { %v10950_v23 = vpack.c.bf16 %v860_v59, %v859_v22  ;;  %4368 = vperm.xlu1 %11198, %v11828_v32   ;;  %4372 = vperm.xlu0 %11199, %v11823_v30   ;;  %v11465_v22 = vmov 3  }
  0xb0   : > { %v797_v60 = vpop.permute.xlu1 %796  ;;  %v792_v25 = vpop.permute.xlu0 %791 }
  0xb1   : > { %10951 = vmatprep.subr.bf16.mxu0 %v10950_v23  ;;  %v814_v26 = vmul.f32 %v797_v60, %v766_v24  ;;  %v813_v28 = vmul.f32 %v792_v25, %v765_v1 }
  0xb2   : > { %10953 = vmatpush3.bf16.msra.mxu0 %v10950_v23 }
  0xb3   : > { %4376 = vperm.xlu1 %11198, %v11843_v36   ;;  %11200 = vset.pattern.permute.xlu0 %v11464_v20 }
  0xb4   : > { %v845_v29 = vpop.permute.xlu1 %844  ;;  %v840_v31 = vpop.permute.xlu0 %839  ;;  %4435 = vperm.xlu0 %11200, %v11828_v32  }
  0xb5   : > { %v862_v33 = vadd.f32 %v845_v29, %v814_v26  ;;  %v861_v34 = vadd.f32 %v840_v31, %v813_v28 }
  0xb7   : > { %v10954_v37 = vpack.c.bf16 %v862_v33, %v861_v34  ;;  %4380 = vperm.xlu1 %11198, %v11838_v35  }
  0xb8   : > { %v807_v40 = vpop.permute.xlu1 %806  ;;  %v802_v15 = vpop.permute.xlu0 %801  ;;  %11203 = vset.pattern.permute.xlu0 %v11465_v22 }
  0xb9   : > { %10955 = vmatprep.subr.bf16.mxu0 %v10954_v37  ;;  %v816_v9 = vmul.f32 %v807_v40, %v768_v38  ;;  %v815_v41 = vmul.f32 %v802_v15, %v767_v39  ;;  %4459 = vperm.xlu0 %11203, %v11823_v30  }
  0xba   : > { %10957 = vmatpush3.bf16.msra.mxu0 %v10954_v37 }
  0xbb   : > { %11201 = vset.pattern.permute.xlu1 %v11464_v20 }
  0xbc   : > { %v855_v44 = vpop.permute.xlu1 %854  ;;  %v850_v45 = vpop.permute.xlu0 %849  ;;  %4439 = vperm.xlu1 %11201, %v11823_v30  }
  0xbd   : > { %v864_v46 = vadd.f32 %v855_v44, %v816_v9  ;;  %v863_v47 = vadd.f32 %v850_v45, %v815_v41  ;;  %4463 = vperm.xlu0 %11203, %v11843_v36  }
  0xbf   : > { %v10958_v27 = vpack.c.bf16 %v864_v46, %v863_v47 }
  0xc0   : > { %v889_v19 = vpop.permute.xlu1 %888  ;;  %v884_v58 = vpop.permute.xlu0 %883  ;;  %11202 = vset.pattern.permute.xlu1 %v11465_v22 }
  0xc1   : > { %10959 = vmatprep.subr.bf16.mxu0 %v10958_v27  ;;  %4455 = vperm.xlu1 %11202, %v11828_v32  }
  0xc2   : > { %10961 = vmatpush3.bf16.msra.mxu0 %v10958_v27  ;;  %11206 = vset.pattern.permute.xlu0 %v11462_v2 }
  0xc3   : > { %11001 = vmatprep.subr.bf16.mxu0 %v11890_v48 }
  0xc4   : > { %v899_v59 = vpop.permute.xlu1 %898  ;;  %v894_v23 = vpop.permute.xlu0 %893 }
  0xc5   : > { %10261 = vmatmul.mubr.msk.f32.vlgmr.msra.gmra.mrb[0].mxu0 %vm961_vm1, %v866_v50  ;;  %11204 = vset.pattern.permute.xlu1 %v11464_v20 }
  0xc6   : > { %10263 = vmatprep.mubr.msk.f32.mxu0 %vm961_vm1, %v867_v52  ;;  %11003 = vmatpush3.bf16.msra.mxu0 %v11890_v48 }
  0xc7   : > { %11005 = vmatprep.subr.bf16.mxu0 %v11895_v51  ;;  %4443 = vperm.xlu1 %11204, %v11843_v36  }
  0xc8   : > { %v909_v24 = vpop.permute.xlu1 %908  ;;  %v904_v1 = vpop.permute.xlu0 %903 }
  0xc9   : > { %10264 = vmatmul.mubr.msk.f32.gmra.mrb[2].mxu0 %vm961_vm1, %v868_v53 }
  0xca   : > { %10266 = vmatprep.mubr.msk.f32.mxu0 %vm961_vm1, %v869_v54  ;;  %11007 = vmatpush3.bf16.msra.mxu0 %v11895_v51 }
  0xcb   : > { %11017 = vmatprep.subr.bf16.mxu0 %v11890_v48  ;;  %4447 = vperm.xlu1 %11204, %v11838_v35  }
  0xcc   : > { %v919_v31 = vpop.permute.xlu1 %918  ;;  %v914_v34 = vpop.permute.xlu0 %913 }
  0xcd   : > { %10267 = vmatmul.mubr.msk.f32.gmra.mrb[4].mxu0 %vm961_vm1, %v870_v55 }
  0xce   : > { %10269 = vmatprep.mubr.msk.f32.mxu0 %vm961_vm1, %v871_v56 }
  0xcf   : > { %11205 = vset.pattern.permute.xlu1 %v11465_v22 }
  0xd0   : > { %v929_v27 = vpop.permute.xlu1 %928  ;;  %v924_v50 = vpop.permute.xlu0 %923  ;;  %4467 = vperm.xlu1 %11205, %v11838_v35  }
  0xd1   : > { %10270 = vmatmul.mubr.msk.f32.gmra.mrb[6].mxu0 %vm961_vm1, %v872_v57 }
  0xd2   : > { %10272 = vmatprep.mubr.msk.f32.mxu0 %vm961_vm1, %v873_v61 }
  0xd4   : > { %11207 = vset.pattern.permute.xlu1 %v11462_v2 }
  0xd5   : > { %10273 = vmatmul.mubr.msk.f32.gmra.mrb[8].mxu0 %vm961_vm1, %v874_v62 }
  0xd6   : > { %10275 = vmatprep.mubr.msk.f32.mxu0 %vm961_vm1, %v875_v63 }
  0xd9   : > { %10276 = vmatmul.mubr.msk.f32.gmra.mrb[10].mxu0 %vm961_vm1, %v876_v0 }
  0xda   : > { %10278 = vmatprep.mubr.msk.f32.mxu0 %vm961_vm1, %v877_v3 }
  0xdd   : > { %10279 = vmatmul.mubr.msk.f32.gmra.mrb[12].mxu0 %vm961_vm1, %v878_v4 }
  0xde   : > { %10281 = vmatprep.mubr.msk.f32.mxu0 %vm961_vm1, %v879_v5 }
  0xe1   : > { %10282 = vmatmul.mubr.msk.f32.gmra.mrb[14].mxu0 %vm961_vm1, %v880_v6 }
  0xe2   : > { %10341 = vmatprep.mubr.msk.f32.mxu0 %vm1424_vm2, %v1514_v7 }
  0xe5   : > { %10342 = vmatmul.mubr.msk.f32.vlgmr.msra.gmra.mrb[16].mxu0 %vm1424_vm2, %v1515_v8 }
  0xe6   : > { %11019 = vmatpush3.bf16.msra.mxu0 %v11890_v48  ;;  %10363 = vmatprep.mubr.msk.f32.mxu0 %vm1424_vm2, %v1518_v10 }
  0xe7   : > { %11021 = vmatprep.subr.bf16.mxu0 %v11895_v51 }
  0xea   : > { %11023 = vmatpush3.bf16.msra.mxu0 %v11895_v51 }
  0xeb   : > { %11033 = vmatprep.subr.bf16.mxu0 %v11890_v48 }
  0xed   : > { %10364 = vmatmul.mubr.msk.f32.vlgmr.msra.gmra.mrb[18].mxu0 %vm1424_vm2, %v1519_v11  ;;  %v939_v11 = vpop.permute.xlu1 %938 }
  0xee   : > { %11035 = vmatpush3.bf16.msra.mxu0 %v11890_v48  ;;  %10385 = vmatprep.mubr.msk.f32.mxu0 %vm1424_vm2, %v1522_v12 }
  0xef   : > { %11037 = vmatprep.subr.bf16.mxu0 %v11895_v51 }
  0xf2   : > { %11039 = vmatpush3.bf16.msra.mxu0 %v11895_v51 }
  0xf3   : > { %11049 = vmatprep.subr.bf16.mxu0 %v11890_v48 }
  0xf5   : > { %10386 = vmatmul.mubr.msk.f32.vlgmr.msra.gmra.mrb[20].mxu0 %vm1424_vm2, %v1523_v13 }
  0xf6   : > { %11051 = vmatpush3.bf16.msra.mxu0 %v11890_v48  ;;  %10407 = vmatprep.mubr.msk.f32.mxu0 %vm1424_vm2, %v1526_v14 }
  0xf7   : > { %11053 = vmatprep.subr.bf16.mxu0 %v11895_v51 }
  0xfa   : > { %11055 = vmatpush3.bf16.msra.mxu0 %v11895_v51 }
  0xfd   : > { %10408 = vmatmul.mubr.msk.f32.vlgmr.msra.gmra.mrb[22].mxu0 %vm1424_vm2, %v1527_v16 }
 0x198   : > { %v10262_v60 = vpop.f32.mrb[0].mxu0 }
 0x199   : > { %v1082_v25 = vadd.f32 %v10262_v60, %v889_v19  ;;  %v1076_v26 = vpop.f32.mrb[1].mxu0  ;;  %v934_v19 = vpop.permute.xlu0 %933 }
 0x19a   : > { %v12021_v28 = vadd.f32 %v1076_v26, %v884_v58 }
 0x19b   : > { %v1172_v29 = vmul.f32 0.044715, %v1082_v25  ;;  %v1156_v16 = vmul.f32 0.5, %v1082_v25 }
 0x19c   : > { %v1171_v33 = vmul.f32 0.044715, %v12021_v28  ;;  %v10265_v30 = vpop.f32.mrb[2].mxu0 }
 0x19d   : > { %v1188_v37 = vmul.f32 %v1172_v29, %v1082_v25  ;;  %v12024_v38 = vadd.f32 %v10265_v30, %v899_v59  ;;  %v1086_v39 = vpop.f32.mrb[3].mxu0  ;;  %v1155_v29 = vmul.f32 0.5, %v12021_v28 }
 0x19e   : > { %v1187_v40 = vmul.f32 %v1171_v33, %v12021_v28  ;;  %v12028_v15 = vadd.f32 %v1086_v39, %v894_v23 }
 0x19f   : > { %v1174_v32 = vmul.f32 0.044715, %v12024_v38  ;;  %v1204_v9 = vmul.f32 %v1188_v37, %v1082_v25  ;;  %v1158_v37 = vmul.f32 0.5, %v12024_v38 }
 0x1a0   : > { %v1173_v41 = vmul.f32 0.044715, %v12028_v15  ;;  %v10268_v42 = vpop.f32.mrb[4].mxu0  ;;  %v1203_v43 = vmul.f32 %v1187_v40, %v12021_v28 }
 0x1a1   : > { %v1190_v44 = vmul.f32 %v1174_v32, %v12024_v38  ;;  %v12035_v45 = vadd.f32 %v10268_v42, %v909_v24  ;;  %v1096_v46 = vpop.f32.mrb[5].mxu0  ;;  %v1220_v47 = vadd.f32 %v1204_v9, %v1082_v25 }
 0x1a2   : > { %v1189_v21 = vmul.f32 %v1173_v41, %v12028_v15  ;;  %v12038_v49 = vadd.f32 %v1096_v46, %v904_v1  ;;  %v1219_v36 = vadd.f32 %v1203_v43, %v12021_v28  ;;  %v949_v28 = vpop.permute.xlu1 %948 }
 0x1a3   : > { %v1206_v52 = vmul.f32 %v1190_v44, %v12024_v38  ;;  %v1176_v53 = vmul.f32 0.044715, %v12035_v45  ;;  %v1236_v54 = vmul.f32 0.7978846, %v1220_v47  ;;  %v944_v47 = vpop.permute.xlu0 %943 }
 0x1a4   : > { %v1205_v55 = vmul.f32 %v1189_v21, %v12028_v15  ;;  %v1175_v56 = vmul.f32 0.044715, %v12038_v49  ;;  %v10271_v57 = vpop.f32.mrb[6].mxu0  ;;  %v1235_v61 = vmul.f32 0.7978846, %v1219_v36  ;;  %v1157_v21 = vmul.f32 0.5, %v12028_v15 }
 0x1a5   : > { %v1192_v62 = vmul.f32 %v1176_v53, %v12035_v45  ;;  %v12047_v63 = vadd.f32 %v10271_v57, %v919_v31  ;;  %v1106_v0 = vpop.f32.mrb[7].mxu0  ;;  %11230 = vtanh.f32 %v1236_v54  ;;  %v1222_v3 = vadd.f32 %v1206_v52, %v12024_v38 }
 0x1a6   : > { %v1191_v4 = vmul.f32 %v1175_v56, %v12038_v49  ;;  %v12051_v5 = vadd.f32 %v1106_v0, %v914_v34  ;;  %11232 = vtanh.f32 %v1235_v61  ;;  %v1221_v6 = vadd.f32 %v1205_v55, %v12028_v15 }
 0x1a7   : > { %v1208_v7 = vmul.f32 %v1192_v62, %v12035_v45  ;;  %v1178_v8 = vmul.f32 0.044715, %v12047_v63  ;;  %v1238_v10 = vmul.f32 0.7978846, %v1222_v3  ;;  %v1160_v15 = vmul.f32 0.5, %v12035_v45 }
 0x1a8   : > { %v1207_v12 = vmul.f32 %v1191_v4, %v12038_v49  ;;  %v1177_v13 = vmul.f32 0.044715, %v12051_v5  ;;  %v10274_v14 = vpop.f32.mrb[8].mxu0  ;;  %v1237_v17 = vmul.f32 0.7978846, %v1221_v6 }
 0x1a9   : > { %v1194_v58 = vmul.f32 %v1178_v8, %v12047_v63  ;;  %v12061_v59 = vadd.f32 %v10274_v14, %v929_v27  ;;  %v1116_v23 = vpop.f32.mrb[9].mxu0  ;;  %11234 = vtanh.f32 %v1238_v10  ;;  %v1224_v24 = vadd.f32 %v1208_v7, %v12035_v45  ;;  %v954_v45 = vpop.permute.xlu0 %953 }
 0x1aa   : > { %v1193_v1 = vmul.f32 %v1177_v13, %v12051_v5  ;;  %v12065_v35 = vadd.f32 %v1116_v23, %v924_v50  ;;  %11236 = vtanh.f32 %v1237_v17  ;;  %v1223_v60 = vadd.f32 %v1207_v12, %v12038_v49  ;;  %v959_v13 = vpop.permute.xlu1 %958 }
 0x1ab   : > { %v1210_v26 = vmul.f32 %v1194_v58, %v12047_v63  ;;  %v1180_v25 = vmul.f32 0.044715, %v12061_v59  ;;  %v1240_v31 = vmul.f32 0.7978846, %v1224_v24 }
 0x1ac   : > { %v1209_v33 = vmul.f32 %v1193_v1, %v12051_v5  ;;  %v1179_v30 = vmul.f32 0.044715, %v12065_v35  ;;  %v10277_v34 = vpop.f32.mrb[10].mxu0  ;;  %v1239_v39 = vmul.f32 0.7978846, %v1223_v60 }
 0x1ad   : > { %v1196_v40 = vmul.f32 %v1180_v25, %v12061_v59  ;;  %v12076_v32 = vadd.f32 %v10277_v34, %v939_v11  ;;  %v1126_v9 = vpop.f32.mrb[11].mxu0  ;;  %11238 = vtanh.f32 %v1240_v31  ;;  %v1226_v41 = vadd.f32 %v1210_v26, %v12047_v63 }
 0x1ae   : > { %v1195_v42 = vmul.f32 %v1179_v30, %v12065_v35  ;;  %v12080_v43 = vadd.f32 %v1126_v9, %v934_v19  ;;  %11240 = vtanh.f32 %v1239_v39  ;;  %v1225_v44 = vadd.f32 %v1209_v33, %v12051_v5 }
 0x1af   : > { %v11231_v46 = vpop.eup %11230  ;;  %v1212_v38 = vmul.f32 %v1196_v40, %v12061_v59  ;;  %v1182_v27 = vmul.f32 0.044715, %v12076_v32  ;;  %v1242_v36 = vmul.f32 0.7978846, %v1226_v41 }
 0x1b0   : > { %v11233_v50 = vpop.eup %11232  ;;  %v1211_v52 = vmul.f32 %v1195_v42, %v12065_v35  ;;  %v1181_v53 = vmul.f32 0.044715, %v12080_v43  ;;  %v10280_v54 = vpop.f32.mrb[12].mxu0  ;;  %v1268_v55 = vadd.f32 1.0, %v11231_v46  ;;  %v1241_v56 = vmul.f32 0.7978846, %v1225_v44 }
 0x1b1   : > { %v1198_v57 = vmul.f32 %v1182_v27, %v12076_v32  ;;  %v12089_v61 = vadd.f32 %v10280_v54, %v949_v28  ;;  %v1136_v62 = vpop.f32.mrb[13].mxu0  ;;  %v1267_v0 = vadd.f32 1.0, %v11233_v50  ;;  %11242 = vtanh.f32 %v1242_v36 }
 0x1b2   : > { %v12091_v3 = vadd.f32 %v1136_v62, %v944_v47  ;;  %v1284_v4 = vmul.f32 %v1268_v55, %v1156_v16  ;;  %11244 = vtanh.f32 %v1241_v56  ;;  %v1197_v7 = vmul.f32 %v1181_v53, %v12080_v43 }
 0x1b3   : > { %v11235_v6 = vpop.eup %11234  ;;  %v1184_v8 = vmul.f32 0.044715, %v12089_v61  ;;  %v1283_v10 = vmul.f32 %v1267_v0, %v1155_v29  ;;  %v1227_v11 = vadd.f32 %v1211_v52, %v12065_v35  ;;  %v1214_v14 = vmul.f32 %v1198_v57, %v12076_v32 }
 0x1b4   : > { %v11237_v12 = vpop.eup %11236  ;;  %v1183_v17 = vmul.f32 0.044715, %v12091_v3  ;;  %v10283_v19 = vpop.f32.mrb[14].mxu0  ;;  %v1270_v58 = vadd.f32 1.0, %v11235_v6  ;;  %v1228_v16 = vadd.f32 %v1212_v38, %v12061_v59  ;;  %v1213_v34 = vmul.f32 %v1197_v7, %v12080_v43 }
 0x1b5   : > { %v1200_v23 = vmul.f32 %v1184_v8, %v12089_v61  ;;  %v12101_v24 = vadd.f32 %v10283_v19, %v959_v13  ;;  %v1146_v1 = vpop.f32.mrb[15].mxu0  ;;  %v10962_v60 = vpack.c.bf16 %v1284_v4, %v1283_v10  ;;  %v1269_v26 = vadd.f32 1.0, %v11237_v12 }
 0x1b6   : > { %v1199_v25 = vmul.f32 %v1183_v17, %v12091_v3  ;;  %v12104_v29 = vadd.f32 %v1146_v1, %v954_v45  ;;  %v1286_v31 = vmul.f32 %v1270_v58, %v1158_v37  ;;  %v1243_v33 = vmul.f32 0.7978846, %v1227_v11 }
 0x1b7   : > { %v11239_v30 = vpop.eup %11238  ;;  %v1186_v39 = vmul.f32 0.044715, %v12101_v24  ;;  %10963 = vmatprep.subr.bf16.mxu1 %v10962_v60  ;;  %v1285_v40 = vmul.f32 %v1269_v26, %v1157_v21  ;;  %v1244_v9 = vmul.f32 0.7978846, %v1228_v16  ;;  %v1159_v44 = vmul.f32 0.5, %v12038_v49 }
 0x1b8   : > { %v11241_v41 = vpop.eup %11240  ;;  %v1185_v28 = vmul.f32 0.044715, %v12104_v29  ;;  %10965 = vmatpush3.bf16.msra.mxu1 %v10962_v60  ;;  %v12109_v42 = vpop.f32.mrb[16].mxu0  ;;  %v1272_v46 = vadd.f32 1.0, %v11239_v30  ;;  %11246 = vtanh.f32 %v1243_v33  ;;  %v1216_v21 = vmul.f32 %v1200_v23, %v12089_v61 }
 0x1b9   : > { %14097 = vst [vmem:[#allocation12_spill] sm:$0xff] %v12109_v42  ;;  %v1202_v37 = vmul.f32 %v1186_v39, %v12101_v24  ;;  %v12113_v47 = vpop.f32.mrb[17].mxu0  ;;  %v10966_v38 = vpack.c.bf16 %v1286_v31, %v1285_v40  ;;  %v1271_v27 = vadd.f32 1.0, %v11241_v41  ;;  %11248 = vtanh.f32 %v1244_v9 }
 0x1ba   : > { %v1215_v36 = vmul.f32 %v1199_v25, %v12091_v3  ;;  %v1201_v50 = vmul.f32 %v1185_v28, %v12104_v29  ;;  %v1288_v52 = vmul.f32 %v1272_v46, %v1160_v15  ;;  %v1162_v49 = vmul.f32 0.5, %v12047_v63 }
 0x1bb   : > { %v11243_v53 = vpop.eup %11242  ;;  %10967 = vmatprep.subr.bf16.mxu1 %v10966_v38  ;;  %v1287_v54 = vmul.f32 %v1271_v27, %v1159_v44  ;;  %v1229_v55 = vadd.f32 %v1213_v34, %v12080_v43  ;;  %v1230_v56 = vadd.f32 %v1214_v14, %v12076_v32  ;;  %v1218_v62 = vmul.f32 %v1202_v37, %v12101_v24 }
 0x1bc   : > { %v11245_v57 = vpop.eup %11244  ;;  %v1217_v0 = vmul.f32 %v1201_v50, %v12104_v29  ;;  %10969 = vmatpush3.bf16.msra.mxu1 %v10966_v38  ;;  %v1161_v4 = vmul.f32 0.5, %v12051_v5  ;;  %v1274_v6 = vadd.f32 1.0, %v11243_v53  ;;  %v1231_v63 = vadd.f32 %v1215_v36, %v12091_v3 }
 0x1bd   : > { %v10970_v7 = vpack.c.bf16 %v1288_v52, %v1287_v54  ;;  %v1273_v15 = vadd.f32 1.0, %v11245_v57  ;;  %v1245_v8 = vmul.f32 0.7978846, %v1229_v55  ;;  %v1246_v10 = vmul.f32 0.7978846, %v1230_v56 }
 0x1be   : > { %v1290_v11 = vmul.f32 %v1274_v6, %v1162_v49  ;;  %v1232_v12 = vadd.f32 %v1216_v21, %v12089_v61  ;;  %v1247_v17 = vmul.f32 0.7978846, %v1231_v63  ;;  %v1233_v5 = vadd.f32 %v1217_v0, %v12104_v29 }
 0x1bf   : > { %10971 = vmatprep.subr.bf16.mxu1 %v10970_v7  ;;  %v1289_v13 = vmul.f32 %v1273_v15, %v1161_v4  ;;  %11250 = vtanh.f32 %v1245_v8  ;;  %v1234_v45 = vadd.f32 %v1218_v62, %v12101_v24  ;;  %v1163_v26 = vmul.f32 0.5, %v12065_v35 }
 0x1c0   : > { %v12126_v14 = vpop.f32.mrb[18].mxu0  ;;  %10973 = vmatpush3.bf16.msra.mxu1 %v10970_v7  ;;  %11252 = vtanh.f32 %v1246_v10  ;;  %v1248_v19 = vmul.f32 0.7978846, %v1232_v12  ;;  %v1249_v1 = vmul.f32 0.7978846, %v1233_v5  ;;  %v1164_v33 = vmul.f32 0.5, %v12061_v59 }
 0x1c1   : > { %14098 = vst [vmem:[#allocation13_spill] sm:$0xff] %v12126_v14  ;;  %v12129_v58 = vpop.f32.mrb[19].mxu0  ;;  %v10974_v16 = vpack.c.bf16 %v1290_v11, %v1289_v13  ;;  %11254 = vtanh.f32 %v1247_v17  ;;  %v1250_v31 = vmul.f32 0.7978846, %v1234_v45  ;;  %v1165_v35 = vmul.f32 0.5, %v12080_v43  ;;  %v1300_v10 = vld [vmem:[%s14035_s6 + $0x8] sm:$0xff] }
 0x1c2   : > { %v11247_v23 = vpop.eup %11246  ;;  %11256 = vtanh.f32 %v1248_v19  ;;  %v1166_v37 = vmul.f32 0.5, %v12076_v32  ;;  %v1167_v50 = vmul.f32 0.5, %v12091_v3  ;;  %v1168_v54 = vmul.f32 0.5, %v12089_v61  ;;  %v1301_v12 = vld [vmem:[%s14035_s6 + $0x10] sm:$0xff]  ;;  %v1416_v17 = vld [vmem:[%s14038_s9 + $0x18] sm:$0xff] }
 0x1c3   : > { %v11249_v60 = vpop.eup %11248  ;;  %10975 = vmatprep.subr.bf16.mxu1 %v10974_v16  ;;  %v1275_v25 = vadd.f32 1.0, %v11247_v23  ;;  %11258 = vtanh.f32 %v1249_v1  ;;  %v1169_v43 = vmul.f32 0.5, %v12104_v29  ;;  %v1170_v4 = vmul.f32 0.5, %v12101_v24  ;;  %v1413_v29 = vld [vmem:[%s14038_s9] sm:$0xff]  ;;  %v1414_v24 = vld [vmem:[%s14038_s9 + $0x8] sm:$0xff]  ;;  %v1415_v13 = vld [vmem:[%s14038_s9 + $0x10] sm:$0xff] }
 0x1c4   : > { %10977 = vmatpush3.bf16.msra.mxu1 %v10974_v16  ;;  %v1276_v30 = vadd.f32 1.0, %v11249_v60  ;;  %11260 = vtanh.f32 %v1250_v31  ;;  %v10995_v11 = vpack.c.bf16 %v1414_v24, %v1413_v29  ;;  %v14057_v63 = vmov 0.0|0.0   ;;  %v1302_v19 = vld [vmem:[%s14035_s6 + $0x18] sm:$0xff]  ;;  %v1408_v16 = vld [vmem:[%s643_s27] sm:$0xff]  ;;  %v1516_v23 = vld [vmem:[%s14040_s11 + $0x10] sm:$0xff]  ;;  %s11388_s27 = scalar_lea.vmem %s11387_s26, 256 }
 0x1c5   : > { %v1291_v34 = vmul.f32 %v1275_v25, %v1163_v26  ;;  %v10998_v5 = vpack.c.bf16 %v1416_v17, %v1415_v13  ;;  %v14056_v45 = vmov 0.0   ;;  %v1517_v1 = vld [vmem:[%s14040_s11 + $0x18] sm:$0xf]  ;;  %v1520_v60 = vld [vmem:[%s14040_s11 + $0x30] sm:$0xff]  ;;  %v2282_v24 = vld [vmem:[%s14037_s8 + $0x8] sm:$0xff] }
 0x1c6   : > { %v1292_v39 = vmul.f32 %v1276_v30, %v1164_v33  ;;  %v1521_v26 = vld [vmem:[%s14040_s11 + $0x38] sm:$0xf]  ;;  %v1524_v25 = vld [vmem:[%s14040_s11 + $0x50] sm:$0xff]  ;;  %v1502_v13 = vld [vmem:[%s14033_s4 + $0x20] sm:$0xff] }
 0x1c7   : > { %v1525_v31 = vld [vmem:[%s14040_s11 + $0x58] sm:$0xf]  ;;  %v1528_v33 = vld [vmem:[%s14040_s11 + $0x70] sm:$0xff] }
 0x1c8   : > { %v10978_v40 = vpack.c.bf16 %v1292_v39, %v1291_v34  ;;  %v12134_v9 = vpop.f32.mrb[20].mxu0  ;;  %v1529_v30 = vld [vmem:[%s14040_s11 + $0x78] sm:$0xf]  ;;  %v12230_v34 = vld [vmem:[%s14043_s14 + $0x28] sm:$0xff]  ;;  %v12247_v39 = vld [vmem:[%s14043_s14 + $0x20] sm:$0xff] }
 0x1c9   : > { %14099 = vst [vmem:[#allocation14_spill] sm:$0xff] %v12134_v9  ;;  %v11251_v41 = vpop.eup %11250  ;;  %v12136_v28 = vpop.f32.mrb[21].mxu0  ;;  %4491 = vperm.xlu1 %11207, %v12230_v34   ;;  %4486 = vperm.xlu0 %11206, %v12247_v39  }
 0x1ca   : > { %v11253_v44 = vpop.eup %11252  ;;  %10979 = vmatprep.subr.bf16.mxu1 %v10978_v40  ;;  %v1277_v46 = vadd.f32 1.0, %v11251_v41  ;;  %v1306_v41 = vpop.permute.xlu0 %1305 }
 0x1cb   : > { %10981 = vmatpush3.bf16.msra.mxu1 %v10978_v40  ;;  %v1278_v59 = vadd.f32 1.0, %v11253_v44  ;;  %v11255_v38 = vpop.eup %11254  ;;  %v12253_v40 = vld [vmem:[%s14043_s14 + $0x38] sm:$0xff] }
 0x1cc   : > { %v1293_v27 = vmul.f32 %v1277_v46, %v1165_v35  ;;  %v11257_v21 = vpop.eup %11256  ;;  %v1279_v52 = vadd.f32 1.0, %v11255_v38  ;;  %v1311_v35 = vpop.permute.xlu1 %1310 }
 0x1cd   : > { %v1294_v36 = vmul.f32 %v1278_v59, %v1166_v37  ;;  %v11259_v53 = vpop.eup %11258  ;;  %v1280_v49 = vadd.f32 1.0, %v11257_v21  ;;  %4501 = vperm.xlu0 %11206, %v12253_v40  }
 0x1ce   : > { %v11261_v55 = vpop.eup %11260  ;;  %v1295_v57 = vmul.f32 %v1279_v52, %v1167_v50  ;;  %v1281_v62 = vadd.f32 1.0, %v11259_v53  ;;  %v1316_v44 = vpop.permute.xlu0 %1315 }
 0x1cf   : > { %v10982_v56 = vpack.c.bf16 %v1294_v36, %v1293_v27  ;;  %v1296_v0 = vmul.f32 %v1280_v49, %v1168_v54  ;;  %v1282_v6 = vadd.f32 1.0, %v11261_v55 }
 0x1d0   : > { %v12143_v32 = vpop.f32.mrb[22].mxu0  ;;  %v1297_v3 = vmul.f32 %v1281_v62, %v1169_v43  ;;  %v1321_v37 = vpop.permute.xlu1 %1320  ;;  %v1498_v62 = vld [vmem:[%s14033_s4] sm:$0xff] }
 0x1d1   : > { %14100 = vst [vmem:[#allocation15_spill] sm:$0xff] %v12143_v32  ;;  %10983 = vmatprep.subr.bf16.mxu1 %v10982_v56  ;;  %v12146_v7 = vpop.f32.mrb[23].mxu0  ;;  %v10986_v15 = vpack.c.bf16 %v1296_v0, %v1295_v57  ;;  %v1298_v61 = vmul.f32 %v1282_v6, %v1170_v4  ;;  %11209 = vset.pattern.permute.xlu0 %v11463_v18 }
 0x1d2   : > { %10985 = vmatpush3.bf16.msra.mxu1 %v10982_v56  ;;  %v12257_v46 = vpop.permute.xlu0 %2287  ;;  %v9461_v56 = vld [vmem:[%s14039_s10] ss:$0 sm:$0xff] }
 0x1d3   : > { %10987 = vmatprep.subr.bf16.mxu1 %v10986_v15  ;;  %v10990_v8 = vpack.c.bf16 %v1298_v61, %v1297_v3  ;;  %v1499_v3 = vld [vmem:[%s14033_s4 + $0x8] sm:$0xff]  ;;  %v1500_v61 = vld [vmem:[%s14033_s4 + $0x10] sm:$0xff] }
 0x1d4   : > { %v12267_v53 = vpop.permute.xlu1 %2292 }
 0x1d6   : > { %10989 = vmatpush3.bf16.msra.mxu1 %v10986_v15  ;;  %v12263_v36 = vpop.permute.xlu0 %2297 }
 0x1d7   : > { %10991 = vmatprep.subr.bf16.mxu1 %v10990_v8 }
 0x1da   : > { %10993 = vmatpush3.bf16.msra.mxu1 %v10990_v8  ;;  %v1549_v0 = vpop.permute.xlu0 %1548  ;;  %v12290_v8 = vpop.permute.xlu1 %2302 }
 0x1db   : > { %10994 = vmatprep.subr.bf16.mxu1 %v14057_v63  ;;  %v12285_v15 = vadd.f32 %v12113_v47, %v1549_v0  ;;  %v2283_v47 = vld [vmem:[%s14037_s8 + $0x10] sm:$0xff]  ;;  %v2708_v0 = vld [vmem:[%s14042_s13 + $0x60] sm:$0xff] }
 0x1dd   : > { %10317 = vmatmul.mubr.f32.vlgmr.msra.gmra.mrb[0].mxu1 %v1300_v10  ;;  %14106 = vst [vmem:[#allocation20_spill] sm:$0xff] %v12285_v15  ;;  %v1501_v10 = vld [vmem:[%s14033_s4 + $0x18] sm:$0xff] }
 0x1de   : > { %10996 = vmatpush3.bf16.msra.mxu1 %v10995_v11  ;;  %10319 = vmatprep.mubr.f32.mxu1 %v1301_v12 }
 0x1df   : > { %10997 = vmatprep.subr.bf16.mxu1 %v14057_v63 }
 0x1e1   : > { %10320 = vmatmul.mubr.f32.gmra.mrb[2].mxu1 %v1302_v19  ;;  %v2284_v19 = vld [vmem:[%s14037_s8 + $0x18] sm:$0xff] }
 0x1e2   : > { %10999 = vmatpush3.bf16.msra.mxu1 %v10998_v5  ;;  %10330 = vmatprep.mubr.msk.f32.mxu1 %vm11467_vm3, %v14056_v45  ;;  %v1503_v5 = vld [vmem:[%s14033_s4 + $0x28] sm:$0xff] }
 0x1e3   : > { %11009 = vmatprep.subr.bf16.mxu1 %v11890_v48 }
 0x1e5   : > { %10331 = vmatmul.mubr.msk.f32.vlgmr.msra.gmra.mrb[4].mxu1 %vm1424_vm2, %v1408_v16 }
 0x1e6   : > { %11011 = vmatpush3.bf16.msra.mxu1 %v11890_v48  ;;  %10352 = vmatprep.mubr.msk.f32.mxu1 %vm1424_vm2, %v1516_v23  ;;  %v2696_v23 = vld [vmem:[%s14042_s13] sm:$0xff] }
 0x1e7   : > { %11013 = vmatprep.subr.bf16.mxu1 %v11895_v51 }
 0x1ea   : > { %11015 = vmatpush3.bf16.msra.mxu1 %v11895_v51 }
 0x1eb   : > { %11025 = vmatprep.subr.bf16.mxu1 %v11890_v48 }
 0x1ed   : > { %10353 = vmatmul.mubr.msk.f32.vlgmr.msra.gmra.mrb[6].mxu1 %vm1424_vm2, %v1517_v1  ;;  %v1559_v1 = vpop.permute.xlu1 %1558 }
 0x1ee   : > { %11027 = vmatpush3.bf16.msra.mxu1 %v11890_v48  ;;  %10374 = vmatprep.mubr.msk.f32.mxu1 %vm1424_vm2, %v1520_v60 }
 0x1ef   : > { %11029 = vmatprep.subr.bf16.mxu1 %v11895_v51 }
 0x1f2   : > { %11031 = vmatpush3.bf16.msra.mxu1 %v11895_v51 }
 0x1f3   : > { %11041 = vmatprep.subr.bf16.mxu1 %v11890_v48 }
 0x1f5   : > { %10375 = vmatmul.mubr.msk.f32.vlgmr.msra.gmra.mrb[8].mxu1 %vm1424_vm2, %v1521_v26 }
 0x1f6   : > { %11043 = vmatpush3.bf16.msra.mxu1 %v11890_v48  ;;  %10396 = vmatprep.mubr.msk.f32.mxu1 %vm1424_vm2, %v1524_v25 }
 0x1f7   : > { %11045 = vmatprep.subr.bf16.mxu1 %v11895_v51 }
 0x1fa   : > { %11047 = vmatpush3.bf16.msra.mxu1 %v11895_v51 }
 0x1fb   : > { %11057 = vmatprep.subr.bf16.mxu1 %v11890_v48 }
 0x1fd   : > { %10397 = vmatmul.mubr.msk.f32.vlgmr.msra.gmra.mrb[10].mxu1 %vm1424_vm2, %v1525_v31  ;;  %v1504_v31 = vld [vmem:[%s14033_s4 + $0x30] sm:$0xff] }
 0x1fe   : > { %11059 = vmatpush3.bf16.msra.mxu1 %v11890_v48  ;;  %10418 = vmatprep.mubr.msk.f32.mxu1 %vm1424_vm2, %v1528_v33  ;;  %v12236_v48 = vld [vmem:[%s14043_s14 + $0x30] sm:$0xff] }
 0x1ff   : > { %11061 = vmatprep.subr.bf16.mxu1 %v11895_v51  ;;  %4496 = vperm.xlu1 %11207, %v12236_v48  }
 0x202   : > { %11063 = vmatpush3.bf16.msra.mxu1 %v11895_v51  ;;  %v2281_v51 = vld [vmem:[%s14037_s8] sm:$0xff] }
 0x203   : > { %10429 = vmatprep.mubr.msk.f32.mxu0 %vm1424_vm2, %v2281_v51  ;;  %11208 = vset.pattern.permute.xlu1 %v11463_v18  ;;  %v1505_v51 = vld [vmem:[%s14033_s4 + $0x38] sm:$0xff] }
 0x205   : > { %10419 = vmatmul.mubr.msk.f32.vlgmr.msra.gmra.mrb[12].mxu1 %vm1424_vm2, %v1529_v30  ;;  %v2697_v30 = vld [vmem:[%s14042_s13 + $0x8] sm:$0xff] }
 0x2b0   : > { %v10318_v59 = vpop.f32.mrb[0].mxu1 }
 0x2b1   : > { %v12259_v38 = vadd.f32 %v10318_v59, %v1311_v35  ;;  %v1389_v27 = vpop.f32.mrb[1].mxu1 }
 0x2b2   : > { %v12261_v21 = vadd.f32 %v1389_v27, %v1306_v41  ;;  %v2698_v41 = vld [vmem:[%s14042_s13 + $0x10] sm:$0xff]  ;;  %v2700_v27 = vld [vmem:[%s14042_s13 + $0x20] sm:$0xff] }
 0x2b3   : > { %14102 = vst [vmem:[#allocation16_spill] sm:$0xff] %v12259_v38 }
 0x2b4   : > { %14103 = vst [vmem:[#allocation17_spill] sm:$0xff] %v12261_v21  ;;  %v11064_v50 = vpack.c.bf16 %v12259_v38, %v12261_v21  ;;  %v10321_v52 = vpop.f32.mrb[2].mxu1 }
 0x2b5   : > { %v12269_v54 = vadd.f32 %v10321_v52, %v1321_v37  ;;  %v1399_v49 = vpop.f32.mrb[3].mxu1  ;;  %v2699_v37 = vld [vmem:[%s14042_s13 + $0x18] sm:$0xff] }
 0x2b6   : > { %v12271_v55 = vadd.f32 %v1399_v49, %v1316_v44  ;;  %11065 = vmatprep.subr.bf16.mxu0 %v11064_v50 }
 0x2b7   : > { %14104 = vst [vmem:[#allocation18_spill] sm:$0xff] %v12269_v54  ;;  %11067 = vmatpush3.bf16.msra.mxu0 %v11064_v50  ;;  %v1579_v50 = vpop.permute.xlu1 %1578 }
 0x2b8   : > { %14105 = vst [vmem:[#allocation19_spill] sm:$0xff] %v12271_v55  ;;  %v11068_v57 = vpack.c.bf16 %v12269_v54, %v12271_v55  ;;  %v1494_v43 = vpop.f32.mrb[4].mxu1 }
 0x2b9   : > { %v1495_v4 = vadd.f32 %v9461_v56, %v1494_v43  ;;  %v10332_v6 = vpop.f32.mrb[5].mxu1  ;;  %v2701_v56 = vld [vmem:[%s14042_s13 + $0x28] sm:$0xff]  ;;  %v2703_v43 = vld [vmem:[%s14042_s13 + $0x38] sm:$0xff] }
 0x2ba   : > { %11069 = vmatprep.subr.bf16.mxu0 %v11068_v57 }
 0x2bb   : > { %11071 = vmatpush3.bf16.msra.mxu0 %v11068_v57  ;;  %v12292_v29 = vmul.f32 %v1498_v62, %v1495_v4  ;;  %v12305_v11 = vmul.f32 %v1499_v3, %v1495_v4  ;;  %v12309_v12 = vmul.f32 %v1500_v61, %v1495_v4  ;;  %v12319_v17 = vmul.f32 %v1501_v10, %v1495_v4  ;;  %v2702_v57 = vld [vmem:[%s14042_s13 + $0x30] sm:$0xff]  ;;  %v2709_v61 = vld [vmem:[%s14042_s13 + $0x68] sm:$0xff]  ;;  %v2711_v10 = vld [vmem:[%s14042_s13 + $0x78] sm:$0xff] }
 0x2bc   : > { %10455 = vmatprep.subr.msk.mxu0 %vm2741_vm4, %v12285_v15  ;;  %v12337_v26 = vmul.f32 %v1502_v13, %v1495_v4  ;;  %v12347_v33 = vmul.f32 %v1503_v5, %v1495_v4  ;;  %v12363_v44 = vmul.f32 %v1504_v31, %v1495_v4  ;;  %v12368_v35 = vmul.f32 %v1505_v51, %v1495_v4  ;;  %v1599_v4 = vpop.permute.xlu1 %1598  ;;  %v2716_v13 = vld [vmem:[%s14042_s13 + $0xa0] sm:$0xff]  ;;  %v1537_v31 = vld [vmem:[%s14041_s12 + $0x38] sm:$0xf] }
 0x2bd   : > { %4601 = vrot.lane.b32.xlu1 %v12292_v29, %s11469_s29  ;;  %10443 = vmatprep.mubr.msk.f32.mxu1 %vm1424_vm2, %v12292_v29  ;;  %v1545_v51 = vld [vmem:[%s14041_s12 + $0x78] sm:$0xf] }
 0x2be   : > { %10430 = vmatmul.mubr.msk.f32.vlgmr.msra.gmra.mrb[24].mxu0 %vm1424_vm2, %v2282_v24  ;;  %4603 = vrot.lane.b32.xlu0 %v12305_v11, %s11469_s29  ;;  %v2710_v24 = vld [vmem:[%s14042_s13 + $0x70] sm:$0xff] }
 0x2bf   : > { %10456 = vmatpush3.msk.msra.mxu0 %vm2741_vm4, %v12285_v15  ;;  %10432 = vmatprep.mubr.msk.f32.mxu0 %vm1424_vm2, %v2283_v47 }
 0x2c0   : > { %v12330_v16 = vpop.f32.mrb[6].mxu1 }
 0x2c1   : > { %14107 = vst [vmem:[#allocation21_spill] sm:$0xff] %v12330_v16  ;;  %4605 = vrot.lane.b32.xlu1 %v12309_v12, %s11469_s29  ;;  %v1779_v60 = vpop.f32.mrb[7].mxu1 }
 0x2c2   : > { %v12339_v25 = vadd.f32 %v1779_v60, %v1559_v1  ;;  %10433 = vmatmul.mubr.msk.f32.gmra.mrb[26].mxu0 %vm1424_vm2, %v2284_v19  ;;  %4607 = vrot.lane.b32.xlu0 %v12319_v17, %s11469_s29  ;;  %v1619_v19 = vpop.permute.xlu1 %1618  ;;  %v2717_v1 = vld [vmem:[%s14042_s13 + $0xa8] sm:$0xff]  ;;  %v9690_v60 = vld [vmem:[%s14043_s14 + $0x58] sm:$0xff] }
 0x2c3   : > { %10457 = vmatprep.mubr.msk.f32.mxu0 %vm2728_vm5, %v2696_v23 }
 0x2c4   : > { %14108 = vst [vmem:[#allocation22_spill] sm:$0xff] %v12339_v25  ;;  %10463 = vmatprep.subr.msk.mxu0 %vm2741_vm4, %v12339_v25 }
 0x2c5   : > { %4609 = vrot.lane.b32.xlu1 %v12337_v26, %s11469_s29 }
 0x2c6   : > { %10458 = vmatmul.mubr.msk.f32.vlgmr.msra.gmra.mrb[28].mxu0 %vm2728_vm5, %v2697_v30  ;;  %4611 = vrot.lane.b32.xlu0 %v12347_v33, %s11469_s29  ;;  %v1541_v30 = vld [vmem:[%s14041_s12 + $0x58] sm:$0xf] }
 0x2c7   : > { %10464 = vmatpush3.msk.msra.mxu0 %vm2741_vm4, %v12339_v25  ;;  %10460 = vmatprep.mubr.msk.f32.mxu0 %vm2728_vm5, %v2698_v41  ;;  %v1535_v41 = vld [vmem:[%s14041_s12 + $0x28] sm:$0xf] }
 0x2c8   : > { %v12376_v59 = vpop.f32.mrb[8].mxu1 }
 0x2c9   : > { %14109 = vst [vmem:[#allocation23_spill] sm:$0xff] %v12376_v59  ;;  %4613 = vrot.lane.b32.xlu1 %v12363_v44, %s11469_s29  ;;  %v1941_v52 = vpop.f32.mrb[9].mxu1 }
 0x2ca   : > { %v12383_v49 = vadd.f32 %v1941_v52, %v1579_v50  ;;  %10461 = vmatmul.mubr.msk.f32.gmra.mrb[30].mxu0 %vm2728_vm5, %v2699_v37  ;;  %4615 = vrot.lane.b32.xlu0 %v12368_v35, %s11469_s29  ;;  %v1539_v37 = vld [vmem:[%s14041_s12 + $0x48] sm:$0xf]  ;;  %v2718_v50 = vld [vmem:[%s14042_s13 + $0xb0] sm:$0xff]  ;;  %s9821_s29 = sshll.u32 %s11452_s30, 7 }
 0x2cb   : > { %10465 = vmatprep.mubr.msk.f32.mxu0 %vm2728_vm5, %v2700_v27  ;;  %v1543_v27 = vld [vmem:[%s14041_s12 + $0x68] sm:$0xf]  ;;  %s13981_s23 = scalar_lea.hbm %s14171_s20, %s9821_s29 }
 0x2cc   : > { %14110 = vst [vmem:[#allocation24_spill] sm:$0xff] %v12383_v49  ;;  %10479 = vmatprep.subr.msk.mxu0 %vm2741_vm4, %v12383_v49  ;;  %v2725_v52 = vld [vmem:[%s14042_s13 + $0xe8] sm:$0xff] }
 0x2cd   : > { %6568 = vperm.xlu1 %11208, %v12247_v39  }
 0x2ce   : > { %10466 = vmatmul.mubr.msk.f32.vlgmr.msra.gmra.mrb[32].mxu0 %vm2728_vm5, %v2701_v56  ;;  %6572 = vperm.xlu0 %11209, %v12230_v34   ;;  %v2727_v56 = vld [vmem:[%s14042_s13 + $0xf8] sm:$0xff] }
 0x2cf   : > { %10480 = vmatpush3.msk.msra.mxu0 %vm2741_vm4, %v12383_v49  ;;  %10468 = vmatprep.mubr.msk.f32.mxu0 %vm2728_vm5, %v2702_v57 }
 0x2d0   : > { %v12406_v62 = vpop.f32.mrb[10].mxu1 }
 0x2d1   : > { %14111 = vst [vmem:[#allocation25_spill] sm:$0xff] %v12406_v62  ;;  %6576 = vperm.xlu1 %11208, %v12236_v48   ;;  %v2103_v6 = vpop.f32.mrb[11].mxu1 }
 0x2d2   : > { %v12412_v3 = vadd.f32 %v2103_v6, %v1599_v4  ;;  %10469 = vmatmul.mubr.msk.f32.gmra.mrb[34].mxu0 %vm2728_vm5, %v2703_v43  ;;  %11210 = vset.pattern.permute.xlu0 %v11464_v20 }
 0x2d3   : > { %10481 = vmatprep.mubr.msk.f32.mxu0 %vm2728_vm5, %v2708_v0  ;;  %6634 = vperm.xlu0 %11210, %v12247_v39  }
 0x2d4   : > { %14112 = vst [vmem:[#allocation26_spill] sm:$0xff] %v12412_v3  ;;  %10495 = vmatprep.subr.msk.mxu0 %vm2741_vm4, %v12412_v3 }
 0x2d5   : > { %6580 = vperm.xlu1 %11208, %v12253_v40  }
 0x2d6   : > { %10482 = vmatmul.mubr.msk.f32.vlgmr.msra.gmra.mrb[36].mxu0 %vm2728_vm5, %v2709_v61 }
 0x2d7   : > { %10496 = vmatpush3.msk.msra.mxu0 %vm2741_vm4, %v12412_v3  ;;  %10484 = vmatprep.mubr.msk.f32.mxu0 %vm2728_vm5, %v2710_v24 }
 0x2d8   : > { %v12434_v47 = vpop.f32.mrb[12].mxu1  ;;  %11213 = vset.pattern.permute.xlu0 %v11465_v22 }
 0x2d9   : > { %14113 = vst [vmem:[#allocation27_spill] sm:$0xff] %v12434_v47  ;;  %11211 = vset.pattern.permute.xlu1 %v11464_v20  ;;  %v2265_v5 = vpop.f32.mrb[13].mxu1  ;;  %6658 = vperm.xlu0 %11213, %v12230_v34  }
 0x2da   : > { %v12442_v23 = vadd.f32 %v2265_v5, %v1619_v19  ;;  %6638 = vperm.xlu1 %11211, %v12230_v34   ;;  %10485 = vmatmul.mubr.msk.f32.gmra.mrb[38].mxu0 %vm2728_vm5, %v2711_v10  ;;  %v9687_v34 = vld [vmem:[%s14043_s14 + $0x40] sm:$0xff] }
 0x2db   : > { %10497 = vmatprep.mubr.msk.f32.mxu0 %vm2728_vm5, %v2716_v13  ;;  %v1569_v13 = vpop.permute.xlu0 %1568 }
 0x2dc   : > { %14114 = vst [vmem:[#allocation28_spill] sm:$0xff] %v12442_v23  ;;  %10511 = vmatprep.subr.msk.mxu0 %vm2741_vm4, %v12442_v23  ;;  %v12548_v5 = vadd.f32 %v12129_v58, %v1569_v13  ;;  %v2704_v58 = vld [vmem:[%s14042_s13 + $0x40] sm:$0xff] }
 0x2dd   : > { %6662 = vperm.xlu0 %11213, %v12236_v48  }
 0x2de   : > { %11212 = vset.pattern.permute.xlu1 %v11465_v22  ;;  %10498 = vmatmul.mubr.msk.f32.vlgmr.msra.gmra.mrb[40].mxu0 %vm2728_vm5, %v2717_v1  ;;  %14115 = vst [vmem:[#allocation29_spill] sm:$0xff] %v12548_v5  ;;  %v2722_v1 = vld [vmem:[%s14042_s13 + $0xd0] sm:$0xff] }
 0x2df   : > { %10512 = vmatpush3.msk.msra.mxu0 %vm2741_vm4, %v12442_v23  ;;  %6654 = vperm.xlu1 %11212, %v12247_v39   ;;  %v9688_v39 = vld [vmem:[%s14043_s14 + $0x48] sm:$0xff] }
 0x2e0   : > { %10500 = vmatprep.mubr.msk.f32.mxu0 %vm2728_vm5, %v2718_v50 }
 0x2e1   : > { %11216 = vset.pattern.permute.xlu0 %v11462_v2 }
 0x2e2   : > { %6685 = vperm.xlu0 %11216, %v9687_v34  }
 0x2e3   : > { %11214 = vset.pattern.permute.xlu1 %v11464_v20 }
 0x2e4   : > { %6642 = vperm.xlu1 %11214, %v12236_v48   ;;  %v9689_v48 = vld [vmem:[%s14043_s14 + $0x50] sm:$0xff] }
 0x2e6   : > { %6700 = vperm.xlu0 %11216, %v9690_v60  }
 0x2e8   : > { %6646 = vperm.xlu1 %11214, %v12253_v40  }
 0x2ea   : > { %6802 = vrot.lane.b32.xlu0 %v12305_v11, %s11470_s0 }
 0x2ec   : > { %11215 = vset.pattern.permute.xlu1 %v11465_v22 }
 0x2ed   : > { %6666 = vperm.xlu1 %11215, %v12253_v40   ;;  %v1533_v40 = vld [vmem:[%s14041_s12 + $0x18] sm:$0xf] }
 0x2ee   : > { %6806 = vrot.lane.b32.xlu0 %v12319_v17, %s11470_s0 }
 0x2f1   : > { %11217 = vset.pattern.permute.xlu1 %v11462_v2 }
 0x2f2   : > { %6690 = vperm.xlu1 %11217, %v9688_v39   ;;  %6810 = vrot.lane.b32.xlu0 %v12347_v33, %s11470_s0 }
 0x2f6   : > { %6695 = vperm.xlu1 %11217, %v9689_v48   ;;  %6814 = vrot.lane.b32.xlu0 %v12368_v35, %s11470_s0 }
 0x2fa   : > { %6800 = vrot.lane.b32.xlu1 %v12292_v29, %s11470_s0  ;;  %1563 = vperm.xlu0 %11216, %v1533_v40   ;;  %v1531_v29 = vld [vmem:[%s14041_s12 + $0x8] sm:$0xf] }
 0x2fe   : > { %6804 = vrot.lane.b32.xlu1 %v12309_v12, %s11470_s0  ;;  %1583 = vperm.xlu0 %11216, %v1537_v31  }
 0x302   : > { %6808 = vrot.lane.b32.xlu1 %v12337_v26, %s11470_s0  ;;  %1603 = vperm.xlu0 %11216, %v1541_v30  }
 0x306   : > { %6812 = vrot.lane.b32.xlu1 %v12363_v44, %s11470_s0  ;;  %1623 = vperm.xlu0 %11216, %v1545_v51   ;;  %s629_s0 = sand.u32 1, %s11444_s28  }
 0x307   : > { %s9438_s18 = sshll.u32 %s629_s0, 3  ;;  %s9309_s22 = scalar_lea.sflag [#allocation3], %s629_s0 }
 0x308   : > { %s631_s25 = scalar_lea.vmem [#allocation2], %s9438_s18 }
 0x309   : > { %s9323_s19 = sshll.u32 %s631_s25, 4  ;;  %s13983_s19 = int_to_ptr.vmem [resolvable:$true] %s9323_s19 }
 0x30a   : > { %1553 = vperm.xlu1 %11217, %v1531_v29   ;;  %11219 = vset.pattern.permute.xlu0 %v11463_v18  ;;  %s11382_s30 = scalar_lea.vmem %s13983_s19, 128  ;;  %p11389_p1 = scmp.lt.s32.totalorder %s13983_s19, %s11387_s26 }
 0x30b   : > { %8771 = vperm.xlu0 %11219, %v9688_v39   ;;  %p11383_p12 = scmp.ne.s32.totalorder %s13983_s19, %s11382_s30  ;;  %p11390_p2 = scmp.lt.s32.totalorder %s11388_s27, %s11382_s30 }
 0x30d   : > { %p11384_p13 = pnand %p11383_p12, %p11607_p4  ;;  %p11391_p3 = por %p11390_p2, %p11389_p1 }
 0x30e   : > { %1573 = vperm.xlu1 %11217, %v1535_v41  }
 0x30f   : > { %11220 = vset.pattern.permute.xlu0 %v11464_v20  ;;  %p11385_p0 = pneg %p11384_p13 }
 0x310   : > { %8833 = vperm.xlu0 %11220, %v9687_v34  }
 0x311   : > { %p11392_p5 = pnand %p11391_p3, %p11385_p0 }
 0x312   : > { %1593 = vperm.xlu1 %11217, %v1539_v37  }
 0x314   : > { %11222 = vset.pattern.permute.xlu0 %v11465_v22 }
 0x315   : > { %8853 = vperm.xlu0 %11222, %v9687_v34  }
 0x316   : > { %1613 = vperm.xlu1 %11217, %v1543_v27  }
 0x319   : > { %8861 = vperm.xlu0 %11222, %v9689_v48  }
 0x31a   : > { %11218 = vset.pattern.permute.xlu1 %v11463_v18  ;;  %v2719_v18 = vld [vmem:[%s14042_s13 + $0xb8] sm:$0xff] }
 0x31b   : > { %8767 = vperm.xlu1 %11218, %v9687_v34   ;;  %10501 = vmatmul.mubr.msk.f32.gmra.mrb[42].mxu0 %vm2728_vm5, %v2719_v18  ;;  %v2723_v34 = vld [vmem:[%s14042_s13 + $0xd8] sm:$0xff] }
 0x31d   : > { %11226 = vset.pattern.permute.xlu0 %v11462_v2 }
 0x31f   : > { %8775 = vperm.xlu1 %11218, %v9689_v48  }
 0x323   : > { %8779 = vperm.xlu1 %11218, %v9690_v60  }
 0x327   : > { %11221 = vset.pattern.permute.xlu1 %v11464_v20 }
 0x328   : > { %8837 = vperm.xlu1 %11221, %v9688_v39  }
 0x32c   : > { %8841 = vperm.xlu1 %11221, %v9689_v48  }
 0x330   : > { %11223 = vset.pattern.permute.xlu1 %v11465_v22 }
 0x331   : > { %8857 = vperm.xlu1 %11223, %v9688_v39  }
 0x335   : > { %11224 = vset.pattern.permute.xlu1 %v11464_v20  ;;  %v2724_v20 = vld [vmem:[%s14042_s13 + $0xe0] sm:$0xff] }
 0x336   : > { %8845 = vperm.xlu1 %11224, %v9690_v60   ;;  %10513 = vmatprep.mubr.msk.f32.mxu0 %vm2728_vm5, %v2724_v20 }
 0x337   : > { %10514 = vmatmul.mubr.msk.f32.vlgmr.msra.gmra.mrb[44].mxu0 %vm2728_vm5, %v2725_v52 }
 0x33a   : > { %11225 = vset.pattern.permute.xlu1 %v11465_v22  ;;  %v2726_v22 = vld [vmem:[%s14042_s13 + $0xf0] sm:$0xff] }
 0x33b   : > { %8865 = vperm.xlu1 %11225, %v9690_v60   ;;  %10516 = vmatprep.mubr.msk.f32.mxu0 %vm2728_vm5, %v2726_v22 }
 0x33c   : > { %10517 = vmatmul.mubr.msk.f32.gmra.mrb[46].mxu0 %vm2728_vm5, %v2727_v56 }
 0x33f   : > { %11227 = vset.pattern.permute.xlu1 %v11462_v2 }
 0x391   : > { %v10431_v57 = vpop.f32.mrb[24].mxu0 }
 0x392   : > { %v2389_v43 = vadd.f32 %v10431_v57, %v12267_v53  ;;  %v2383_v0 = vpop.f32.mrb[25].mxu0 }
 0x393   : > { %v2384_v2 = vadd.f32 %v2383_v0, %v12257_v46  ;;  %v1589_v46 = vpop.permute.xlu0 %1588 }
 0x394   : > { %v12553_v53 = vadd.f32 %v12136_v28, %v1589_v46  ;;  %v2705_v28 = vld [vmem:[%s14042_s13 + $0x48] sm:$0xff] }
 0x395   : > { %v11072_v4 = vpack.c.bf16 %v2389_v43, %v2384_v2  ;;  %v10434_v6 = vpop.f32.mrb[26].mxu0 }
 0x396   : > { %v2399_v61 = vadd.f32 %v10434_v6, %v12290_v8  ;;  %v2393_v24 = vpop.f32.mrb[27].mxu0  ;;  %14116 = vst [vmem:[#allocation30_spill] sm:$0xff] %v12553_v53 }
 0x397   : > { %v2394_v10 = vadd.f32 %v2393_v24, %v12263_v36  ;;  %11073 = vmatprep.subr.bf16.mxu1 %v11072_v4  ;;  %v2706_v36 = vld [vmem:[%s14042_s13 + $0x50] sm:$0xff]  ;;  %v1609_v8 = vpop.permute.xlu0 %1608 }
 0x398   : > { %11075 = vmatpush3.bf16.msra.mxu1 %v11072_v4 }
 0x399   : > { %v11076_v19 = vpack.c.bf16 %v2399_v61, %v2394_v10  ;;  %v12630_v60 = vpop.f32.mrb[28].mxu0 }
 0x39a   : > { %v2811_v39 = vpop.f32.mrb[29].mxu0 }
 0x39b   : > { %11077 = vmatprep.subr.bf16.mxu1 %v11076_v19  ;;  %v12668_v2 = vpop.permute.xlu0 %2533 }
 0x39c   : > { %11079 = vmatpush3.bf16.msra.mxu1 %v11076_v19  ;;  %14118 = vst [vmem:[#allocation32_spill] sm:$0xff] %v12668_v2 }
 0x39d   : > { %10471 = vmatprep.subr.msk.mxu1 %vm2741_vm4, %v12548_v5  ;;  %v12633_v48 = vpop.f32.mrb[30].mxu0 }
 0x39e   : > { %v12635_v40 = vpop.f32.mrb[31].mxu0 }
 0x39f   : > { %10444 = vmatmul.mubr.msk.f32.vlgmr.msra.gmra.mrb[14].mxu1 %vm1424_vm2, %v12305_v11  ;;  %v12584_v11 = vadd.f32 %v12146_v7, %v1609_v8  ;;  %v2713_v7 = vld [vmem:[%s14042_s13 + $0x88] sm:$0xff] }
 0x3a0   : > { %10446 = vmatprep.mubr.msk.f32.mxu1 %vm1424_vm2, %v12309_v12  ;;  %10472 = vmatpush3.msk.msra.mxu1 %vm2741_vm4, %v12548_v5  ;;  %v2707_v12 = vld [vmem:[%s14042_s13 + $0x58] sm:$0xff] }
 0x3a1   : > { %10487 = vmatprep.subr.msk.mxu1 %vm2741_vm4, %v12553_v53  ;;  %14117 = vst [vmem:[#allocation31_spill] sm:$0xff] %v12584_v11  ;;  %v12637_v31 = vpop.f32.mrb[32].mxu0 }
 0x3a2   : > { %v2911_v30 = vpop.f32.mrb[33].mxu0 }
 0x3a3   : > { %10447 = vmatmul.mubr.msk.f32.gmra.mrb[16].mxu1 %vm1424_vm2, %v12319_v17  ;;  %v2712_v17 = vld [vmem:[%s14042_s13 + $0x80] sm:$0xff]  ;;  %10529 = vmatprep.mubr.msk.f32.mxu0 %vm3530_vm6, %v2911_v30 }
 0x3a4   : > { %10449 = vmatprep.mubr.msk.f32.mxu1 %vm1424_vm2, %v12337_v26  ;;  %v2714_v26 = vld [vmem:[%s14042_s13 + $0x90] sm:$0xff] }
 0x3a5   : > { %v12640_v51 = vpop.f32.mrb[34].mxu0 }
 0x3a6   : > { %v12642_v29 = vpop.f32.mrb[35].mxu0 }
 0x3a7   : > { %10450 = vmatmul.mubr.msk.f32.gmra.mrb[18].mxu1 %vm1424_vm2, %v12347_v33  ;;  %v2715_v33 = vld [vmem:[%s14042_s13 + $0x98] sm:$0xff] }
 0x3a8   : > { %10452 = vmatprep.mubr.msk.f32.mxu1 %vm1424_vm2, %v12363_v44  ;;  %v2720_v44 = vld [vmem:[%s14042_s13 + $0xc0] sm:$0xff] }
 0x3a9   : > { %v12644_v41 = vpop.f32.mrb[36].mxu0 }
 0x3aa   : > { %v12646_v37 = vpop.f32.mrb[37].mxu0 }
 0x3ab   : > { %10453 = vmatmul.mubr.msk.f32.gmra.mrb[20].mxu1 %vm1424_vm2, %v12368_v35  ;;  %v2721_v35 = vld [vmem:[%s14042_s13 + $0xc8] sm:$0xff] }
 0x3ac   : > { %10473 = vmatprep.mubr.msk.f32.mxu1 %vm2728_vm5, %v2704_v58 }
 0x3ad   : > { %v12648_v27 = vpop.f32.mrb[38].mxu0 }
 0x3ae   : > { %v12650_v50 = vpop.f32.mrb[39].mxu0 }
 0x3af   : > { %10474 = vmatmul.mubr.msk.f32.vlgmr.msra.gmra.mrb[22].mxu1 %vm2728_vm5, %v2705_v28 }
 0x3b0   : > { %10488 = vmatpush3.msk.msra.mxu1 %vm2741_vm4, %v12553_v53  ;;  %10476 = vmatprep.mubr.msk.f32.mxu1 %vm2728_vm5, %v2706_v36 }
 0x3b1   : > { %10503 = vmatprep.subr.msk.mxu1 %vm2741_vm4, %v12584_v11  ;;  %v12652_v18 = vpop.f32.mrb[40].mxu0 }
 0x3b2   : > { %v12654_v20 = vpop.f32.mrb[41].mxu0 }
 0x3b3   : > { %10477 = vmatmul.mubr.msk.f32.gmra.mrb[24].mxu1 %vm2728_vm5, %v2707_v12 }
 0x3b4   : > { %10489 = vmatprep.mubr.msk.f32.mxu1 %vm2728_vm5, %v2712_v17 }
 0x3b7   : > { %10490 = vmatmul.mubr.msk.f32.vlgmr.msra.gmra.mrb[26].mxu1 %vm2728_vm5, %v2713_v7 }
 0x3b8   : > { %10504 = vmatpush3.msk.msra.mxu1 %vm2741_vm4, %v12584_v11  ;;  %10492 = vmatprep.mubr.msk.f32.mxu1 %vm2728_vm5, %v2714_v26 }
 0x3bb   : > { %10493 = vmatmul.mubr.msk.f32.gmra.mrb[28].mxu1 %vm2728_vm5, %v2715_v33 }
 0x3bc   : > { %10505 = vmatprep.mubr.msk.f32.mxu1 %vm2728_vm5, %v2720_v44 }
 0x3bf   : > { %10506 = vmatmul.mubr.msk.f32.vlgmr.msra.gmra.mrb[30].mxu1 %vm2728_vm5, %v2721_v35 }
 0x3c0   : > { %10508 = vmatprep.mubr.msk.f32.mxu1 %vm2728_vm5, %v2722_v1 }
 0x3c3   : > { %10509 = vmatmul.mubr.msk.f32.gmra.mrb[32].mxu1 %vm2728_vm5, %v2723_v34 }
 0x3c4   : > { %10521 = vmatprep.mubr.msk.f32.mxu1 %vm3530_vm6, %v2811_v39 }
 0x3ee   : > { %v12656_v52 = vpop.f32.mrb[42].mxu0 }
 0x3ef   : > { %v12658_v22 = vpop.f32.mrb[43].mxu0 }
 0x40a   : > { %v12660_v56 = vpop.f32.mrb[44].mxu0 }
 0x40b   : > { %v12662_v57 = vpop.f32.mrb[45].mxu0 }
 0x40f   : > { %v12664_v43 = vpop.f32.mrb[46].mxu0 }
 0x410   : > { %v12666_v0 = vpop.f32.mrb[47].mxu0 }
 0x472   : > { %v10445_v4 = vpop.f32.mrb[14].mxu1 }
 0x473   : > { %v2537_v6 = vsub.f32 %v10445_v4, %v12668_v2  ;;  %v2492_v61 = vpop.f32.mrb[15].mxu1 }
 0x474   : > { %v2536_v24 = vsub.f32 %v2492_v61, %v12668_v2 }
 0x475   : > { %v2551_v10 = vsel %vm697_vm0, %v2537_v6, -inf }
 0x476   : > { %v2552_v13 = vrot.slane %v2551_v10, 4  ;;  %v2544_v19 = vsel %vm697_vm0, %v2536_v24, -inf  ;;  %v10448_v46 = vpop.f32.mrb[16].mxu1 }
 0x477   : > { %v2545_v58 = vrot.slane %v2544_v19, 4  ;;  %v12675_v28 = vsub.f32 %v10448_v46, %v12668_v2  ;;  %v2502_v36 = vpop.f32.mrb[17].mxu1 }
 0x478   : > { %v2553_v8 = vmax.f32 %v2551_v10, %v2552_v13  ;;  %v12678_v12 = vsub.f32 %v2502_v36, %v12668_v2 }
 0x479   : > { %v2546_v17 = vmax.f32 %v2544_v19, %v2545_v58  ;;  %v2565_v7 = vsel %vm697_vm0, %v12675_v28, -inf }
 0x47a   : > { %v2554_v26 = vrot.slane %v2553_v8, 2  ;;  %v2566_v33 = vrot.slane %v2565_v7, 4  ;;  %v2558_v44 = vsel %vm697_vm0, %v12678_v12, -inf  ;;  %v10451_v35 = vpop.f32.mrb[18].mxu1 }
 0x47b   : > { %v2547_v1 = vrot.slane %v2546_v17, 2  ;;  %v2559_v34 = vrot.slane %v2558_v44, 4  ;;  %v12685_v39 = vsub.f32 %v10451_v35, %v12668_v2  ;;  %v2512_v30 = vpop.f32.mrb[19].mxu1 }
 0x47c   : > { %v2555_v4 = vmax.f32 %v2553_v8, %v2554_v26  ;;  %v2567_v61 = vmax.f32 %v2565_v7, %v2566_v33  ;;  %v12688_v10 = vsub.f32 %v2512_v30, %v12668_v2 }
 0x47d   : > { %v2548_v13 = vmax.f32 %v2546_v17, %v2547_v1  ;;  %v2560_v19 = vmax.f32 %v2558_v44, %v2559_v34  ;;  %v2579_v46 = vsel %vm697_vm0, %v12685_v39, -inf }
 0x47e   : > { %v2556_v58 = vrot.slane %v2555_v4, 1  ;;  %v2568_v36 = vrot.slane %v2567_v61, 2  ;;  %v2580_v45 = vrot.slane %v2579_v46, 4  ;;  %v2572_v63 = vsel %vm697_vm0, %v12688_v10, -inf  ;;  %v10454_v32 = vpop.f32.mrb[20].mxu1 }
 0x47f   : > { %v2549_v35 = vrot.slane %v2548_v13, 1  ;;  %v2561_v9 = vrot.slane %v2560_v19, 2  ;;  %v2573_v14 = vrot.slane %v2572_v63, 4  ;;  %v12695_v8 = vsub.f32 %v10454_v32, %v12668_v2  ;;  %v2522_v7 = vpop.f32.mrb[21].mxu1 }
 0x480   : > { %v2557_v26 = vmax.f32 %v2555_v4, %v2556_v58  ;;  %v2569_v17 = vmax.f32 %v2567_v61, %v2568_v36  ;;  %v2581_v33 = vmax.f32 %v2579_v46, %v2580_v45  ;;  %v12698_v44 = vsub.f32 %v2522_v7, %v12668_v2 }
 0x481   : > { %v2550_v1 = vmax.f32 %v2548_v13, %v2549_v35  ;;  %v2562_v34 = vmax.f32 %v2560_v19, %v2561_v9  ;;  %v2574_v30 = vmax.f32 %v2572_v63, %v2573_v14  ;;  %v2593_v47 = vsel %vm697_vm0, %v12695_v8, -inf }
 0x482   : > { %v2601_v62 = vsub.f32 %v2537_v6, %v2557_v26  ;;  %v2570_v59 = vrot.slane %v2569_v17, 1  ;;  %v2582_v16 = vrot.slane %v2581_v33, 2  ;;  %v2594_v42 = vrot.slane %v2593_v47, 4  ;;  %v12702_v11 = vpop.f32.mrb[22].mxu1 }
 0x483   : > { %v2600_v32 = vsub.f32 %v2536_v24, %v2550_v1  ;;  %v2563_v53 = vrot.slane %v2562_v34, 1  ;;  %v2575_v4 = vrot.slane %v2574_v30, 2  ;;  %v2586_v45 = vsel %vm697_vm0, %v12698_v44, -inf  ;;  %v12706_v61 = vpop.f32.mrb[23].mxu1 }
 0x484   : > { %v2610_v13 = vmul.f32 1.442695, %v2601_v62  ;;  %v2571_v9 = vmax.f32 %v2569_v17, %v2570_v59  ;;  %v2583_v14 = vmax.f32 %v2581_v33, %v2582_v16  ;;  %v2595_v63 = vmax.f32 %v2593_v47, %v2594_v42 }
 0x485   : > { %v2608_v19 = vmul.f32 1.442695, %v2600_v32  ;;  %v2564_v46 = vmax.f32 %v2562_v34, %v2563_v53  ;;  %v2576_v6 = vmax.f32 %v2574_v30, %v2575_v4  ;;  %v2587_v58 = vrot.slane %v2586_v45, 4 }
 0x486   : > { %11262 = vpow2.f32 %v2610_v13  ;;  %v2603_v36 = vsub.f32 %v12675_v28, %v2571_v9  ;;  %v2584_v35 = vrot.slane %v2583_v14, 1  ;;  %v2596_v24 = vrot.slane %v2595_v63, 2  ;;  %v12709_v7 = vpop.f32.mrb[24].mxu1  ;;  %v12720_v13 = vpop.permute.xlu1 %4368 }
 0x487   : > { %11264 = vpow2.f32 %v2608_v19  ;;  %v2602_v26 = vsub.f32 %v12678_v12, %v2564_v46  ;;  %v2577_v1 = vrot.slane %v2576_v6, 1  ;;  %v2588_v2 = vmax.f32 %v2586_v45, %v2587_v58  ;;  %v12712_v62 = vpop.f32.mrb[25].mxu1 }
 0x488   : > { %v2614_v16 = vmul.f32 1.442695, %v2603_v36  ;;  %v2585_v42 = vmax.f32 %v2583_v14, %v2584_v35  ;;  %v2597_v59 = vmax.f32 %v2595_v63, %v2596_v24 }
 0x489   : > { %v2612_v47 = vmul.f32 1.442695, %v2602_v26  ;;  %v2578_v53 = vmax.f32 %v2576_v6, %v2577_v1  ;;  %v2589_v17 = vrot.slane %v2588_v2, 2 }
 0x48a   : > { %11266 = vpow2.f32 %v2614_v16  ;;  %v2605_v28 = vsub.f32 %v12685_v39, %v2585_v42  ;;  %v2598_v33 = vrot.slane %v2597_v59, 1  ;;  %v12715_v34 = vpop.f32.mrb[26].mxu1  ;;  %v12738_v26 = vpop.permute.xlu1 %4376 }
 0x48b   : > { %11268 = vpow2.f32 %v2612_v47  ;;  %v2604_v30 = vsub.f32 %v12688_v10, %v2578_v53  ;;  %v2590_v12 = vmax.f32 %v2588_v2, %v2589_v17  ;;  %v12718_v32 = vpop.f32.mrb[27].mxu1  ;;  %14119 = vst [vmem:[#allocation33_spill] sm:$0xff] %v12738_v26 }
 0x48c   : > { %v2618_v4 = vmul.f32 1.442695, %v2605_v28  ;;  %v2599_v45 = vmax.f32 %v2597_v59, %v2598_v33 }
 0x48d   : > { %v2616_v9 = vmul.f32 1.442695, %v2604_v30  ;;  %v2591_v14 = vrot.slane %v2590_v12, 1 }
 0x48e   : > { %11270 = vpow2.f32 %v2618_v4  ;;  %v2607_v63 = vsub.f32 %v12695_v8, %v2599_v45  ;;  %v12723_v19 = vpop.f32.mrb[28].mxu1 }
 0x48f   : > { %11272 = vpow2.f32 %v2616_v9  ;;  %v2592_v39 = vmax.f32 %v2590_v12, %v2591_v14  ;;  %v12725_v46 = vpop.f32.mrb[29].mxu1 }
 0x490   : > { %v12727_v6 = vpop.eup %11262  ;;  %v2622_v2 = vmul.f32 1.442695, %v2607_v63 }
 0x491   : > { %v12729_v10 = vpop.eup %11264  ;;  %v2631_v58 = vsel %vm697_vm0, %v12727_v6, 0.0  ;;  %v2606_v36 = vsub.f32 %v12698_v44, %v2592_v39 }
 0x492   : > { %v2632_v35 = vrot.slane %v2631_v58, 4  ;;  %v2624_v8 = vsel %vm697_vm0, %v12729_v10, 0.0  ;;  %11274 = vpow2.f32 %v2622_v2  ;;  %v12736_v24 = vpop.f32.mrb[30].mxu1 }
 0x493   : > { %v2625_v1 = vrot.slane %v2624_v8, 4  ;;  %v2620_v16 = vmul.f32 1.442695, %v2606_v36  ;;  %v12740_v42 = vpop.f32.mrb[31].mxu1 }
 0x494   : > { %v12742_v59 = vpop.eup %11266  ;;  %v2633_v47 = vadd.f32 %v2632_v35, %v2631_v58  ;;  %v12758_v58 = vpop.permute.xlu1 %4380 }
 0x495   : > { %v12744_v53 = vpop.eup %11268  ;;  %v2626_v17 = vadd.f32 %v2625_v1, %v2624_v8  ;;  %v2645_v44 = vsel %vm697_vm0, %v12742_v59, 0.0  ;;  %11276 = vpow2.f32 %v2620_v16  ;;  %14120 = vst [vmem:[#allocation34_spill] sm:$0xff] %v12758_v58 }
 0x496   : > { %v2634_v28 = vrot.slane %v2633_v47, 2  ;;  %v2646_v33 = vrot.slane %v2645_v44, 4  ;;  %v2638_v30 = vsel %vm697_vm0, %v12744_v53, 0.0  ;;  %v12750_v12 = vpop.f32.mrb[32].mxu1 }
 0x497   : > { %v2627_v4 = vrot.slane %v2626_v17, 2  ;;  %v2639_v45 = vrot.slane %v2638_v30, 4  ;;  %v12752_v9 = vpop.f32.mrb[33].mxu1 }
 0x498   : > { %v12754_v14 = vpop.eup %11270  ;;  %v2647_v63 = vadd.f32 %v2646_v33, %v2645_v44  ;;  %v2635_v39 = vadd.f32 %v2634_v28, %v2633_v47  ;;  %v12770_v58 = vpop.permute.xlu1 %4439 }
 0x499   : > { %v12756_v2 = vpop.eup %11272  ;;  %v2640_v36 = vadd.f32 %v2639_v45, %v2638_v30  ;;  %v2659_v35 = vsel %vm697_vm0, %v12754_v14, 0.0  ;;  %v2628_v8 = vadd.f32 %v2627_v4, %v2626_v17  ;;  %14121 = vst [vmem:[#allocation35_spill] sm:$0xff] %v12770_v58 }
 0x49a   : > { %v2648_v1 = vrot.slane %v2647_v63, 2  ;;  %v2660_v16 = vrot.slane %v2659_v35, 4  ;;  %v2652_v5 = vsel %vm697_vm0, %v12756_v2, 0.0  ;;  %v2636_v23 = vrot.slane %v2635_v39, 1 }
 0x49b   : > { %v2641_v3 = vrot.slane %v2640_v36, 2  ;;  %v2653_v49 = vrot.slane %v2652_v5, 4  ;;  %v2629_v25 = vrot.slane %v2628_v8, 1 }
 0x49c   : > { %v12764_v44 = vpop.eup %11274  ;;  %v2661_v47 = vadd.f32 %v2660_v16, %v2659_v35  ;;  %v2637_v28 = vadd.f32 %v2636_v23, %v2635_v39  ;;  %v2649_v33 = vadd.f32 %v2648_v1, %v2647_v63  ;;  %v12774_v58 = vpop.permute.xlu1 %4455 }
 0x49d   : > { %v2654_v15 = vadd.f32 %v2653_v49, %v2652_v5  ;;  %v2673_v30 = vsel %vm697_vm0, %v12764_v44, 0.0  ;;  %v2630_v45 = vadd.f32 %v2629_v25, %v2628_v8  ;;  %v2642_v17 = vadd.f32 %v2641_v3, %v2640_v36 }
 0x49e   : > { %v2662_v4 = vrot.slane %v2661_v47, 2  ;;  %v2674_v55 = vrot.slane %v2673_v30, 4  ;;  %11278 = vrcp.f32 %v2637_v28  ;;  %v2650_v54 = vrot.slane %v2649_v33, 1 }
 0x49f   : > { %v12768_v26 = vpop.eup %11276  ;;  %v2655_v21 = vrot.slane %v2654_v15, 2  ;;  %11280 = vrcp.f32 %v2630_v45  ;;  %v2643_v38 = vrot.slane %v2642_v17, 1 }
 0x4a0   : > { %v2675_v35 = vadd.f32 %v2674_v55, %v2673_v30  ;;  %v2666_v49 = vsel %vm697_vm0, %v12768_v26, 0.0  ;;  %v2651_v23 = vadd.f32 %v2650_v54, %v2649_v33  ;;  %v2663_v5 = vadd.f32 %v2662_v4, %v2661_v47  ;;  %v12778_v4 = vpop.permute.xlu1 %4443 }
 0x4a1   : > { %v2667_v63 = vrot.slane %v2666_v49, 4  ;;  %v2644_v25 = vadd.f32 %v2643_v38, %v2642_v17  ;;  %v2656_v3 = vadd.f32 %v2655_v21, %v2654_v15 }
 0x4a2   : > { %v2676_v39 = vrot.slane %v2675_v35, 2  ;;  %11282 = vrcp.f32 %v2651_v23  ;;  %v2664_v36 = vrot.slane %v2663_v5, 1 }
 0x4a3   : > { %v2668_v8 = vadd.f32 %v2667_v63, %v2666_v49  ;;  %11284 = vrcp.f32 %v2644_v25  ;;  %v2657_v1 = vrot.slane %v2656_v3, 1 }
 0x4a4   : > { %v2665_v16 = vadd.f32 %v2664_v36, %v2663_v5  ;;  %v2677_v28 = vadd.f32 %v2676_v39, %v2675_v35 }
 0x4a5   : > { %v2669_v45 = vrot.slane %v2668_v8, 2  ;;  %v2658_v55 = vadd.f32 %v2657_v1, %v2656_v3 }
 0x4a6   : > { %11286 = vrcp.f32 %v2665_v16  ;;  %v2678_v30 = vrot.slane %v2677_v28, 1 }
 0x4a7   : > { %11288 = vrcp.f32 %v2658_v55  ;;  %v2670_v54 = vadd.f32 %v2669_v45, %v2668_v8 }
 0x4a8   : > { %v11279_v47 = vpop.eup %11278  ;;  %v2679_v33 = vadd.f32 %v2678_v30, %v2677_v28 }
 0x4a9   : > { %v11281_v38 = vpop.eup %11280  ;;  %v2689_v21 = vmul.f32 %v11279_v47, %v12727_v6  ;;  %v2671_v15 = vrot.slane %v2670_v54, 1 }
 0x4aa   : > { %v2688_v17 = vmul.f32 %v11281_v38, %v12729_v10  ;;  %11290 = vrcp.f32 %v2679_v33 }
 0x4ab   : > { %10527 = vmatprep.subr.mxu0 %v2689_v21  ;;  %v2672_v35 = vadd.f32 %v2671_v15, %v2670_v54 }
 0x4ac   : > { %v11283_v49 = vpop.eup %11282  ;;  %10519 = vmatprep.subr.mxu1 %v2688_v17  ;;  %10528 = vmatpush3.msra.mxu0 %v2689_v21 }
 0x4ad   : > { %v11285_v23 = vpop.eup %11284  ;;  %10520 = vmatpush3.msra.mxu1 %v2688_v17  ;;  %10530 = vmatmul.mubr.msk.f32.vlgmr.msra.gmra.mrb[48].mxu0 %vm3530_vm6, %v12637_v31  ;;  %v2691_v5 = vmul.f32 %v11283_v49, %v12742_v59  ;;  %11292 = vrcp.f32 %v2672_v35  ;;  %v12790_v31 = vpop.permute.xlu1 %4447 }
 0x4ae   : > { %10522 = vmatmul.mubr.msk.f32.vlgmr.msra.gmra.mrb[34].mxu1 %vm3530_vm6, %v12630_v60  ;;  %10532 = vmatprep.mubr.msk.f32.mxu0 %vm3530_vm6, %v12642_v29  ;;  %v2690_v6 = vmul.f32 %v11285_v23, %v12744_v53 }
 0x4af   : > { %10524 = vmatprep.mubr.msk.f32.mxu1 %vm3530_vm6, %v12635_v40  ;;  %10543 = vmatprep.subr.mxu0 %v2691_v5 }
 0x4b0   : > { %v11287_v10 = vpop.eup %11286  ;;  %10535 = vmatprep.subr.mxu1 %v2690_v6  ;;  %10544 = vmatpush3.msra.mxu0 %v2691_v5 }
 0x4b1   : > { %v11289_v63 = vpop.eup %11288  ;;  %10533 = vmatmul.mubr.msk.f32.gmra.mrb[50].mxu0 %vm3530_vm6, %v12640_v51  ;;  %10536 = vmatpush3.msra.mxu1 %v2690_v6  ;;  %v2693_v60 = vmul.f32 %v11287_v10, %v12754_v14  ;;  %v12807_v59 = vpop.permute.xlu1 %4467 }
 0x4b2   : > { %10525 = vmatmul.mubr.msk.f32.gmra.mrb[36].mxu1 %vm3530_vm6, %v12633_v48  ;;  %10545 = vmatprep.mubr.msk.f32.mxu0 %vm3530_vm6, %v12646_v37  ;;  %v2692_v40 = vmul.f32 %v11289_v63, %v12756_v2 }
 0x4b3   : > { %10559 = vmatprep.subr.mxu0 %v2693_v60  ;;  %10537 = vmatprep.mubr.msk.f32.mxu1 %vm3530_vm6, %v12706_v61 }
 0x4b4   : > { %v11291_v29 = vpop.eup %11290  ;;  %10551 = vmatprep.subr.mxu1 %v2692_v40 }
 0x4b5   : > { %10546 = vmatmul.mubr.msk.f32.vlgmr.msra.gmra.mrb[52].mxu0 %vm3530_vm6, %v12644_v41  ;;  %v2695_v51 = vmul.f32 %v11291_v29, %v12764_v44 }
 0x4b6   : > { %10560 = vmatpush3.msra.mxu0 %v2693_v60  ;;  %10538 = vmatmul.mubr.msk.f32.vlgmr.msra.gmra.mrb[38].mxu1 %vm3530_vm6, %v12702_v11  ;;  %v12822_v11 = vpop.permute.xlu1 %4491 }
 0x4b7   : > { %v11293_v48 = vpop.eup %11292  ;;  %10552 = vmatpush3.msra.mxu1 %v2692_v40  ;;  %10575 = vmatprep.subr.mxu0 %v2695_v51 }
 0x4b8   : > { %10540 = vmatprep.mubr.msk.f32.mxu1 %vm3530_vm6, %v12712_v62  ;;  %10548 = vmatprep.mubr.msk.f32.mxu0 %vm3530_vm6, %v12650_v50  ;;  %v2694_v37 = vmul.f32 %v11293_v48, %v12768_v26  ;;  %v9567_v50 = vld [vmem:[%s14037_s8 + $0x20] sm:$0xff] }
 0x4b9   : > { %10549 = vmatmul.mubr.msk.f32.gmra.mrb[54].mxu0 %vm3530_vm6, %v12648_v27 }
 0x4ba   : > { %10567 = vmatprep.subr.mxu1 %v2694_v37  ;;  %10541 = vmatmul.mubr.msk.f32.gmra.mrb[40].mxu1 %vm3530_vm6, %v12709_v7  ;;  %v12838_v41 = vpop.permute.xlu1 %4496 }
 0x4bb   : > { %10553 = vmatprep.mubr.msk.f32.mxu1 %vm3530_vm6, %v12718_v32  ;;  %10561 = vmatprep.mubr.msk.f32.mxu0 %vm3530_vm6, %v12654_v20 }
 0x4bd   : > { %10562 = vmatmul.mubr.msk.f32.vlgmr.msra.gmra.mrb[56].mxu0 %vm3530_vm6, %v12652_v18 }
 0x4be   : > { %10576 = vmatpush3.msra.mxu0 %v2695_v51  ;;  %10554 = vmatmul.mubr.msk.f32.vlgmr.msra.gmra.mrb[42].mxu1 %vm3530_vm6, %v12715_v34  ;;  %v4602_v27 = vpop.permute.xlu1 %4601 }
 0x4bf   : > { %10568 = vmatpush3.msra.mxu1 %v2694_v37  ;;  %10556 = vmatprep.mubr.msk.f32.mxu1 %vm3530_vm6, %v12725_v46 }
 0x4c0   : > { %10564 = vmatprep.mubr.msk.f32.mxu0 %vm3530_vm6, %v12658_v22 }
 0x4c1   : > { %10565 = vmatmul.mubr.msk.f32.gmra.mrb[58].mxu0 %vm3530_vm6, %v12656_v52 }
 0x4c2   : > { %10557 = vmatmul.mubr.msk.f32.gmra.mrb[44].mxu1 %vm3530_vm6, %v12723_v19  ;;  %10577 = vmatprep.mubr.msk.f32.mxu0 %vm3530_vm6, %v12662_v57 }
 0x4c3   : > { %10569 = vmatprep.mubr.msk.f32.mxu1 %vm3530_vm6, %v12740_v42 }
 0x4c5   : > { %10578 = vmatmul.mubr.msk.f32.vlgmr.msra.gmra.mrb[60].mxu0 %vm3530_vm6, %v12660_v56 }
 0x4c6   : > { %10570 = vmatmul.mubr.msk.f32.vlgmr.msra.gmra.mrb[46].mxu1 %vm3530_vm6, %v12736_v24  ;;  %10580 = vmatprep.mubr.msk.f32.mxu0 %vm3530_vm6, %v12666_v0 }
 0x4c7   : > { %10572 = vmatprep.mubr.msk.f32.mxu1 %vm3530_vm6, %v12752_v9 }
 0x4c9   : > { %10581 = vmatmul.mubr.msk.f32.gmra.mrb[62].mxu0 %vm3530_vm6, %v12664_v43 }
 0x4ca   : > { %10573 = vmatmul.mubr.msk.f32.gmra.mrb[48].mxu1 %vm3530_vm6, %v12750_v12  ;;  %10605 = vmatprep.mubr.msk.f32.mxu0 %vm1424_vm2, %v4602_v27 }
 0x4cb   : > { %10591 = vmatprep.mubr.msk.f32.mxu1 %vm1424_vm2, %v9567_v50 }
 0x580   : > { %v10531_v18 = vpop.f32.mrb[48].mxu0 }
 0x581   : > { %v4323_v20 = vsel %vm697_vm0, %v10531_v18, 0.0  ;;  %v10523_v52 = vpop.f32.mrb[34].mxu1  ;;  %v3706_v22 = vpop.f32.mrb[49].mxu0 }
 0x582   : > { %v4322_v56 = vsel %vm697_vm0, %v10523_v52, 0.0  ;;  %v4308_v57 = vsel %vm697_vm0, %v3706_v22, 0.0  ;;  %v3609_v43 = vpop.f32.mrb[35].mxu1 }
 0x583   : > { %v4324_v0 = vadd.f32 %v4323_v20, %v4322_v56  ;;  %v4307_v61 = vsel %vm697_vm0, %v3609_v43, 0.0 }
 0x584   : > { %v4309_v7 = vadd.f32 %v4308_v57, %v4307_v61  ;;  %v10534_v62 = vpop.f32.mrb[50].mxu0 }
 0x585   : > { %v4353_v34 = vsel %vm697_vm0, %v10534_v62, 0.0  ;;  %v10526_v32 = vpop.f32.mrb[36].mxu1  ;;  %v3716_v19 = vpop.f32.mrb[51].mxu0 }
 0x586   : > { %v4352_v46 = vsel %vm697_vm0, %v10526_v32, 0.0  ;;  %v4338_v24 = vsel %vm697_vm0, %v3716_v19, 0.0  ;;  %v3619_v26 = vpop.f32.mrb[37].mxu1 }
 0x587   : > { %v4354_v42 = vadd.f32 %v4353_v34, %v4352_v46  ;;  %v4337_v53 = vsel %vm697_vm0, %v3619_v26, 0.0 }
 0x588   : > { %v4339_v12 = vadd.f32 %v4338_v24, %v4337_v53  ;;  %v10547_v9 = vpop.f32.mrb[52].mxu0 }
 0x589   : > { %v10539_v14 = vpop.f32.mrb[38].mxu1  ;;  %v3900_v2 = vpop.f32.mrb[53].mxu0  ;;  %v4327_v36 = vsel %vm697_vm0, %v10547_v9, 0.0 }
 0x58a   : > { %v4325_v44 = vsel %vm697_vm0, %v10539_v14, 0.0  ;;  %v3803_v25 = vpop.f32.mrb[39].mxu1  ;;  %v4312_v16 = vsel %vm697_vm0, %v3900_v2, 0.0 }
 0x58b   : > { %v4326_v3 = vadd.f32 %v4325_v44, %v4324_v0  ;;  %v4310_v39 = vsel %vm697_vm0, %v3803_v25, 0.0 }
 0x58c   : > { %v4311_v8 = vadd.f32 %v4310_v39, %v4309_v7  ;;  %v10550_v1 = vpop.f32.mrb[54].mxu0 }
 0x58d   : > { %v10542_v28 = vpop.f32.mrb[40].mxu1  ;;  %v3910_v45 = vpop.f32.mrb[55].mxu0  ;;  %v4328_v55 = vadd.f32 %v4327_v36, %v4326_v3  ;;  %v4357_v21 = vsel %vm697_vm0, %v10550_v1, 0.0 }
 0x58e   : > { %v4355_v30 = vsel %vm697_vm0, %v10542_v28, 0.0  ;;  %v3813_v54 = vpop.f32.mrb[41].mxu1  ;;  %v4313_v47 = vadd.f32 %v4312_v16, %v4311_v8  ;;  %v4342_v35 = vsel %vm697_vm0, %v3910_v45, 0.0  ;;  %v4373_v3 = vpop.permute.xlu0 %4372 }
 0x58f   : > { %v4356_v33 = vadd.f32 %v4355_v30, %v4354_v42  ;;  %v4340_v38 = vsel %vm697_vm0, %v3813_v54, 0.0  ;;  %v14122_v54 = vld [vmem:[#allocation16_spill] sm:$0xff] }
 0x590   : > { %v4341_v15 = vadd.f32 %v4340_v38, %v4339_v12  ;;  %v10563_v17 = vpop.f32.mrb[56].mxu0 }
 0x591   : > { %v10555_v49 = vpop.f32.mrb[42].mxu1  ;;  %v4094_v23 = vpop.f32.mrb[57].mxu0  ;;  %v4358_v5 = vadd.f32 %v4357_v21, %v4356_v33  ;;  %v4331_v29 = vsel %vm697_vm0, %v10563_v17, 0.0  ;;  %v14123_v21 = vld [vmem:[#allocation17_spill] sm:$0xff] }
 0x592   : > { %v4329_v6 = vsel %vm697_vm0, %v10555_v49, 0.0  ;;  %v3997_v10 = vpop.f32.mrb[43].mxu1  ;;  %v4343_v63 = vadd.f32 %v4342_v35, %v4341_v15  ;;  %v4316_v37 = vsel %vm697_vm0, %v4094_v23, 0.0  ;;  %v14124_v49 = vld [vmem:[#allocation34_spill] sm:$0xff] }
 0x593   : > { %v4330_v60 = vadd.f32 %v4329_v6, %v4328_v55  ;;  %v4314_v40 = vsel %vm697_vm0, %v3997_v10, 0.0  ;;  %v14125_v6 = vld [vmem:[#allocation33_spill] sm:$0xff] }
 0x594   : > { %v4315_v51 = vadd.f32 %v4314_v40, %v4313_v47  ;;  %v10566_v48 = vpop.f32.mrb[58].mxu0  ;;  %v14127_v40 = vld [vmem:[#allocation19_spill] sm:$0xff] }
 0x595   : > { %v10558_v27 = vpop.f32.mrb[44].mxu1  ;;  %v4104_v50 = vpop.f32.mrb[59].mxu0  ;;  %v4332_v18 = vadd.f32 %v4331_v29, %v4330_v60  ;;  %v4361_v43 = vsel %vm697_vm0, %v10566_v48, 0.0 }
 0x596   : > { %v4359_v20 = vsel %vm697_vm0, %v10558_v27, 0.0  ;;  %v4007_v52 = vpop.f32.mrb[45].mxu1  ;;  %v4317_v22 = vadd.f32 %v4316_v37, %v4315_v51  ;;  %v4346_v7 = vsel %vm697_vm0, %v4104_v50, 0.0 }
 0x597   : > { %v4360_v56 = vadd.f32 %v4359_v20, %v4358_v5  ;;  %v4344_v57 = vsel %vm697_vm0, %v4007_v52, 0.0 }
 0x598   : > { %v4345_v0 = vadd.f32 %v4344_v57, %v4343_v63  ;;  %v10579_v61 = vpop.f32.mrb[60].mxu0  ;;  %v14126_v63 = vld [vmem:[#allocation18_spill] sm:$0xff] }
 0x599   : > { %v10571_v62 = vpop.f32.mrb[46].mxu1  ;;  %v4288_v34 = vpop.f32.mrb[61].mxu0  ;;  %v4362_v32 = vadd.f32 %v4361_v43, %v4360_v56  ;;  %v4335_v53 = vsel %vm697_vm0, %v10579_v61, 0.0 }
 0x59a   : > { %v4333_v19 = vsel %vm697_vm0, %v10571_v62, 0.0  ;;  %v4191_v46 = vpop.f32.mrb[47].mxu1  ;;  %v4347_v24 = vadd.f32 %v4346_v7, %v4345_v0  ;;  %v4320_v2 = vsel %vm697_vm0, %v4288_v34, 0.0 }
 0x59b   : > { %v4334_v26 = vadd.f32 %v4333_v19, %v4332_v18  ;;  %v4318_v42 = vsel %vm697_vm0, %v4191_v46, 0.0 }
 0x59c   : > { %v4319_v12 = vadd.f32 %v4318_v42, %v4317_v22  ;;  %v10582_v9 = vpop.f32.mrb[62].mxu0 }
 0x59d   : > { %v4336_v14 = vadd.f32 %v4335_v53, %v4334_v26  ;;  %v10574_v44 = vpop.f32.mrb[48].mxu1  ;;  %v4298_v25 = vpop.f32.mrb[63].mxu0  ;;  %v4365_v55 = vsel %vm697_vm0, %v10582_v9, 0.0 }
 0x59e   : > { %v4321_v39 = vadd.f32 %v4320_v2, %v4319_v12  ;;  %v4363_v36 = vsel %vm697_vm0, %v10574_v44, 0.0  ;;  %v4201_v8 = vpop.f32.mrb[49].mxu1  ;;  %v4350_v38 = vsel %vm697_vm0, %v4298_v25, 0.0 }
 0x59f   : > { %v4384_v1 = vadd.f32 %v4373_v3, %v4336_v14  ;;  %v4364_v16 = vadd.f32 %v4363_v36, %v4362_v32  ;;  %v4348_v28 = vsel %vm697_vm0, %v4201_v8, 0.0 }
 0x5a0   : > { %v4383_v45 = vadd.f32 %v12720_v13, %v4321_v39  ;;  %v4349_v30 = vadd.f32 %v4348_v28, %v4347_v24 }
 0x5a1   : > { %v4388_v47 = vadd.f32 %v4384_v1, %v14122_v54  ;;  %v4366_v33 = vadd.f32 %v4365_v55, %v4364_v16  ;;  %v4436_v1 = vpop.permute.xlu0 %4435 }
 0x5a2   : > { %v4387_v15 = vadd.f32 %v4383_v45, %v14123_v21  ;;  %v4351_v17 = vadd.f32 %v4350_v38, %v4349_v30 }
 0x5a3   : > { %v4392_v35 = vsel %vm697_vm0, %v4388_v47, 0.0  ;;  %v4386_v23 = vadd.f32 %v14124_v49, %v4366_v33  ;;  %v14128_v33 = vld [vmem:[#allocation35_spill] sm:$0xff] }
 0x5a4   : > { %v4391_v5 = vsel %vm697_vm0, %v4387_v15, 0.0  ;;  %v4385_v10 = vadd.f32 %v14125_v6, %v4351_v17 }
 0x5a5   : > { %v4393_v13 = vadd.f32 %v4392_v35, %v4391_v5  ;;  %v4390_v60 = vadd.f32 %v4386_v23, %v14126_v63  ;;  %v4460_v16 = vpop.permute.xlu0 %4459 }
 0x5a6   : > { %v4389_v29 = vadd.f32 %v4385_v10, %v14127_v40  ;;  %v9583_v40 = vld [vmem:[%s14042_s13 + $0x100] sm:$0xff] }
 0x5a7   : > { %v4396_v37 = vsel %vm697_vm0, %v4390_v60, 0.0 }
 0x5a8   : > { %v4394_v51 = vsel %vm697_vm0, %v4389_v29, 0.0 }
 0x5a9   : > { %v4395_v48 = vadd.f32 %v4394_v51, %v4393_v13  ;;  %v4464_v17 = vpop.permute.xlu0 %4463  ;;  %v14134_v13 = vld [vmem:[#allocation22_spill] sm:$0xff]  ;;  %v9585_v51 = vld [vmem:[%s14042_s13 + $0x110] sm:$0xff] }
 0x5aa   : > { %v5031_v63 = vrot.slane %v14134_v13, 4  ;;  %v9601_v13 = vld [vmem:[%s14042_s13 + $0x190] sm:$0xff] }
 0x5ab   : > { %v4397_v27 = vadd.f32 %v4396_v37, %v4395_v48  ;;  %v14135_v48 = vld [vmem:[#allocation24_spill] sm:$0xff] }
 0x5ac   : > { %v5231_v37 = vrot.slane %v14135_v48, 4 }
 0x5ad   : > { %v4398_v50 = vrot.slane %v4397_v27, 4 }
 0x5af   : > { %v4399_v18 = vadd.f32 %v4398_v50, %v4397_v27  ;;  %v9586_v27 = vld [vmem:[%s14042_s13 + $0x118] sm:$0xff]  ;;  %v9587_v50 = vld [vmem:[%s14042_s13 + $0x120] sm:$0xff] }
 0x5b1   : > { %v4400_v20 = vrot.slane %v4399_v18, 2 }
 0x5b3   : > { %v4401_v52 = vadd.f32 %v4400_v20, %v4399_v18  ;;  %v9588_v18 = vld [vmem:[%s14042_s13 + $0x128] sm:$0xff]  ;;  %v9589_v20 = vld [vmem:[%s14042_s13 + $0x130] sm:$0xff] }
 0x5b5   : > { %v4402_v22 = vrot.slane %v4401_v52, 1 }
 0x5b7   : > { %v4403_v56 = vadd.f32 %v4402_v22, %v4401_v52  ;;  %v14136_v52 = vld [vmem:[#allocation26_spill] sm:$0xff] }
 0x5b8   : > { %v5431_v22 = vrot.slane %v14136_v52, 4 }
 0x5b9   : > { %v4405_v57 = vmul.f32 0.03125, %v4403_v56  ;;  %v9590_v56 = vld [vmem:[%s14042_s13 + $0x138] sm:$0xff] }
 0x5bb   : > { %v4408_v43 = vsub.f32 %v4389_v29, %v4405_v57  ;;  %v4409_v0 = vsub.f32 %v4390_v60, %v4405_v57  ;;  %v4406_v61 = vsub.f32 %v4387_v15, %v4405_v57  ;;  %v4407_v7 = vsub.f32 %v4388_v47, %v4405_v57  ;;  %v9570_v60 = vld [vmem:[%s14037_s8 + $0x38] sm:$0xff]  ;;  %v9584_v29 = vld [vmem:[%s14042_s13 + $0x108] sm:$0xff]  ;;  %v9595_v57 = vld [vmem:[%s14042_s13 + $0x160] sm:$0xff] }
 0x5bd   : > { %v4412_v62 = vmul.f32 %v4408_v43, %v4408_v43  ;;  %v4410_v34 = vmul.f32 %v4406_v61, %v4406_v61  ;;  %v4411_v32 = vmul.f32 %v4407_v7, %v4407_v7  ;;  %v4413_v19 = vmul.f32 %v4409_v0, %v4409_v0 }
 0x5bf   : > { %v4414_v46 = vsel %vm697_vm0, %v4410_v34, 0.0  ;;  %v4415_v24 = vsel %vm697_vm0, %v4411_v32, 0.0  ;;  %v4417_v42 = vsel %vm697_vm0, %v4412_v62, 0.0  ;;  %v4419_v12 = vsel %vm697_vm0, %v4413_v19, 0.0  ;;  %v9598_v62 = vld [vmem:[%s14042_s13 + $0x178] sm:$0xff]  ;;  %v9603_v34 = vld [vmem:[%s14042_s13 + $0x1a0] sm:$0xff] }
 0x5c0   : > { %v4416_v26 = vadd.f32 %v4415_v24, %v4414_v46  ;;  %v9604_v32 = vld [vmem:[%s14042_s13 + $0x1a8] sm:$0xff]  ;;  %v9605_v19 = vld [vmem:[%s14042_s13 + $0x1b0] sm:$0xff]  ;;  %v9606_v46 = vld [vmem:[%s14042_s13 + $0x1b8] sm:$0xff] }
 0x5c1   : > { %v9611_v24 = vld [vmem:[%s14042_s13 + $0x1e0] sm:$0xff] }
 0x5c2   : > { %v4418_v53 = vadd.f32 %v4417_v42, %v4416_v26  ;;  %v9612_v26 = vld [vmem:[%s14042_s13 + $0x1e8] sm:$0xff]  ;;  %v9613_v42 = vld [vmem:[%s14042_s13 + $0x1f0] sm:$0xff] }
 0x5c4   : > { %v4420_v9 = vadd.f32 %v4419_v12, %v4418_v53  ;;  %v9614_v53 = vld [vmem:[%s14042_s13 + $0x1f8] sm:$0xff]  ;;  %v4487_v12 = vpop.permute.xlu0 %4486 }
 0x5c6   : > { %v4421_v14 = vrot.slane %v4420_v9, 4 }
 0x5c8   : > { %v4422_v2 = vadd.f32 %v4421_v14, %v4420_v9  ;;  %v4502_v14 = vpop.permute.xlu0 %4501 }
 0x5ca   : > { %v4423_v44 = vrot.slane %v4422_v2, 2 }
 0x5cc   : > { %v4424_v25 = vadd.f32 %v4423_v44, %v4422_v2 }
 0x5ce   : > { %v4425_v3 = vrot.slane %v4424_v25, 1 }
 0x5d0   : > { %v4426_v39 = vadd.f32 %v4425_v3, %v4424_v25 }
 0x5d2   : > { %v4427_v36 = vmul.f32 0.03125, %v4426_v39 }
 0x5d4   : > { %v4428_v8 = vadd.f32 1e-06, %v4427_v36 }
 0x5d6   : > { %11294 = vrsqrt.f32 %v4428_v8 }
 0x5e0   : > { %v11295_v28 = vpop.eup %11294 }
 0x5e1   : > { %v4430_v45 = vmul.f32 %v11295_v28, %v4406_v61  ;;  %v4431_v55 = vmul.f32 %v11295_v28, %v4407_v7  ;;  %v4432_v30 = vmul.f32 %v11295_v28, %v4408_v43  ;;  %v4433_v54 = vmul.f32 %v11295_v28, %v4409_v0  ;;  %v9596_v43 = vld [vmem:[%s14042_s13 + $0x168] sm:$0xff]  ;;  %v9597_v0 = vld [vmem:[%s14042_s13 + $0x170] sm:$0xff] }
 0x5e2   : > { %v14137_v61 = vld [vmem:[#allocation28_spill] sm:$0xff] }
 0x5e3   : > { %v4450_v47 = vmul.f32 %v4436_v1, %v4430_v45  ;;  %v4451_v38 = vmul.f32 %v14128_v33, %v4431_v55  ;;  %v4452_v21 = vmul.f32 %v12778_v4, %v4432_v30  ;;  %v4453_v15 = vmul.f32 %v12790_v31, %v4433_v54  ;;  %v14133_v31 = vld [vmem:[#allocation20_spill] sm:$0xff]  ;;  %v14138_v45 = vld [vmem:[#allocation29_spill] sm:$0xff]  ;;  %v4606_v30 = vpop.permute.xlu1 %4605  ;;  %v14139_v54 = vld [vmem:[#allocation30_spill] sm:$0xff] }
 0x5e4   : > { %v4931_v10 = vrot.slane %v14133_v31, 4  ;;  %v5631_v7 = vrot.slane %v14137_v61, 4  ;;  %v5131_v55 = vrot.slane %v14138_v45, 4 }
 0x5e5   : > { %v12910_v35 = vadd.f32 %v12774_v58, %v4450_v47  ;;  %v12912_v49 = vadd.f32 %v4460_v16, %v4451_v38  ;;  %v12914_v23 = vadd.f32 %v4464_v17, %v4452_v21  ;;  %v12917_v5 = vadd.f32 %v12807_v59, %v4453_v15  ;;  %v9568_v58 = vld [vmem:[%s14037_s8 + $0x28] sm:$0xff]  ;;  %v9569_v59 = vld [vmem:[%s14037_s8 + $0x30] sm:$0xff]  ;;  %v4604_v16 = vpop.permute.xlu0 %4603  ;;  %v9591_v21 = vld [vmem:[%s14042_s13 + $0x140] sm:$0xff] }
 0x5e6   : > { %v5331_v47 = vrot.slane %v14139_v54, 4  ;;  %v9592_v17 = vld [vmem:[%s14042_s13 + $0x148] sm:$0xff] }
 0x5e7   : > { %14129 = vst [vmem:[#allocation16_spill] sm:$0xff] %v12910_v35  ;;  %14130 = vst [vmem:[#allocation17_spill] sm:$0xff] %v12912_v49  ;;  %v11080_v6 = vpack.c.bf16 %v12912_v49, %v12910_v35  ;;  %v11084_v4 = vpack.c.bf16 %v12917_v5, %v12914_v23 }
 0x5e8   : > { %14131 = vst [vmem:[#allocation34_spill] sm:$0xff] %v12914_v23  ;;  %14132 = vst [vmem:[#allocation33_spill] sm:$0xff] %v12917_v5 }
 0x5e9   : > { %11081 = vmatprep.subr.bf16.mxu1 %v11080_v6 }
 0x5ea   : > { %11083 = vmatpush3.bf16.msra.mxu1 %v11080_v6  ;;  %v9593_v6 = vld [vmem:[%s14042_s13 + $0x150] sm:$0xff] }
 0x5eb   : > { %11085 = vmatprep.subr.bf16.mxu1 %v11084_v4 }
 0x5ee   : > { %11087 = vmatpush3.bf16.msra.mxu1 %v11084_v4  ;;  %v14140_v4 = vld [vmem:[#allocation31_spill] sm:$0xff] }
 0x5ef   : > { %10617 = vmatprep.subr.msk.mxu1 %vm2741_vm4, %v4931_v10  ;;  %v5531_v31 = vrot.slane %v14140_v4, 4 }
 0x5f1   : > { %10592 = vmatmul.mubr.msk.f32.vlgmr.msra.gmra.mrb[50].mxu1 %vm1424_vm2, %v9568_v58  ;;  %v9599_v58 = vld [vmem:[%s14042_s13 + $0x180] sm:$0xff] }
 0x5f2   : > { %10618 = vmatpush3.msk.msra.mxu1 %vm2741_vm4, %v4931_v10  ;;  %10594 = vmatprep.mubr.msk.f32.mxu1 %vm1424_vm2, %v9569_v59  ;;  %v9594_v10 = vld [vmem:[%s14042_s13 + $0x158] sm:$0xff]  ;;  %v9600_v59 = vld [vmem:[%s14042_s13 + $0x188] sm:$0xff] }
 0x5f3   : > { %10625 = vmatprep.subr.msk.mxu1 %vm2741_vm4, %v5031_v63 }
 0x5f5   : > { %10595 = vmatmul.mubr.msk.f32.gmra.mrb[52].mxu1 %vm1424_vm2, %v9570_v60  ;;  %v9607_v60 = vld [vmem:[%s14042_s13 + $0x1c0] sm:$0xff] }
 0x5f6   : > { %10619 = vmatprep.mubr.msk.f32.mxu1 %vm2728_vm5, %v9583_v40  ;;  %v9608_v40 = vld [vmem:[%s14042_s13 + $0x1c8] sm:$0xff] }
 0x5f9   : > { %10620 = vmatmul.mubr.msk.f32.vlgmr.msra.gmra.mrb[54].mxu1 %vm2728_vm5, %v9584_v29  ;;  %v9609_v29 = vld [vmem:[%s14042_s13 + $0x1d0] sm:$0xff] }
 0x5fa   : > { %10626 = vmatpush3.msk.msra.mxu1 %vm2741_vm4, %v5031_v63  ;;  %10622 = vmatprep.mubr.msk.f32.mxu1 %vm2728_vm5, %v9585_v51  ;;  %v9602_v63 = vld [vmem:[%s14042_s13 + $0x198] sm:$0xff] }
 0x5fb   : > { %10641 = vmatprep.subr.msk.mxu1 %vm2741_vm4, %v5231_v37  ;;  %v9610_v51 = vld [vmem:[%s14042_s13 + $0x1d8] sm:$0xff] }
 0x5fd   : > { %10623 = vmatmul.mubr.msk.f32.gmra.mrb[56].mxu1 %vm2728_vm5, %v9586_v27 }
 0x5fe   : > { %10627 = vmatprep.mubr.msk.f32.mxu1 %vm2728_vm5, %v9587_v50 }
 0x601   : > { %10628 = vmatmul.mubr.msk.f32.vlgmr.msra.gmra.mrb[58].mxu1 %vm2728_vm5, %v9588_v18 }
 0x602   : > { %10642 = vmatpush3.msk.msra.mxu1 %vm2741_vm4, %v5231_v37  ;;  %10630 = vmatprep.mubr.msk.f32.mxu1 %vm2728_vm5, %v9589_v20 }
 0x603   : > { %10657 = vmatprep.subr.msk.mxu1 %vm2741_vm4, %v5431_v22 }
 0x605   : > { %10631 = vmatmul.mubr.msk.f32.gmra.mrb[60].mxu1 %vm2728_vm5, %v9590_v56 }
 0x606   : > { %10643 = vmatprep.mubr.msk.f32.mxu1 %vm2728_vm5, %v9595_v57 }
 0x609   : > { %10644 = vmatmul.mubr.msk.f32.vlgmr.msra.gmra.mrb[62].mxu1 %vm2728_vm5, %v9596_v43 }
 0x60a   : > { %10658 = vmatpush3.msk.msra.mxu1 %vm2741_vm4, %v5431_v22  ;;  %10646 = vmatprep.mubr.msk.f32.mxu1 %vm2728_vm5, %v9597_v0 }
 0x60b   : > { %10673 = vmatprep.subr.msk.mxu1 %vm2741_vm4, %v5631_v7 }
 0x60d   : > { %10647 = vmatmul.mubr.msk.f32.gmra.mrb[64].mxu1 %vm2728_vm5, %v9598_v62 }
 0x60e   : > { %10659 = vmatprep.mubr.msk.f32.mxu1 %vm2728_vm5, %v9603_v34 }
 0x611   : > { %10660 = vmatmul.mubr.msk.f32.vlgmr.msra.gmra.mrb[66].mxu1 %vm2728_vm5, %v9604_v32 }
 0x612   : > { %10674 = vmatpush3.msk.msra.mxu1 %vm2741_vm4, %v5631_v7  ;;  %10662 = vmatprep.mubr.msk.f32.mxu1 %vm2728_vm5, %v9605_v19 }
 0x615   : > { %10663 = vmatmul.mubr.msk.f32.gmra.mrb[68].mxu1 %vm2728_vm5, %v9606_v46 }
 0x616   : > { %10675 = vmatprep.mubr.msk.f32.mxu1 %vm2728_vm5, %v9611_v24 }
 0x619   : > { %10676 = vmatmul.mubr.msk.f32.vlgmr.msra.gmra.mrb[70].mxu1 %vm2728_vm5, %v9612_v26 }
 0x61a   : > { %10678 = vmatprep.mubr.msk.f32.mxu1 %vm2728_vm5, %v9613_v42  ;;  %v14141_v42 = vld [vmem:[#allocation32_spill] sm:$0xff] }
 0x61d   : > { %10679 = vmatmul.mubr.msk.f32.gmra.mrb[72].mxu1 %vm2728_vm5, %v9614_v53 }
 0x6c4   : > { %v10593_v9 = vpop.f32.mrb[50].mxu1 }
 0x6c5   : > { %v4588_v2 = vadd.f32 %v10593_v9, %v12822_v11  ;;  %v4582_v44 = vpop.f32.mrb[51].mxu1  ;;  %v4608_v11 = vpop.permute.xlu0 %4607 }
 0x6c6   : > { %v4583_v25 = vadd.f32 %v4582_v44, %v4487_v12 }
 0x6c8   : > { %v11088_v3 = vpack.c.bf16 %v4588_v2, %v4583_v25  ;;  %v10596_v39 = vpop.f32.mrb[52].mxu1 }
 0x6c9   : > { %v4598_v36 = vadd.f32 %v10596_v39, %v4502_v14  ;;  %v4592_v8 = vpop.f32.mrb[53].mxu1  ;;  %v4612_v33 = vpop.permute.xlu0 %4611 }
 0x6ca   : > { %v4593_v1 = vadd.f32 %v4592_v8, %v12838_v41  ;;  %11089 = vmatprep.subr.bf16.mxu0 %v11088_v3  ;;  %v4610_v41 = vpop.permute.xlu1 %4609 }
 0x6cb   : > { %11091 = vmatpush3.bf16.msra.mxu0 %v11088_v3 }
 0x6cc   : > { %v11092_v28 = vpack.c.bf16 %v4598_v36, %v4593_v1  ;;  %v13096_v48 = vpop.f32.mrb[54].mxu1 }
 0x6cd   : > { %v4616_v15 = vpop.permute.xlu0 %4615  ;;  %v5012_v37 = vpop.f32.mrb[55].mxu1 }
 0x6ce   : > { %11093 = vmatprep.subr.bf16.mxu0 %v11092_v28  ;;  %v4614_v38 = vpop.permute.xlu1 %4613 }
 0x6cf   : > { %11095 = vmatpush3.bf16.msra.mxu0 %v11092_v28 }
 0x6d0   : > { %10633 = vmatprep.subr.msk.mxu0 %vm2741_vm4, %v5131_v55  ;;  %v13099_v27 = vpop.f32.mrb[56].mxu1 }
 0x6d1   : > { %v13101_v50 = vpop.f32.mrb[57].mxu1 }
 0x6d2   : > { %10606 = vmatmul.mubr.msk.f32.vlgmr.msra.gmra.mrb[64].mxu0 %vm1424_vm2, %v4604_v16 }
 0x6d3   : > { %10608 = vmatprep.mubr.msk.f32.mxu0 %vm1424_vm2, %v4606_v30  ;;  %10634 = vmatpush3.msk.msra.mxu0 %vm2741_vm4, %v5131_v55 }
 0x6d4   : > { %10649 = vmatprep.subr.msk.mxu0 %vm2741_vm4, %v5331_v47  ;;  %v13103_v18 = vpop.f32.mrb[58].mxu1 }
 0x6d5   : > { %v5112_v20 = vpop.f32.mrb[59].mxu1 }
 0x6d6   : > { %10609 = vmatmul.mubr.msk.f32.gmra.mrb[66].mxu0 %vm1424_vm2, %v4608_v11  ;;  %10691 = vmatprep.mubr.msk.f32.mxu1 %vm3530_vm6, %v5112_v20 }
 0x6d7   : > { %10611 = vmatprep.mubr.msk.f32.mxu0 %vm1424_vm2, %v4610_v41 }
 0x6d8   : > { %v13106_v52 = vpop.f32.mrb[60].mxu1 }
 0x6d9   : > { %v13108_v22 = vpop.f32.mrb[61].mxu1 }
 0x6da   : > { %10612 = vmatmul.mubr.msk.f32.gmra.mrb[68].mxu0 %vm1424_vm2, %v4612_v33 }
 0x6db   : > { %10614 = vmatprep.mubr.msk.f32.mxu0 %vm1424_vm2, %v4614_v38 }
 0x6dc   : > { %v13110_v56 = vpop.f32.mrb[62].mxu1 }
 0x6dd   : > { %v13112_v57 = vpop.f32.mrb[63].mxu1 }
 0x6de   : > { %10615 = vmatmul.mubr.msk.f32.gmra.mrb[70].mxu0 %vm1424_vm2, %v4616_v15 }
 0x6df   : > { %10635 = vmatprep.mubr.msk.f32.mxu0 %vm2728_vm5, %v9591_v21 }
 0x6e0   : > { %v13114_v43 = vpop.f32.mrb[64].mxu1 }
 0x6e1   : > { %v13116_v0 = vpop.f32.mrb[65].mxu1 }
 0x6e2   : > { %10636 = vmatmul.mubr.msk.f32.vlgmr.msra.gmra.mrb[72].mxu0 %vm2728_vm5, %v9592_v17 }
 0x6e3   : > { %10650 = vmatpush3.msk.msra.mxu0 %vm2741_vm4, %v5331_v47  ;;  %10638 = vmatprep.mubr.msk.f32.mxu0 %vm2728_vm5, %v9593_v6 }
 0x6e4   : > { %10665 = vmatprep.subr.msk.mxu0 %vm2741_vm4, %v5531_v31  ;;  %v13118_v61 = vpop.f32.mrb[66].mxu1 }
 0x6e5   : > { %v13120_v7 = vpop.f32.mrb[67].mxu1 }
 0x6e6   : > { %10639 = vmatmul.mubr.msk.f32.gmra.mrb[74].mxu0 %vm2728_vm5, %v9594_v10 }
 0x6e7   : > { %10651 = vmatprep.mubr.msk.f32.mxu0 %vm2728_vm5, %v9599_v58 }
 0x6e8   : > { %v13122_v62 = vpop.f32.mrb[68].mxu1 }
 0x6e9   : > { %v13124_v34 = vpop.f32.mrb[69].mxu1 }
 0x6ea   : > { %10652 = vmatmul.mubr.msk.f32.vlgmr.msra.gmra.mrb[76].mxu0 %vm2728_vm5, %v9600_v59 }
 0x6eb   : > { %10666 = vmatpush3.msk.msra.mxu0 %vm2741_vm4, %v5531_v31  ;;  %10654 = vmatprep.mubr.msk.f32.mxu0 %vm2728_vm5, %v9601_v13 }
 0x6ec   : > { %v13126_v32 = vpop.f32.mrb[70].mxu1 }
 0x6ed   : > { %v13128_v19 = vpop.f32.mrb[71].mxu1 }
 0x6ee   : > { %10655 = vmatmul.mubr.msk.f32.gmra.mrb[78].mxu0 %vm2728_vm5, %v9602_v63 }
 0x6ef   : > { %10667 = vmatprep.mubr.msk.f32.mxu0 %vm2728_vm5, %v9607_v60 }
 0x6f0   : > { %v13130_v46 = vpop.f32.mrb[72].mxu1 }
 0x6f1   : > { %v13132_v24 = vpop.f32.mrb[73].mxu1 }
 0x6f2   : > { %10668 = vmatmul.mubr.msk.f32.vlgmr.msra.gmra.mrb[80].mxu0 %vm2728_vm5, %v9608_v40 }
 0x6f3   : > { %10670 = vmatprep.mubr.msk.f32.mxu0 %vm2728_vm5, %v9609_v29 }
 0x6f6   : > { %10671 = vmatmul.mubr.msk.f32.gmra.mrb[82].mxu0 %vm2728_vm5, %v9610_v51 }
 0x6f7   : > { %10683 = vmatprep.mubr.msk.f32.mxu0 %vm3530_vm6, %v5012_v37 }
 0x7a5   : > { %v10607_v26 = vpop.f32.mrb[64].mxu0 }
 0x7a6   : > { %v4739_v53 = vsub.f32 %v10607_v26, %v14141_v42  ;;  %v4699_v12 = vpop.f32.mrb[65].mxu0 }
 0x7a7   : > { %v4738_v9 = vsub.f32 %v4699_v12, %v14141_v42 }
 0x7a8   : > { %v4753_v14 = vsel %vm697_vm0, %v4739_v53, -inf }
 0x7a9   : > { %v4754_v2 = vrot.slane %v4753_v14, 4  ;;  %v4746_v44 = vsel %vm697_vm0, %v4738_v9, -inf  ;;  %v10610_v25 = vpop.f32.mrb[66].mxu0 }
 0x7aa   : > { %v4747_v3 = vrot.slane %v4746_v44, 4  ;;  %v13139_v39 = vsub.f32 %v10610_v25, %v14141_v42  ;;  %v4709_v36 = vpop.f32.mrb[67].mxu0 }
 0x7ab   : > { %v4755_v8 = vmax.f32 %v4753_v14, %v4754_v2  ;;  %v13142_v1 = vsub.f32 %v4709_v36, %v14141_v42 }
 0x7ac   : > { %v4748_v16 = vmax.f32 %v4746_v44, %v4747_v3  ;;  %v4767_v28 = vsel %vm697_vm0, %v13139_v39, -inf }
 0x7ad   : > { %v4756_v45 = vrot.slane %v4755_v8, 2  ;;  %v4768_v55 = vrot.slane %v4767_v28, 4  ;;  %v4760_v30 = vsel %vm697_vm0, %v13142_v1, -inf  ;;  %v10613_v11 = vpop.f32.mrb[68].mxu0 }
 0x7ae   : > { %v4749_v54 = vrot.slane %v4748_v16, 2  ;;  %v4761_v47 = vrot.slane %v4760_v30, 4  ;;  %v13149_v41 = vsub.f32 %v10613_v11, %v14141_v42  ;;  %v4719_v33 = vpop.f32.mrb[69].mxu0 }
 0x7af   : > { %v4757_v38 = vmax.f32 %v4755_v8, %v4756_v45  ;;  %v4769_v21 = vmax.f32 %v4767_v28, %v4768_v55  ;;  %v13152_v15 = vsub.f32 %v4719_v33, %v14141_v42 }
 0x7b0   : > { %v4750_v17 = vmax.f32 %v4748_v16, %v4749_v54  ;;  %v4762_v6 = vmax.f32 %v4760_v30, %v4761_v47  ;;  %v4781_v4 = vsel %vm697_vm0, %v13149_v41, -inf }
 0x7b1   : > { %v4758_v31 = vrot.slane %v4757_v38, 1  ;;  %v4770_v10 = vrot.slane %v4769_v21, 2  ;;  %v4782_v58 = vrot.slane %v4781_v4, 4  ;;  %v4774_v59 = vsel %vm697_vm0, %v13152_v15, -inf  ;;  %v10616_v13 = vpop.f32.mrb[70].mxu0 }
 0x7b2   : > { %v4751_v63 = vrot.slane %v4750_v17, 1  ;;  %v4763_v60 = vrot.slane %v4762_v6, 2  ;;  %v4775_v40 = vrot.slane %v4774_v59, 4  ;;  %v13159_v29 = vsub.f32 %v10616_v13, %v14141_v42  ;;  %v4729_v51 = vpop.f32.mrb[71].mxu0 }
 0x7b3   : > { %v4759_v37 = vmax.f32 %v4757_v38, %v4758_v31  ;;  %v4771_v20 = vmax.f32 %v4769_v21, %v4770_v10  ;;  %v4783_v26 = vmax.f32 %v4781_v4, %v4782_v58  ;;  %v13162_v12 = vsub.f32 %v4729_v51, %v14141_v42 }
 0x7b4   : > { %v4752_v14 = vmax.f32 %v4750_v17, %v4751_v63  ;;  %v4764_v2 = vmax.f32 %v4762_v6, %v4763_v60  ;;  %v4776_v44 = vmax.f32 %v4774_v59, %v4775_v40  ;;  %v4795_v25 = vsel %vm697_vm0, %v13159_v29, -inf }
 0x7b5   : > { %v4803_v3 = vsub.f32 %v4739_v53, %v4759_v37  ;;  %v4772_v36 = vrot.slane %v4771_v20, 1  ;;  %v4784_v8 = vrot.slane %v4783_v26, 2  ;;  %v4796_v16 = vrot.slane %v4795_v25, 4  ;;  %v13166_v28 = vpop.f32.mrb[72].mxu0 }
 0x7b6   : > { %v4802_v45 = vsub.f32 %v4738_v9, %v4752_v14  ;;  %v4765_v55 = vrot.slane %v4764_v2, 1  ;;  %v4777_v30 = vrot.slane %v4776_v44, 2  ;;  %v4788_v11 = vsel %vm697_vm0, %v13162_v12, -inf  ;;  %v13170_v54 = vpop.f32.mrb[73].mxu0 }
 0x7b7   : > { %v4812_v47 = vmul.f32 1.442695, %v4803_v3  ;;  %v4773_v33 = vmax.f32 %v4771_v20, %v4772_v36  ;;  %v4785_v38 = vmax.f32 %v4783_v26, %v4784_v8  ;;  %v4797_v21 = vmax.f32 %v4795_v25, %v4796_v16  ;;  %v13184_v16 = vpop.permute.xlu1 %6568 }
 0x7b8   : > { %v4810_v17 = vmul.f32 1.442695, %v4802_v45  ;;  %v4766_v6 = vmax.f32 %v4764_v2, %v4765_v55  ;;  %v4778_v53 = vmax.f32 %v4776_v44, %v4777_v30  ;;  %v4789_v4 = vrot.slane %v4788_v11, 4 }
 0x7b9   : > { %11296 = vpow2.f32 %v4812_v47  ;;  %v4805_v31 = vsub.f32 %v13139_v39, %v4773_v33  ;;  %v4786_v10 = vrot.slane %v4785_v38, 1  ;;  %v4798_v9 = vrot.slane %v4797_v21, 2  ;;  %v13173_v58 = vpop.f32.mrb[74].mxu0 }
 0x7ba   : > { %11298 = vpow2.f32 %v4810_v17  ;;  %v4804_v59 = vsub.f32 %v13142_v1, %v4766_v6  ;;  %v4779_v13 = vrot.slane %v4778_v53, 1  ;;  %v4790_v63 = vmax.f32 %v4788_v11, %v4789_v4  ;;  %v13176_v60 = vpop.f32.mrb[75].mxu0 }
 0x7bb   : > { %v4816_v40 = vmul.f32 1.442695, %v4805_v31  ;;  %v4787_v51 = vmax.f32 %v4785_v38, %v4786_v10  ;;  %v4799_v37 = vmax.f32 %v4797_v21, %v4798_v9  ;;  %v13202_v4 = vpop.permute.xlu1 %6576 }
 0x7bc   : > { %v4814_v20 = vmul.f32 1.442695, %v4804_v59  ;;  %v4780_v26 = vmax.f32 %v4778_v53, %v4779_v13  ;;  %v4791_v14 = vrot.slane %v4790_v63, 2  ;;  %14142 = vst [vmem:[#allocation18_spill] sm:$0xff] %v13202_v4 }
 0x7bd   : > { %11300 = vpow2.f32 %v4816_v40  ;;  %v4807_v39 = vsub.f32 %v13149_v41, %v4787_v51  ;;  %v4800_v2 = vrot.slane %v4799_v37, 1  ;;  %v13179_v44 = vpop.f32.mrb[76].mxu0 }
 0x7be   : > { %11302 = vpow2.f32 %v4814_v20  ;;  %v4806_v25 = vsub.f32 %v13152_v15, %v4780_v26  ;;  %v4792_v1 = vmax.f32 %v4790_v63, %v4791_v14  ;;  %v13182_v3 = vpop.f32.mrb[77].mxu0 }
 0x7bf   : > { %v4820_v36 = vmul.f32 1.442695, %v4807_v39  ;;  %v4801_v8 = vmax.f32 %v4799_v37, %v4800_v2 }
 0x7c0   : > { %v4818_v45 = vmul.f32 1.442695, %v4806_v25  ;;  %v4793_v55 = vrot.slane %v4792_v1, 1 }
 0x7c1   : > { %11304 = vpow2.f32 %v4820_v36  ;;  %v4809_v30 = vsub.f32 %v13159_v29, %v4801_v8  ;;  %v13187_v11 = vpop.f32.mrb[78].mxu0 }
 0x7c2   : > { %11306 = vpow2.f32 %v4818_v45  ;;  %v4794_v41 = vmax.f32 %v4792_v1, %v4793_v55  ;;  %v13189_v47 = vpop.f32.mrb[79].mxu0  ;;  %v13222_v45 = vpop.permute.xlu1 %6580 }
 0x7c3   : > { %v13191_v33 = vpop.eup %11296  ;;  %v4824_v15 = vmul.f32 1.442695, %v4809_v30  ;;  %14143 = vst [vmem:[#allocation19_spill] sm:$0xff] %v13222_v45 }
 0x7c4   : > { %v13193_v38 = vpop.eup %11298  ;;  %v4833_v21 = vsel %vm697_vm0, %v13191_v33, 0.0  ;;  %v4808_v17 = vsub.f32 %v13162_v12, %v4794_v41 }
 0x7c5   : > { %v4834_v6 = vrot.slane %v4833_v21, 4  ;;  %v4826_v29 = vsel %vm697_vm0, %v13193_v38, 0.0  ;;  %11308 = vpow2.f32 %v4824_v15  ;;  %v13200_v53 = vpop.f32.mrb[80].mxu0 }
 0x7c6   : > { %v4827_v31 = vrot.slane %v4826_v29, 4  ;;  %v4822_v10 = vmul.f32 1.442695, %v4808_v17  ;;  %v13204_v9 = vpop.f32.mrb[81].mxu0  ;;  %v13234_v45 = vpop.permute.xlu1 %6638 }
 0x7c7   : > { %v13206_v59 = vpop.eup %11300  ;;  %v4835_v13 = vadd.f32 %v4834_v6, %v4833_v21  ;;  %14144 = vst [vmem:[#allocation35_spill] sm:$0xff] %v13234_v45 }
 0x7c8   : > { %v13208_v63 = vpop.eup %11302  ;;  %v4828_v40 = vadd.f32 %v4827_v31, %v4826_v29  ;;  %v4847_v12 = vsel %vm697_vm0, %v13206_v59, 0.0  ;;  %11310 = vpow2.f32 %v4822_v10 }
 0x7c9   : > { %v4836_v51 = vrot.slane %v4835_v13, 2  ;;  %v4848_v37 = vrot.slane %v4847_v12, 4  ;;  %v4840_v20 = vsel %vm697_vm0, %v13208_v63, 0.0  ;;  %v13214_v26 = vpop.f32.mrb[82].mxu0 }
 0x7ca   : > { %v4829_v14 = vrot.slane %v4828_v40, 2  ;;  %v4841_v39 = vrot.slane %v4840_v20, 4  ;;  %v13216_v2 = vpop.f32.mrb[83].mxu0  ;;  %v13238_v45 = vpop.permute.xlu1 %6654 }
 0x7cb   : > { %v13218_v25 = vpop.eup %11304  ;;  %v4849_v1 = vadd.f32 %v4848_v37, %v4847_v12  ;;  %v4837_v36 = vadd.f32 %v4836_v51, %v4835_v13 }
 0x7cc   : > { %v13220_v8 = vpop.eup %11306  ;;  %v4842_v55 = vadd.f32 %v4841_v39, %v4840_v20  ;;  %v4861_v30 = vsel %vm697_vm0, %v13218_v25, 0.0  ;;  %v4830_v41 = vadd.f32 %v4829_v14, %v4828_v40 }
 0x7cd   : > { %v4850_v15 = vrot.slane %v4849_v1, 2  ;;  %v4862_v21 = vrot.slane %v4861_v30, 4  ;;  %v4854_v17 = vsel %vm697_vm0, %v13220_v8, 0.0  ;;  %v4838_v6 = vrot.slane %v4837_v36, 1 }
 0x7ce   : > { %v4843_v29 = vrot.slane %v4842_v55, 2  ;;  %v4855_v31 = vrot.slane %v4854_v17, 4  ;;  %v4831_v10 = vrot.slane %v4830_v41, 1 }
 0x7cf   : > { %v13228_v12 = vpop.eup %11308  ;;  %v4863_v13 = vadd.f32 %v4862_v21, %v4861_v30  ;;  %v4839_v51 = vadd.f32 %v4838_v6, %v4837_v36  ;;  %v4851_v37 = vadd.f32 %v4850_v15, %v4849_v1 }
 0x7d0   : > { %v4856_v42 = vadd.f32 %v4855_v31, %v4854_v17  ;;  %v4875_v20 = vsel %vm697_vm0, %v13228_v12, 0.0  ;;  %v4832_v39 = vadd.f32 %v4831_v10, %v4830_v41  ;;  %v4844_v40 = vadd.f32 %v4843_v29, %v4842_v55 }
 0x7d1   : > { %v4864_v14 = vrot.slane %v4863_v13, 2  ;;  %v4876_v23 = vrot.slane %v4875_v20, 4  ;;  %11312 = vrcp.f32 %v4839_v51  ;;  %v4852_v5 = vrot.slane %v4851_v37, 1 }
 0x7d2   : > { %v13232_v4 = vpop.eup %11310  ;;  %v4857_v35 = vrot.slane %v4856_v42, 2  ;;  %11314 = vrcp.f32 %v4832_v39  ;;  %v4845_v49 = vrot.slane %v4844_v40, 1 }
 0x7d3   : > { %v4877_v30 = vadd.f32 %v4876_v23, %v4875_v20  ;;  %v4868_v1 = vsel %vm697_vm0, %v13232_v4, 0.0  ;;  %v4853_v36 = vadd.f32 %v4852_v5, %v4851_v37  ;;  %v4865_v15 = vadd.f32 %v4864_v14, %v4863_v13  ;;  %v13242_v14 = vpop.permute.xlu1 %6642 }
 0x7d4   : > { %v4869_v21 = vrot.slane %v4868_v1, 4  ;;  %v4846_v41 = vadd.f32 %v4845_v49, %v4844_v40  ;;  %v4858_v55 = vadd.f32 %v4857_v35, %v4856_v42 }
 0x7d5   : > { %v4878_v17 = vrot.slane %v4877_v30, 2  ;;  %11316 = vrcp.f32 %v4853_v36  ;;  %v4866_v6 = vrot.slane %v4865_v15, 1 }
 0x7d6   : > { %v4870_v29 = vadd.f32 %v4869_v21, %v4868_v1  ;;  %11318 = vrcp.f32 %v4846_v41  ;;  %v4859_v31 = vrot.slane %v4858_v55, 1 }
 0x7d7   : > { %v4867_v10 = vadd.f32 %v4866_v6, %v4865_v15  ;;  %v4879_v51 = vadd.f32 %v4878_v17, %v4877_v30 }
 0x7d8   : > { %v4871_v39 = vrot.slane %v4870_v29, 2  ;;  %v4860_v23 = vadd.f32 %v4859_v31, %v4858_v55 }
 0x7d9   : > { %11320 = vrcp.f32 %v4867_v10  ;;  %v4880_v20 = vrot.slane %v4879_v51, 1 }
 0x7da   : > { %11322 = vrcp.f32 %v4860_v23  ;;  %v4872_v5 = vadd.f32 %v4871_v39, %v4870_v29 }
 0x7db   : > { %v11313_v13 = vpop.eup %11312  ;;  %v4881_v37 = vadd.f32 %v4880_v20, %v4879_v51 }
 0x7dc   : > { %v11315_v49 = vpop.eup %11314  ;;  %v4891_v35 = vmul.f32 %v11313_v13, %v13191_v33  ;;  %v4873_v42 = vrot.slane %v4872_v5, 1 }
 0x7dd   : > { %v4890_v40 = vmul.f32 %v11315_v49, %v13193_v38  ;;  %11324 = vrcp.f32 %v4881_v37 }
 0x7de   : > { %10689 = vmatprep.subr.mxu1 %v4891_v35  ;;  %v4874_v30 = vadd.f32 %v4873_v42, %v4872_v5 }
 0x7df   : > { %v11317_v1 = vpop.eup %11316  ;;  %10681 = vmatprep.subr.mxu0 %v4890_v40  ;;  %10690 = vmatpush3.msra.mxu1 %v4891_v35 }
 0x7e0   : > { %v11319_v36 = vpop.eup %11318  ;;  %10682 = vmatpush3.msra.mxu0 %v4890_v40  ;;  %10692 = vmatmul.mubr.msk.f32.vlgmr.msra.gmra.mrb[74].mxu1 %vm3530_vm6, %v13103_v18  ;;  %v4893_v15 = vmul.f32 %v11317_v1, %v13206_v59  ;;  %11326 = vrcp.f32 %v4874_v30  ;;  %v13254_v18 = vpop.permute.xlu1 %6646 }
 0x7e1   : > { %10684 = vmatmul.mubr.msk.f32.vlgmr.msra.gmra.mrb[84].mxu0 %vm3530_vm6, %v13096_v48  ;;  %10694 = vmatprep.mubr.msk.f32.mxu1 %vm3530_vm6, %v13108_v22  ;;  %v4892_v33 = vmul.f32 %v11319_v36, %v13208_v63 }
 0x7e2   : > { %10686 = vmatprep.mubr.msk.f32.mxu0 %vm3530_vm6, %v13101_v50  ;;  %10705 = vmatprep.subr.mxu1 %v4893_v15 }
 0x7e3   : > { %v11321_v38 = vpop.eup %11320  ;;  %10697 = vmatprep.subr.mxu0 %v4892_v33  ;;  %10706 = vmatpush3.msra.mxu1 %v4893_v15 }
 0x7e4   : > { %v11323_v21 = vpop.eup %11322  ;;  %10695 = vmatmul.mubr.msk.f32.gmra.mrb[76].mxu1 %vm3530_vm6, %v13106_v52  ;;  %10698 = vmatpush3.msra.mxu0 %v4892_v33  ;;  %v4895_v48 = vmul.f32 %v11321_v38, %v13218_v25  ;;  %v13271_v59 = vpop.permute.xlu1 %6666 }
 0x7e5   : > { %10687 = vmatmul.mubr.msk.f32.gmra.mrb[86].mxu0 %vm3530_vm6, %v13099_v27  ;;  %10707 = vmatprep.mubr.msk.f32.mxu1 %vm3530_vm6, %v13112_v57  ;;  %v4894_v50 = vmul.f32 %v11323_v21, %v13220_v8 }
 0x7e6   : > { %10721 = vmatprep.subr.mxu1 %v4895_v48  ;;  %10699 = vmatprep.mubr.msk.f32.mxu0 %vm3530_vm6, %v13170_v54 }
 0x7e7   : > { %v11325_v22 = vpop.eup %11324  ;;  %10713 = vmatprep.subr.mxu0 %v4894_v50 }
 0x7e8   : > { %10708 = vmatmul.mubr.msk.f32.vlgmr.msra.gmra.mrb[78].mxu1 %vm3530_vm6, %v13110_v56  ;;  %v4897_v52 = vmul.f32 %v11325_v22, %v13228_v12  ;;  %v13286_v56 = vpop.permute.xlu1 %6690 }
 0x7e9   : > { %10722 = vmatpush3.msra.mxu1 %v4895_v48  ;;  %10700 = vmatmul.mubr.msk.f32.vlgmr.msra.gmra.mrb[88].mxu0 %vm3530_vm6, %v13166_v28 }
 0x7ea   : > { %v11327_v27 = vpop.eup %11326  ;;  %10714 = vmatpush3.msra.mxu0 %v4894_v50  ;;  %10737 = vmatprep.subr.mxu1 %v4897_v52 }
 0x7eb   : > { %10702 = vmatprep.mubr.msk.f32.mxu0 %vm3530_vm6, %v13176_v60  ;;  %10710 = vmatprep.mubr.msk.f32.mxu1 %vm3530_vm6, %v13116_v0  ;;  %v4896_v57 = vmul.f32 %v11327_v27, %v13232_v4 }
 0x7ec   : > { %10711 = vmatmul.mubr.msk.f32.gmra.mrb[80].mxu1 %vm3530_vm6, %v13114_v43  ;;  %v13302_v43 = vpop.permute.xlu1 %6695 }
 0x7ed   : > { %10729 = vmatprep.subr.mxu0 %v4896_v57  ;;  %10703 = vmatmul.mubr.msk.f32.gmra.mrb[90].mxu0 %vm3530_vm6, %v13173_v58 }
 0x7ee   : > { %10715 = vmatprep.mubr.msk.f32.mxu0 %vm3530_vm6, %v13182_v3  ;;  %10723 = vmatprep.mubr.msk.f32.mxu1 %vm3530_vm6, %v13120_v7 }
 0x7f0   : > { %10724 = vmatmul.mubr.msk.f32.vlgmr.msra.gmra.mrb[82].mxu1 %vm3530_vm6, %v13118_v61  ;;  %v6801_v0 = vpop.permute.xlu1 %6800  ;;  %v9691_v61 = vld [vmem:[%s14037_s8 + $0x40] sm:$0xff] }
 0x7f1   : > { %10738 = vmatpush3.msra.mxu1 %v4897_v52  ;;  %10716 = vmatmul.mubr.msk.f32.vlgmr.msra.gmra.mrb[92].mxu0 %vm3530_vm6, %v13179_v44 }
 0x7f2   : > { %10730 = vmatpush3.msra.mxu0 %v4896_v57  ;;  %10718 = vmatprep.mubr.msk.f32.mxu0 %vm3530_vm6, %v13189_v47 }
 0x7f3   : > { %10726 = vmatprep.mubr.msk.f32.mxu1 %vm3530_vm6, %v13124_v34 }
 0x7f4   : > { %10727 = vmatmul.mubr.msk.f32.gmra.mrb[84].mxu1 %vm3530_vm6, %v13122_v62 }
 0x7f5   : > { %10719 = vmatmul.mubr.msk.f32.gmra.mrb[94].mxu0 %vm3530_vm6, %v13187_v11  ;;  %10739 = vmatprep.mubr.msk.f32.mxu1 %vm3530_vm6, %v13128_v19 }
 0x7f6   : > { %10731 = vmatprep.mubr.msk.f32.mxu0 %vm3530_vm6, %v13204_v9 }
 0x7f8   : > { %10740 = vmatmul.mubr.msk.f32.vlgmr.msra.gmra.mrb[86].mxu1 %vm3530_vm6, %v13126_v32 }
 0x7f9   : > { %10732 = vmatmul.mubr.msk.f32.vlgmr.msra.gmra.mrb[96].mxu0 %vm3530_vm6, %v13200_v53  ;;  %10742 = vmatprep.mubr.msk.f32.mxu1 %vm3530_vm6, %v13132_v24 }
 0x7fa   : > { %10734 = vmatprep.mubr.msk.f32.mxu0 %vm3530_vm6, %v13216_v2 }
 0x7fc   : > { %10743 = vmatmul.mubr.msk.f32.gmra.mrb[88].mxu1 %vm3530_vm6, %v13130_v46 }
 0x7fd   : > { %10735 = vmatmul.mubr.msk.f32.gmra.mrb[98].mxu0 %vm3530_vm6, %v13214_v26  ;;  %10767 = vmatprep.mubr.msk.f32.mxu1 %vm1424_vm2, %v6801_v0 }
 0x7fe   : > { %10753 = vmatprep.mubr.msk.f32.mxu0 %vm1424_vm2, %v9691_v61 }
 0x8b3   : > { %v10693_v7 = vpop.f32.mrb[74].mxu1 }
 0x8b4   : > { %v6523_v62 = vsel %vm697_vm0, %v10693_v7, 0.0  ;;  %v10685_v34 = vpop.f32.mrb[84].mxu0  ;;  %v5906_v32 = vpop.f32.mrb[75].mxu1 }
 0x8b5   : > { %v6522_v19 = vsel %vm697_vm0, %v10685_v34, 0.0  ;;  %v6508_v46 = vsel %vm697_vm0, %v5906_v32, 0.0  ;;  %v5809_v24 = vpop.f32.mrb[85].mxu0 }
 0x8b6   : > { %v6524_v28 = vadd.f32 %v6523_v62, %v6522_v19  ;;  %v6507_v54 = vsel %vm697_vm0, %v5809_v24, 0.0 }
 0x8b7   : > { %v6509_v58 = vadd.f32 %v6508_v46, %v6507_v54  ;;  %v10696_v60 = vpop.f32.mrb[76].mxu1 }
 0x8b8   : > { %v6553_v44 = vsel %vm697_vm0, %v10696_v60, 0.0  ;;  %v10688_v3 = vpop.f32.mrb[86].mxu0  ;;  %v5916_v11 = vpop.f32.mrb[77].mxu1 }
 0x8b9   : > { %v6552_v47 = vsel %vm697_vm0, %v10688_v3, 0.0  ;;  %v6538_v53 = vsel %vm697_vm0, %v5916_v11, 0.0  ;;  %v5819_v4 = vpop.f32.mrb[87].mxu0 }
 0x8ba   : > { %v6554_v9 = vadd.f32 %v6553_v44, %v6552_v47  ;;  %v6537_v63 = vsel %vm697_vm0, %v5819_v4, 0.0 }
 0x8bb   : > { %v6539_v26 = vadd.f32 %v6538_v53, %v6537_v63  ;;  %v10709_v2 = vpop.f32.mrb[78].mxu1 }
 0x8bc   : > { %v10701_v25 = vpop.f32.mrb[88].mxu0  ;;  %v6100_v8 = vpop.f32.mrb[79].mxu1  ;;  %v6527_v6 = vsel %vm697_vm0, %v10709_v2, 0.0 }
 0x8bd   : > { %v6525_v12 = vsel %vm697_vm0, %v10701_v25, 0.0  ;;  %v6003_v41 = vpop.f32.mrb[89].mxu0  ;;  %v6512_v10 = vsel %vm697_vm0, %v6100_v8, 0.0 }
 0x8be   : > { %v6526_v55 = vadd.f32 %v6525_v12, %v6524_v28  ;;  %v6510_v17 = vsel %vm697_vm0, %v6003_v41, 0.0 }
 0x8bf   : > { %v6511_v29 = vadd.f32 %v6510_v17, %v6509_v58  ;;  %v10712_v31 = vpop.f32.mrb[80].mxu1 }
 0x8c0   : > { %v10704_v51 = vpop.f32.mrb[90].mxu0  ;;  %v6110_v39 = vpop.f32.mrb[81].mxu1  ;;  %v6528_v23 = vadd.f32 %v6527_v6, %v6526_v55  ;;  %v6557_v35 = vsel %vm697_vm0, %v10712_v31, 0.0 }
 0x8c1   : > { %v6555_v20 = vsel %vm697_vm0, %v10704_v51, 0.0  ;;  %v6013_v5 = vpop.f32.mrb[91].mxu0  ;;  %v6513_v13 = vadd.f32 %v6512_v10, %v6511_v29  ;;  %v6542_v30 = vsel %vm697_vm0, %v6110_v39, 0.0  ;;  %v6573_v55 = vpop.permute.xlu0 %6572 }
 0x8c2   : > { %v6556_v37 = vadd.f32 %v6555_v20, %v6554_v9  ;;  %v6540_v49 = vsel %vm697_vm0, %v6013_v5, 0.0  ;;  %v14145_v5 = vld [vmem:[#allocation17_spill] sm:$0xff] }
 0x8c3   : > { %v6541_v42 = vadd.f32 %v6540_v49, %v6539_v26  ;;  %v10725_v40 = vpop.f32.mrb[82].mxu1 }
 0x8c4   : > { %v10717_v1 = vpop.f32.mrb[92].mxu0  ;;  %v6294_v36 = vpop.f32.mrb[83].mxu1  ;;  %v6558_v15 = vadd.f32 %v6557_v35, %v6556_v37  ;;  %v6531_v22 = vsel %vm697_vm0, %v10725_v40, 0.0  ;;  %v14146_v35 = vld [vmem:[#allocation16_spill] sm:$0xff] }
 0x8c5   : > { %v6529_v33 = vsel %vm697_vm0, %v10717_v1, 0.0  ;;  %v6197_v38 = vpop.f32.mrb[93].mxu0  ;;  %v6543_v21 = vadd.f32 %v6542_v30, %v6541_v42  ;;  %v6516_v57 = vsel %vm697_vm0, %v6294_v36, 0.0  ;;  %v14147_v1 = vld [vmem:[#allocation19_spill] sm:$0xff] }
 0x8c6   : > { %v6530_v48 = vadd.f32 %v6529_v33, %v6528_v23  ;;  %v6514_v50 = vsel %vm697_vm0, %v6197_v38, 0.0  ;;  %v14148_v33 = vld [vmem:[#allocation18_spill] sm:$0xff] }
 0x8c7   : > { %v6515_v52 = vadd.f32 %v6514_v50, %v6513_v13  ;;  %v10728_v27 = vpop.f32.mrb[84].mxu1  ;;  %v14150_v50 = vld [vmem:[#allocation34_spill] sm:$0xff] }
 0x8c8   : > { %v10720_v0 = vpop.f32.mrb[94].mxu0  ;;  %v6304_v61 = vpop.f32.mrb[85].mxu1  ;;  %v6532_v7 = vadd.f32 %v6531_v22, %v6530_v48  ;;  %v6561_v24 = vsel %vm697_vm0, %v10728_v27, 0.0 }
 0x8c9   : > { %v6559_v62 = vsel %vm697_vm0, %v10720_v0, 0.0  ;;  %v6207_v34 = vpop.f32.mrb[95].mxu0  ;;  %v6517_v32 = vadd.f32 %v6516_v57, %v6515_v52  ;;  %v6546_v58 = vsel %vm697_vm0, %v6304_v61, 0.0 }
 0x8ca   : > { %v6560_v19 = vadd.f32 %v6559_v62, %v6558_v15  ;;  %v6544_v46 = vsel %vm697_vm0, %v6207_v34, 0.0 }
 0x8cb   : > { %v6545_v28 = vadd.f32 %v6544_v46, %v6543_v21  ;;  %v10741_v54 = vpop.f32.mrb[86].mxu1  ;;  %v14149_v21 = vld [vmem:[#allocation33_spill] sm:$0xff]  ;;  %v6635_v46 = vpop.permute.xlu0 %6634 }
 0x8cc   : > { %v10733_v60 = vpop.f32.mrb[96].mxu0  ;;  %v6488_v44 = vpop.f32.mrb[87].mxu1  ;;  %v6562_v3 = vadd.f32 %v6561_v24, %v6560_v19  ;;  %v6535_v63 = vsel %vm697_vm0, %v10741_v54, 0.0 }
 0x8cd   : > { %v6533_v11 = vsel %vm697_vm0, %v10733_v60, 0.0  ;;  %v6391_v47 = vpop.f32.mrb[97].mxu0  ;;  %v6547_v53 = vadd.f32 %v6546_v58, %v6545_v28  ;;  %v6520_v8 = vsel %vm697_vm0, %v6488_v44, 0.0 }
 0x8ce   : > { %v6534_v4 = vadd.f32 %v6533_v11, %v6532_v7  ;;  %v6518_v9 = vsel %vm697_vm0, %v6391_v47, 0.0 }
 0x8cf   : > { %v6519_v26 = vadd.f32 %v6518_v9, %v6517_v32  ;;  %v10744_v2 = vpop.f32.mrb[88].mxu1  ;;  %v6659_v47 = vpop.permute.xlu0 %6658 }
 0x8d0   : > { %v6536_v25 = vadd.f32 %v6535_v63, %v6534_v4  ;;  %v10736_v12 = vpop.f32.mrb[98].mxu0  ;;  %v6498_v41 = vpop.f32.mrb[89].mxu1  ;;  %v6565_v23 = vsel %vm697_vm0, %v10744_v2, 0.0 }
 0x8d1   : > { %v6521_v17 = vadd.f32 %v6520_v8, %v6519_v26  ;;  %v6563_v6 = vsel %vm697_vm0, %v10736_v12, 0.0  ;;  %v6401_v29 = vpop.f32.mrb[99].mxu0  ;;  %v6550_v49 = vsel %vm697_vm0, %v6498_v41, 0.0 }
 0x8d2   : > { %v6584_v31 = vadd.f32 %v6573_v55, %v6536_v25  ;;  %v6564_v10 = vadd.f32 %v6563_v6, %v6562_v3  ;;  %v6548_v51 = vsel %vm697_vm0, %v6401_v29, 0.0 }
 0x8d3   : > { %v6583_v39 = vadd.f32 %v13184_v16, %v6521_v17  ;;  %v6549_v20 = vadd.f32 %v6548_v51, %v6547_v53  ;;  %v6663_v8 = vpop.permute.xlu0 %6662 }
 0x8d4   : > { %v6588_v13 = vadd.f32 %v6584_v31, %v14145_v5  ;;  %v6566_v37 = vadd.f32 %v6565_v23, %v6564_v10  ;;  %v13376_v5 = vpop.permute.xlu1 %6804 }
 0x8d5   : > { %v6587_v42 = vadd.f32 %v6583_v39, %v14146_v35  ;;  %v6551_v40 = vadd.f32 %v6550_v49, %v6549_v20 }
 0x8d6   : > { %v6592_v30 = vsel %vm697_vm0, %v6588_v13, 0.0  ;;  %v6586_v36 = vadd.f32 %v14147_v1, %v6566_v37 }
 0x8d7   : > { %v6591_v15 = vsel %vm697_vm0, %v6587_v42, 0.0  ;;  %v6585_v38 = vadd.f32 %v14148_v33, %v6551_v40  ;;  %v13370_v17 = vpop.permute.xlu0 %6685 }
 0x8d8   : > { %v6593_v16 = vadd.f32 %v6592_v30, %v6591_v15  ;;  %v6590_v48 = vadd.f32 %v6586_v36, %v14149_v21  ;;  %v13380_v37 = vpop.permute.xlu1 %6808  ;;  %v14151_v15 = vld [vmem:[#allocation35_spill] sm:$0xff] }
 0x8d9   : > { %v6589_v22 = vadd.f32 %v6585_v38, %v14150_v50 }
 0x8da   : > { %v6596_v57 = vsel %vm697_vm0, %v6590_v48, 0.0 }
 0x8db   : > { %v6594_v52 = vsel %vm697_vm0, %v6589_v22, 0.0  ;;  %v13372_v10 = vpop.permute.xlu0 %6700 }
 0x8dc   : > { %v6595_v27 = vadd.f32 %v6594_v52, %v6593_v16  ;;  %v13387_v21 = vpop.permute.xlu1 %6812 }
 0x8de   : > { %v6597_v0 = vadd.f32 %v6596_v57, %v6595_v27 }
 0x8df   : > { %v13374_v20 = vpop.permute.xlu0 %6802 }
 0x8e0   : > { %v6598_v61 = vrot.slane %v6597_v0, 4 }
 0x8e2   : > { %v6599_v7 = vadd.f32 %v6598_v61, %v6597_v0 }
 0x8e4   : > { %v6600_v62 = vrot.slane %v6599_v7, 2 }
 0x8e6   : > { %v6601_v34 = vadd.f32 %v6600_v62, %v6599_v7  ;;  %v9693_v7 = vld [vmem:[%s14037_s8 + $0x50] sm:$0xff]  ;;  %v14157_v62 = vld [vmem:[#allocation21_spill] sm:$0xff] }
 0x8e8   : > { %v6602_v32 = vrot.slane %v6601_v34, 1 }
 0x8ea   : > { %v6603_v19 = vadd.f32 %v6602_v32, %v6601_v34  ;;  %v9694_v32 = vld [vmem:[%s14037_s8 + $0x58] sm:$0xff] }
 0x8ec   : > { %v6604_v24 = vmul.f32 0.03125, %v6603_v19  ;;  %v9707_v19 = vld [vmem:[%s14042_s13 + $0x200] sm:$0xff] }
 0x8ee   : > { %v6607_v28 = vsub.f32 %v6589_v22, %v6604_v24  ;;  %v6608_v54 = vsub.f32 %v6590_v48, %v6604_v24  ;;  %v6605_v58 = vsub.f32 %v6587_v42, %v6604_v24  ;;  %v6606_v60 = vsub.f32 %v6588_v13, %v6604_v24  ;;  %v13378_v13 = vpop.permute.xlu0 %6806  ;;  %v9708_v24 = vld [vmem:[%s14042_s13 + $0x208] sm:$0xff] }
 0x8f0   : > { %v6611_v44 = vmul.f32 %v6607_v28, %v6607_v28  ;;  %v6609_v3 = vmul.f32 %v6605_v58, %v6605_v58  ;;  %v6610_v11 = vmul.f32 %v6606_v60, %v6606_v60  ;;  %v6612_v53 = vmul.f32 %v6608_v54, %v6608_v54 }
 0x8f2   : > { %v6613_v4 = vsel %vm697_vm0, %v6609_v3, 0.0  ;;  %v6614_v9 = vsel %vm697_vm0, %v6610_v11, 0.0  ;;  %v6616_v26 = vsel %vm697_vm0, %v6611_v44, 0.0  ;;  %v6618_v25 = vsel %vm697_vm0, %v6612_v53, 0.0  ;;  %v13382_v1 = vpop.permute.xlu0 %6810  ;;  %v9711_v44 = vld [vmem:[%s14042_s13 + $0x220] sm:$0xff]  ;;  %v9712_v11 = vld [vmem:[%s14042_s13 + $0x228] sm:$0xff] }
 0x8f3   : > { %v6615_v63 = vadd.f32 %v6614_v9, %v6613_v4  ;;  %v14159_v53 = vld [vmem:[#allocation25_spill] sm:$0xff] }
 0x8f4   : > { %v9714_v9 = vld [vmem:[%s14042_s13 + $0x238] sm:$0xff] }
 0x8f5   : > { %v6617_v2 = vadd.f32 %v6616_v26, %v6615_v63  ;;  %v9719_v63 = vld [vmem:[%s14042_s13 + $0x260] sm:$0xff] }
 0x8f6   : > { %v13401_v57 = vpop.permute.xlu0 %6814 }
 0x8f7   : > { %v6619_v12 = vadd.f32 %v6618_v25, %v6617_v2  ;;  %v9720_v2 = vld [vmem:[%s14042_s13 + $0x268] sm:$0xff]  ;;  %v9721_v25 = vld [vmem:[%s14042_s13 + $0x270] sm:$0xff] }
 0x8f9   : > { %v6620_v41 = vrot.slane %v6619_v12, 4 }
 0x8fa   : > { %v1564_v61 = vpop.permute.xlu0 %1563 }
 0x8fb   : > { %v6621_v55 = vadd.f32 %v6620_v41, %v6619_v12  ;;  %v1785_v34 = vadd.f32 %v14157_v62, %v1564_v61  ;;  %v9722_v41 = vld [vmem:[%s14042_s13 + $0x278] sm:$0xff]  ;;  %v9725_v61 = vld [vmem:[%s14042_s13 + $0x290] sm:$0xff]  ;;  %v9732_v62 = vld [vmem:[%s14042_s13 + $0x2c8] sm:$0xff] }
 0x8fd   : > { %v6622_v6 = vrot.slane %v6621_v55, 2 }
 0x8ff   : > { %v6623_v29 = vadd.f32 %v6622_v6, %v6621_v55  ;;  %v9727_v55 = vld [vmem:[%s14042_s13 + $0x2a0] sm:$0xff]  ;;  %v9728_v6 = vld [vmem:[%s14042_s13 + $0x2a8] sm:$0xff] }
 0x901   : > { %v6624_v31 = vrot.slane %v6623_v29, 1 }
 0x903   : > { %v6625_v51 = vadd.f32 %v6624_v31, %v6623_v29  ;;  %v9729_v29 = vld [vmem:[%s14042_s13 + $0x2b0] sm:$0xff]  ;;  %v9730_v31 = vld [vmem:[%s14042_s13 + $0x2b8] sm:$0xff] }
 0x905   : > { %v6626_v39 = vmul.f32 0.03125, %v6625_v51  ;;  %v9735_v51 = vld [vmem:[%s14042_s13 + $0x2e0] sm:$0xff] }
 0x907   : > { %v6627_v23 = vadd.f32 1e-06, %v6626_v39  ;;  %v9736_v39 = vld [vmem:[%s14042_s13 + $0x2e8] sm:$0xff] }
 0x909   : > { %11328 = vrsqrt.f32 %v6627_v23  ;;  %v9737_v23 = vld [vmem:[%s14042_s13 + $0x2f0] sm:$0xff] }
 0x913   : > { %v11329_v49 = vpop.eup %11328 }
 0x914   : > { %v6629_v35 = vmul.f32 %v11329_v49, %v6605_v58  ;;  %v6630_v42 = vmul.f32 %v11329_v49, %v6606_v60  ;;  %v6631_v40 = vmul.f32 %v11329_v49, %v6607_v28  ;;  %v6632_v30 = vmul.f32 %v11329_v49, %v6608_v54  ;;  %v9709_v28 = vld [vmem:[%s14042_s13 + $0x210] sm:$0xff]  ;;  %v14158_v54 = vld [vmem:[#allocation23_spill] sm:$0xff]  ;;  %v9710_v60 = vld [vmem:[%s14042_s13 + $0x218] sm:$0xff] }
 0x915   : > { %v9738_v49 = vld [vmem:[%s14042_s13 + $0x2f8] sm:$0xff] }
 0x916   : > { %v6649_v36 = vmul.f32 %v6635_v46, %v6629_v35  ;;  %v6650_v33 = vmul.f32 %v14151_v15, %v6630_v42  ;;  %v6651_v38 = vmul.f32 %v13242_v14, %v6631_v40  ;;  %v6652_v16 = vmul.f32 %v13254_v18, %v6632_v30  ;;  %v1554_v18 = vpop.permute.xlu1 %1553  ;;  %v1584_v46 = vpop.permute.xlu0 %1583 }
 0x917   : > { %v1947_v58 = vadd.f32 %v14158_v54, %v1584_v46 }
 0x918   : > { %v13390_v48 = vadd.f32 %v13238_v45, %v6649_v36  ;;  %v13392_v50 = vadd.f32 %v6659_v47, %v6650_v33  ;;  %v13394_v22 = vadd.f32 %v6663_v8, %v6651_v38  ;;  %v13397_v52 = vadd.f32 %v13271_v59, %v6652_v16  ;;  %v14156_v45 = vld [vmem:[#allocation12_spill] sm:$0xff]  ;;  %v9692_v59 = vld [vmem:[%s14037_s8 + $0x48] sm:$0xff] }
 0x919   : > { %v1704_v0 = vadd.f32 %v14156_v45, %v1554_v18  ;;  %v9713_v47 = vld [vmem:[%s14042_s13 + $0x230] sm:$0xff]  ;;  %v14160_v8 = vld [vmem:[#allocation27_spill] sm:$0xff]  ;;  %v14161_v18 = vld [vmem:[#allocation13_spill] sm:$0xff] }
 0x91a   : > { %14152 = vst [vmem:[#allocation20_spill] sm:$0xff] %v13390_v48  ;;  %14153 = vst [vmem:[#allocation22_spill] sm:$0xff] %v13392_v50  ;;  %v11096_v27 = vpack.c.bf16 %v13392_v50, %v13390_v48  ;;  %v11100_v14 = vpack.c.bf16 %v13397_v52, %v13394_v22  ;;  %v1604_v3 = vpop.permute.xlu0 %1603  ;;  %v1574_v33 = vpop.permute.xlu1 %1573 }
 0x91b   : > { %14154 = vst [vmem:[#allocation24_spill] sm:$0xff] %v13394_v22  ;;  %14155 = vst [vmem:[#allocation26_spill] sm:$0xff] %v13397_v52  ;;  %v2109_v4 = vadd.f32 %v14159_v53, %v1604_v3  ;;  %v1866_v45 = vadd.f32 %v14161_v18, %v1574_v33 }
 0x91c   : > { %11097 = vmatprep.subr.bf16.mxu0 %v11096_v27 }
 0x91d   : > { %11099 = vmatpush3.bf16.msra.mxu0 %v11096_v27 }
 0x91e   : > { %11101 = vmatprep.subr.bf16.mxu0 %v11100_v14  ;;  %v1624_v26 = vpop.permute.xlu0 %1623 }
 0x91f   : > { %v2271_v12 = vadd.f32 %v14160_v8, %v1624_v26 }
 0x921   : > { %11103 = vmatpush3.bf16.msra.mxu0 %v11100_v14 }
 0x922   : > { %10779 = vmatprep.subr.msk.mxu0 %vm2741_vm4, %v1704_v0 }
 0x924   : > { %10754 = vmatmul.mubr.msk.f32.vlgmr.msra.gmra.mrb[100].mxu0 %vm1424_vm2, %v9692_v59  ;;  %v9726_v59 = vld [vmem:[%s14042_s13 + $0x298] sm:$0xff] }
 0x925   : > { %10780 = vmatpush3.msk.msra.mxu0 %vm2741_vm4, %v1704_v0  ;;  %10756 = vmatprep.mubr.msk.f32.mxu0 %vm1424_vm2, %v9693_v7  ;;  %v1594_v0 = vpop.permute.xlu1 %1593  ;;  %v9731_v7 = vld [vmem:[%s14042_s13 + $0x2c0] sm:$0xff] }
 0x926   : > { %10787 = vmatprep.subr.msk.mxu0 %vm2741_vm4, %v1785_v34 }
 0x928   : > { %10757 = vmatmul.mubr.msk.f32.gmra.mrb[102].mxu0 %vm1424_vm2, %v9694_v32  ;;  %v9734_v32 = vld [vmem:[%s14042_s13 + $0x2d8] sm:$0xff] }
 0x929   : > { %10781 = vmatprep.mubr.msk.f32.mxu0 %vm2728_vm5, %v9707_v19 }
 0x92c   : > { %10782 = vmatmul.mubr.msk.f32.vlgmr.msra.gmra.mrb[104].mxu0 %vm2728_vm5, %v9708_v24 }
 0x92d   : > { %10788 = vmatpush3.msk.msra.mxu0 %vm2741_vm4, %v1785_v34  ;;  %10784 = vmatprep.mubr.msk.f32.mxu0 %vm2728_vm5, %v9709_v28  ;;  %v9733_v34 = vld [vmem:[%s14042_s13 + $0x2d0] sm:$0xff] }
 0x92e   : > { %10803 = vmatprep.subr.msk.mxu0 %vm2741_vm4, %v1947_v58 }
 0x930   : > { %10785 = vmatmul.mubr.msk.f32.gmra.mrb[106].mxu0 %vm2728_vm5, %v9710_v60 }
 0x931   : > { %10789 = vmatprep.mubr.msk.f32.mxu0 %vm2728_vm5, %v9711_v44 }
 0x934   : > { %10790 = vmatmul.mubr.msk.f32.vlgmr.msra.gmra.mrb[108].mxu0 %vm2728_vm5, %v9712_v11 }
 0x935   : > { %10804 = vmatpush3.msk.msra.mxu0 %vm2741_vm4, %v1947_v58  ;;  %10792 = vmatprep.mubr.msk.f32.mxu0 %vm2728_vm5, %v9713_v47 }
 0x936   : > { %10819 = vmatprep.subr.msk.mxu0 %vm2741_vm4, %v2109_v4 }
 0x938   : > { %10793 = vmatmul.mubr.msk.f32.gmra.mrb[110].mxu0 %vm2728_vm5, %v9714_v9 }
 0x939   : > { %10805 = vmatprep.mubr.msk.f32.mxu0 %vm2728_vm5, %v9719_v63 }
 0x93c   : > { %10806 = vmatmul.mubr.msk.f32.vlgmr.msra.gmra.mrb[112].mxu0 %vm2728_vm5, %v9720_v2 }
 0x93d   : > { %10820 = vmatpush3.msk.msra.mxu0 %vm2741_vm4, %v2109_v4  ;;  %10808 = vmatprep.mubr.msk.f32.mxu0 %vm2728_vm5, %v9721_v25 }
 0x93e   : > { %10835 = vmatprep.subr.msk.mxu0 %vm2741_vm4, %v2271_v12 }
 0x940   : > { %10809 = vmatmul.mubr.msk.f32.gmra.mrb[114].mxu0 %vm2728_vm5, %v9722_v41 }
 0x941   : > { %10821 = vmatprep.mubr.msk.f32.mxu0 %vm2728_vm5, %v9727_v55  ;;  %v14164_v55 = vld [vmem:[#allocation32_spill] sm:$0xff] }
 0x944   : > { %10822 = vmatmul.mubr.msk.f32.vlgmr.msra.gmra.mrb[116].mxu0 %vm2728_vm5, %v9728_v6 }
 0x945   : > { %10836 = vmatpush3.msk.msra.mxu0 %vm2741_vm4, %v2271_v12  ;;  %10824 = vmatprep.mubr.msk.f32.mxu0 %vm2728_vm5, %v9729_v29 }
 0x948   : > { %10825 = vmatmul.mubr.msk.f32.gmra.mrb[118].mxu0 %vm2728_vm5, %v9730_v31 }
 0x949   : > { %10837 = vmatprep.mubr.msk.f32.mxu0 %vm2728_vm5, %v9735_v51 }
 0x94c   : > { %10838 = vmatmul.mubr.msk.f32.vlgmr.msra.gmra.mrb[120].mxu0 %vm2728_vm5, %v9736_v39 }
 0x94d   : > { %10840 = vmatprep.mubr.msk.f32.mxu0 %vm2728_vm5, %v9737_v23 }
 0x950   : > { %10841 = vmatmul.mubr.msk.f32.gmra.mrb[122].mxu0 %vm2728_vm5, %v9738_v49 }
 0x9f7   : > { %v10755_v35 = vpop.f32.mrb[100].mxu0 }
 0x9f8   : > { %v6787_v42 = vadd.f32 %v10755_v35, %v13286_v56  ;;  %v6781_v40 = vpop.f32.mrb[101].mxu0  ;;  %v14162_v56 = vld [vmem:[#allocation14_spill] sm:$0xff] }
 0x9f9   : > { %v6782_v30 = vadd.f32 %v6781_v40, %v13370_v17  ;;  %v2028_v17 = vadd.f32 %v14162_v56, %v1594_v0 }
 0x9fb   : > { %v11104_v36 = vpack.c.bf16 %v6787_v42, %v6782_v30  ;;  %v10758_v15 = vpop.f32.mrb[102].mxu0 }
 0x9fc   : > { %v6797_v38 = vadd.f32 %v10758_v15, %v13372_v10  ;;  %v6791_v16 = vpop.f32.mrb[103].mxu0  ;;  %v1614_v10 = vpop.permute.xlu1 %1613 }
 0x9fd   : > { %v6792_v27 = vadd.f32 %v6791_v16, %v13302_v43  ;;  %11105 = vmatprep.subr.bf16.mxu1 %v11104_v36  ;;  %v9715_v43 = vld [vmem:[%s14042_s13 + $0x240] sm:$0xff] }
 0x9fe   : > { %11107 = vmatpush3.bf16.msra.mxu1 %v11104_v36 }
 0x9ff   : > { %v11108_v14 = vpack.c.bf16 %v6797_v38, %v6792_v27  ;;  %v13587_v19 = vpop.f32.mrb[104].mxu0 }
 0xa00   : > { %v7211_v46 = vpop.f32.mrb[105].mxu0 }
 0xa01   : > { %11109 = vmatprep.subr.bf16.mxu1 %v11108_v14 }
 0xa02   : > { %11111 = vmatpush3.bf16.msra.mxu1 %v11108_v14 }
 0xa03   : > { %10795 = vmatprep.subr.msk.mxu1 %vm2741_vm4, %v1866_v45  ;;  %v13589_v24 = vpop.f32.mrb[106].mxu0 }
 0xa04   : > { %v13592_v28 = vpop.f32.mrb[107].mxu0 }
 0xa05   : > { %10768 = vmatmul.mubr.msk.f32.vlgmr.msra.gmra.mrb[90].mxu1 %vm1424_vm2, %v13374_v20  ;;  %v9716_v20 = vld [vmem:[%s14042_s13 + $0x248] sm:$0xff] }
 0xa06   : > { %10770 = vmatprep.mubr.msk.f32.mxu1 %vm1424_vm2, %v13376_v5  ;;  %10796 = vmatpush3.msk.msra.mxu1 %vm2741_vm4, %v1866_v45  ;;  %v9717_v5 = vld [vmem:[%s14042_s13 + $0x250] sm:$0xff] }
 0xa07   : > { %10811 = vmatprep.subr.msk.mxu1 %vm2741_vm4, %v2028_v17  ;;  %v13594_v54 = vpop.f32.mrb[108].mxu0 }
 0xa08   : > { %v7311_v58 = vpop.f32.mrb[109].mxu0 }
 0xa09   : > { %10771 = vmatmul.mubr.msk.f32.gmra.mrb[92].mxu1 %vm1424_vm2, %v13378_v13  ;;  %v14163_v13 = vld [vmem:[#allocation15_spill] sm:$0xff]  ;;  %10853 = vmatprep.mubr.msk.f32.mxu0 %vm3530_vm6, %v7311_v58 }
 0xa0a   : > { %10773 = vmatprep.mubr.msk.f32.mxu1 %vm1424_vm2, %v13380_v37  ;;  %v2190_v37 = vadd.f32 %v14163_v13, %v1614_v10 }
 0xa0b   : > { %v13597_v60 = vpop.f32.mrb[110].mxu0 }
 0xa0c   : > { %v13599_v44 = vpop.f32.mrb[111].mxu0 }
 0xa0d   : > { %10774 = vmatmul.mubr.msk.f32.gmra.mrb[94].mxu1 %vm1424_vm2, %v13382_v1  ;;  %v9718_v1 = vld [vmem:[%s14042_s13 + $0x258] sm:$0xff] }
 0xa0e   : > { %10776 = vmatprep.mubr.msk.f32.mxu1 %vm1424_vm2, %v13387_v21  ;;  %v9723_v21 = vld [vmem:[%s14042_s13 + $0x280] sm:$0xff] }
 0xa0f   : > { %v13601_v3 = vpop.f32.mrb[112].mxu0 }
 0xa10   : > { %v13603_v11 = vpop.f32.mrb[113].mxu0 }
 0xa11   : > { %10777 = vmatmul.mubr.msk.f32.gmra.mrb[96].mxu1 %vm1424_vm2, %v13401_v57  ;;  %v9724_v57 = vld [vmem:[%s14042_s13 + $0x288] sm:$0xff] }
 0xa12   : > { %10797 = vmatprep.mubr.msk.f32.mxu1 %vm2728_vm5, %v9715_v43 }
 0xa13   : > { %v13605_v47 = vpop.f32.mrb[114].mxu0 }
 0xa14   : > { %v13607_v53 = vpop.f32.mrb[115].mxu0 }
 0xa15   : > { %10798 = vmatmul.mubr.msk.f32.vlgmr.msra.gmra.mrb[98].mxu1 %vm2728_vm5, %v9716_v20 }
 0xa16   : > { %10812 = vmatpush3.msk.msra.mxu1 %vm2741_vm4, %v2028_v17  ;;  %10800 = vmatprep.mubr.msk.f32.mxu1 %vm2728_vm5, %v9717_v5 }
 0xa17   : > { %10827 = vmatprep.subr.msk.mxu1 %vm2741_vm4, %v2190_v37  ;;  %v13609_v4 = vpop.f32.mrb[116].mxu0 }
 0xa18   : > { %v13611_v9 = vpop.f32.mrb[117].mxu0 }
 0xa19   : > { %10801 = vmatmul.mubr.msk.f32.gmra.mrb[100].mxu1 %vm2728_vm5, %v9718_v1 }
 0xa1a   : > { %10813 = vmatprep.mubr.msk.f32.mxu1 %vm2728_vm5, %v9723_v21 }
 0xa1b   : > { %v13613_v63 = vpop.f32.mrb[118].mxu0 }
 0xa1c   : > { %v13615_v26 = vpop.f32.mrb[119].mxu0 }
 0xa1d   : > { %10814 = vmatmul.mubr.msk.f32.vlgmr.msra.gmra.mrb[102].mxu1 %vm2728_vm5, %v9724_v57 }
 0xa1e   : > { %10828 = vmatpush3.msk.msra.mxu1 %vm2741_vm4, %v2190_v37  ;;  %10816 = vmatprep.mubr.msk.f32.mxu1 %vm2728_vm5, %v9725_v61 }
 0xa1f   : > { %v13617_v2 = vpop.f32.mrb[120].mxu0 }
 0xa20   : > { %v13619_v25 = vpop.f32.mrb[121].mxu0 }
 0xa21   : > { %10817 = vmatmul.mubr.msk.f32.gmra.mrb[104].mxu1 %vm2728_vm5, %v9726_v59 }
 0xa22   : > { %10829 = vmatprep.mubr.msk.f32.mxu1 %vm2728_vm5, %v9731_v7 }
 0xa23   : > { %v13621_v8 = vpop.f32.mrb[122].mxu0 }
 0xa24   : > { %v13623_v12 = vpop.f32.mrb[123].mxu0 }
 0xa25   : > { %10830 = vmatmul.mubr.msk.f32.vlgmr.msra.gmra.mrb[106].mxu1 %vm2728_vm5, %v9732_v62 }
 0xa26   : > { %10832 = vmatprep.mubr.msk.f32.mxu1 %vm2728_vm5, %v9733_v34 }
 0xa29   : > { %10833 = vmatmul.mubr.msk.f32.gmra.mrb[108].mxu1 %vm2728_vm5, %v9734_v32 }
 0xa2a   : > { %10845 = vmatprep.mubr.msk.f32.mxu1 %vm3530_vm6, %v7211_v46 }
 0xad8   : > { %v10769_v41 = vpop.f32.mrb[90].mxu1 }
 0xad9   : > { %v6938_v6 = vsub.f32 %v10769_v41, %v14164_v55  ;;  %v6898_v29 = vpop.f32.mrb[91].mxu1 }
 0xada   : > { %v6937_v31 = vsub.f32 %v6898_v29, %v14164_v55 }
 0xadb   : > { %v6952_v51 = vsel %vm697_vm0, %v6938_v6, -inf }
 0xadc   : > { %v6953_v39 = vrot.slane %v6952_v51, 4  ;;  %v6945_v23 = vsel %vm697_vm0, %v6937_v31, -inf  ;;  %v10772_v49 = vpop.f32.mrb[92].mxu1 }
 0xadd   : > { %v6946_v35 = vrot.slane %v6945_v23, 4  ;;  %v13630_v42 = vsub.f32 %v10772_v49, %v14164_v55  ;;  %v6908_v40 = vpop.f32.mrb[93].mxu1 }
 0xade   : > { %v6954_v30 = vmax.f32 %v6952_v51, %v6953_v39  ;;  %v13633_v36 = vsub.f32 %v6908_v40, %v14164_v55 }
 0xadf   : > { %v6947_v15 = vmax.f32 %v6945_v23, %v6946_v35  ;;  %v6966_v33 = vsel %vm697_vm0, %v13630_v42, -inf }
 0xae0   : > { %v6955_v38 = vrot.slane %v6954_v30, 2  ;;  %v6967_v16 = vrot.slane %v6966_v33, 4  ;;  %v6959_v27 = vsel %vm697_vm0, %v13633_v36, -inf  ;;  %v10775_v14 = vpop.f32.mrb[94].mxu1 }
 0xae1   : > { %v6948_v18 = vrot.slane %v6947_v15, 2  ;;  %v6960_v45 = vrot.slane %v6959_v27, 4  ;;  %v13640_v0 = vsub.f32 %v10775_v14, %v14164_v55  ;;  %v6918_v56 = vpop.f32.mrb[95].mxu1 }
 0xae2   : > { %v6956_v17 = vmax.f32 %v6954_v30, %v6955_v38  ;;  %v6968_v43 = vmax.f32 %v6966_v33, %v6967_v16  ;;  %v13643_v10 = vsub.f32 %v6918_v56, %v14164_v55 }
 0xae3   : > { %v6949_v20 = vmax.f32 %v6947_v15, %v6948_v18  ;;  %v6961_v5 = vmax.f32 %v6959_v27, %v6960_v45  ;;  %v6980_v13 = vsel %vm697_vm0, %v13640_v0, -inf }
 0xae4   : > { %v6957_v37 = vrot.slane %v6956_v17, 1  ;;  %v6969_v1 = vrot.slane %v6968_v43, 2  ;;  %v6981_v21 = vrot.slane %v6980_v13, 4  ;;  %v6973_v57 = vsel %vm697_vm0, %v13643_v10, -inf  ;;  %v10778_v61 = vpop.f32.mrb[96].mxu1 }
 0xae5   : > { %v6950_v59 = vrot.slane %v6949_v20, 1  ;;  %v6962_v7 = vrot.slane %v6961_v5, 2  ;;  %v6974_v62 = vrot.slane %v6973_v57, 4  ;;  %v13650_v34 = vsub.f32 %v10778_v61, %v14164_v55  ;;  %v6928_v32 = vpop.f32.mrb[97].mxu1 }
 0xae6   : > { %v6958_v46 = vmax.f32 %v6956_v17, %v6957_v37  ;;  %v6970_v58 = vmax.f32 %v6968_v43, %v6969_v1  ;;  %v6982_v41 = vmax.f32 %v6980_v13, %v6981_v21  ;;  %v13653_v29 = vsub.f32 %v6928_v32, %v14164_v55 }
 0xae7   : > { %v6951_v51 = vmax.f32 %v6949_v20, %v6950_v59  ;;  %v6963_v39 = vmax.f32 %v6961_v5, %v6962_v7  ;;  %v6975_v23 = vmax.f32 %v6973_v57, %v6974_v62  ;;  %v6994_v49 = vsel %vm697_vm0, %v13650_v34, -inf }
 0xae8   : > { %v7002_v35 = vsub.f32 %v6938_v6, %v6958_v46  ;;  %v6971_v40 = vrot.slane %v6970_v58, 1  ;;  %v6983_v30 = vrot.slane %v6982_v41, 2  ;;  %v6995_v15 = vrot.slane %v6994_v49, 4  ;;  %v13657_v33 = vpop.f32.mrb[98].mxu1 }
 0xae9   : > { %v7001_v38 = vsub.f32 %v6937_v31, %v6951_v51  ;;  %v6964_v16 = vrot.slane %v6963_v39, 1  ;;  %v6976_v27 = vrot.slane %v6975_v23, 2  ;;  %v6987_v14 = vsel %vm697_vm0, %v13653_v29, -inf  ;;  %v13661_v55 = vpop.f32.mrb[99].mxu1 }
 0xaea   : > { %v7011_v18 = vmul.f32 1.442695, %v7002_v35  ;;  %v6972_v45 = vmax.f32 %v6970_v58, %v6971_v40  ;;  %v6984_v56 = vmax.f32 %v6982_v41, %v6983_v30  ;;  %v6996_v17 = vmax.f32 %v6994_v49, %v6995_v15 }
 0xaeb   : > { %v7009_v43 = vmul.f32 1.442695, %v7001_v38  ;;  %v6965_v20 = vmax.f32 %v6963_v39, %v6964_v16  ;;  %v6977_v6 = vmax.f32 %v6975_v23, %v6976_v27  ;;  %v6988_v5 = vrot.slane %v6987_v14, 4 }
 0xaec   : > { %11330 = vpow2.f32 %v7011_v18  ;;  %v7004_v13 = vsub.f32 %v13630_v42, %v6972_v45  ;;  %v6985_v37 = vrot.slane %v6984_v56, 1  ;;  %v6997_v31 = vrot.slane %v6996_v17, 2  ;;  %v13664_v1 = vpop.f32.mrb[100].mxu1 }
 0xaed   : > { %11332 = vpow2.f32 %v7009_v43  ;;  %v7003_v21 = vsub.f32 %v13633_v36, %v6965_v20  ;;  %v6978_v57 = vrot.slane %v6977_v6, 1  ;;  %v6989_v61 = vmax.f32 %v6987_v14, %v6988_v5  ;;  %v13667_v59 = vpop.f32.mrb[101].mxu1 }
 0xaee   : > { %v7015_v7 = vmul.f32 1.442695, %v7004_v13  ;;  %v6986_v62 = vmax.f32 %v6984_v56, %v6985_v37  ;;  %v6998_v32 = vmax.f32 %v6996_v17, %v6997_v31 }
 0xaef   : > { %v7013_v46 = vmul.f32 1.442695, %v7003_v21  ;;  %v6979_v58 = vmax.f32 %v6977_v6, %v6978_v57  ;;  %v6990_v41 = vrot.slane %v6989_v61, 2 }
 0xaf0   : > { %11334 = vpow2.f32 %v7015_v7  ;;  %v7006_v42 = vsub.f32 %v13640_v0, %v6986_v62  ;;  %v6999_v51 = vrot.slane %v6998_v32, 1  ;;  %v13670_v39 = vpop.f32.mrb[102].mxu1 }
 0xaf1   : > { %11336 = vpow2.f32 %v7013_v46  ;;  %v7005_v23 = vsub.f32 %v13643_v10, %v6979_v58  ;;  %v6991_v36 = vmax.f32 %v6989_v61, %v6990_v41  ;;  %v13673_v49 = vpop.f32.mrb[103].mxu1 }
 0xaf2   : > { %v7019_v35 = vmul.f32 1.442695, %v7006_v42  ;;  %v7000_v40 = vmax.f32 %v6998_v32, %v6999_v51 }
 0xaf3   : > { %v7017_v30 = vmul.f32 1.442695, %v7005_v23  ;;  %v6992_v15 = vrot.slane %v6991_v36, 1 }
 0xaf4   : > { %11338 = vpow2.f32 %v7019_v35  ;;  %v7008_v38 = vsub.f32 %v13650_v34, %v7000_v40  ;;  %v13676_v16 = vpop.f32.mrb[104].mxu1 }
 0xaf5   : > { %11340 = vpow2.f32 %v7017_v30  ;;  %v6993_v0 = vmax.f32 %v6991_v36, %v6992_v15  ;;  %v13678_v27 = vpop.f32.mrb[105].mxu1 }
 0xaf6   : > { %v13680_v14 = vpop.eup %11330  ;;  %v7023_v18 = vmul.f32 1.442695, %v7008_v38 }
 0xaf7   : > { %v13682_v10 = vpop.eup %11332  ;;  %v7032_v45 = vsel %vm697_vm0, %v13680_v14, 0.0  ;;  %v7007_v56 = vsub.f32 %v13653_v29, %v6993_v0 }
 0xaf8   : > { %v7033_v17 = vrot.slane %v7032_v45, 4  ;;  %v7025_v34 = vsel %vm697_vm0, %v13682_v10, 0.0  ;;  %11342 = vpow2.f32 %v7023_v18  ;;  %v13689_v43 = vpop.f32.mrb[106].mxu1 }
 0xaf9   : > { %v7026_v20 = vrot.slane %v7025_v34, 4  ;;  %v7021_v6 = vmul.f32 1.442695, %v7007_v56  ;;  %v13691_v5 = vpop.f32.mrb[107].mxu1 }
 0xafa   : > { %v13693_v13 = vpop.eup %11334  ;;  %v7034_v37 = vadd.f32 %v7033_v17, %v7032_v45 }
 0xafb   : > { %v13695_v31 = vpop.eup %11336  ;;  %v7027_v21 = vadd.f32 %v7026_v20, %v7025_v34  ;;  %v7046_v29 = vsel %vm697_vm0, %v13693_v13, 0.0  ;;  %11344 = vpow2.f32 %v7021_v6 }
 0xafc   : > { %v7035_v57 = vrot.slane %v7034_v37, 2  ;;  %v7047_v61 = vrot.slane %v7046_v29, 4  ;;  %v7039_v7 = vsel %vm697_vm0, %v13695_v31, 0.0  ;;  %v13701_v62 = vpop.f32.mrb[108].mxu1 }
 0xafd   : > { %v7028_v32 = vrot.slane %v7027_v21, 2  ;;  %v7040_v46 = vrot.slane %v7039_v7, 4  ;;  %v13703_v58 = vpop.f32.mrb[109].mxu1 }
 0xafe   : > { %v13705_v41 = vpop.eup %11338  ;;  %v7048_v42 = vadd.f32 %v7047_v61, %v7046_v29  ;;  %v7036_v51 = vadd.f32 %v7035_v57, %v7034_v37 }
 0xaff   : > { %v13707_v23 = vpop.eup %11340  ;;  %v7041_v36 = vadd.f32 %v7040_v46, %v7039_v7  ;;  %v7060_v35 = vsel %vm697_vm0, %v13705_v41, 0.0  ;;  %v7029_v40 = vadd.f32 %v7028_v32, %v7027_v21 }
 0xb00   : > { %v7049_v30 = vrot.slane %v7048_v42, 2  ;;  %v7061_v15 = vrot.slane %v7060_v35, 4  ;;  %v7053_v38 = vsel %vm697_vm0, %v13707_v23, 0.0  ;;  %v7037_v0 = vrot.slane %v7036_v51, 1 }
 0xb01   : > { %v7042_v18 = vrot.slane %v7041_v36, 2  ;;  %v7054_v45 = vrot.slane %v7053_v38, 4  ;;  %v7030_v56 = vrot.slane %v7029_v40, 1 }
 0xb02   : > { %v13713_v17 = vpop.eup %11342  ;;  %v7062_v34 = vadd.f32 %v7061_v15, %v7060_v35  ;;  %v7038_v20 = vadd.f32 %v7037_v0, %v7036_v51  ;;  %v7050_v6 = vadd.f32 %v7049_v30, %v7048_v42 }
 0xb03   : > { %v7055_v37 = vadd.f32 %v7054_v45, %v7053_v38  ;;  %v7074_v29 = vsel %vm697_vm0, %v13713_v17, 0.0  ;;  %v7031_v57 = vadd.f32 %v7030_v56, %v7029_v40  ;;  %v7043_v21 = vadd.f32 %v7042_v18, %v7041_v36 }
 0xb04   : > { %v7063_v61 = vrot.slane %v7062_v34, 2  ;;  %v7075_v7 = vrot.slane %v7074_v29, 4  ;;  %11346 = vrcp.f32 %v7038_v20  ;;  %v7051_v32 = vrot.slane %v7050_v6, 1 }
 0xb05   : > { %v13717_v46 = vpop.eup %11344  ;;  %v7056_v52 = vrot.slane %v7055_v37, 2  ;;  %11348 = vrcp.f32 %v7031_v57  ;;  %v7044_v22 = vrot.slane %v7043_v21, 1 }
 0xb06   : > { %v7076_v48 = vadd.f32 %v7075_v7, %v7074_v29  ;;  %v7067_v51 = vsel %vm697_vm0, %v13717_v46, 0.0  ;;  %v7052_v42 = vadd.f32 %v7051_v32, %v7050_v6  ;;  %v7064_v35 = vadd.f32 %v7063_v61, %v7062_v34 }
 0xb07   : > { %v7068_v30 = vrot.slane %v7067_v51, 4  ;;  %v7045_v15 = vadd.f32 %v7044_v22, %v7043_v21  ;;  %v7057_v38 = vadd.f32 %v7056_v52, %v7055_v37 }
 0xb08   : > { %v7077_v40 = vrot.slane %v7076_v48, 2  ;;  %11350 = vrcp.f32 %v7052_v42  ;;  %v7065_v36 = vrot.slane %v7064_v35, 1 }
 0xb09   : > { %v7069_v0 = vadd.f32 %v7068_v30, %v7067_v51  ;;  %11352 = vrcp.f32 %v7045_v15  ;;  %v7058_v18 = vrot.slane %v7057_v38, 1 }
 0xb0a   : > { %v7066_v45 = vadd.f32 %v7065_v36, %v7064_v35  ;;  %v7078_v56 = vadd.f32 %v7077_v40, %v7076_v48 }
 0xb0b   : > { %v7070_v20 = vrot.slane %v7069_v0, 2  ;;  %v7059_v57 = vadd.f32 %v7058_v18, %v7057_v38 }
 0xb0c   : > { %11354 = vrcp.f32 %v7066_v45  ;;  %v7079_v29 = vrot.slane %v7078_v56, 1 }
 0xb0d   : > { %11356 = vrcp.f32 %v7059_v57  ;;  %v7071_v7 = vadd.f32 %v7070_v20, %v7069_v0 }
 0xb0e   : > { %v11347_v50 = vpop.eup %11346  ;;  %v7080_v6 = vadd.f32 %v7079_v29, %v7078_v56 }
 0xb0f   : > { %v11349_v34 = vpop.eup %11348  ;;  %v7090_v22 = vmul.f32 %v11347_v50, %v13680_v14  ;;  %v7072_v52 = vrot.slane %v7071_v7, 1 }
 0xb10   : > { %v7089_v37 = vmul.f32 %v11349_v34, %v13682_v10  ;;  %11358 = vrcp.f32 %v7080_v6 }
 0xb11   : > { %10851 = vmatprep.subr.mxu0 %v7090_v22  ;;  %v7073_v21 = vadd.f32 %v7072_v52, %v7071_v7 }
 0xb12   : > { %v11351_v61 = vpop.eup %11350  ;;  %10843 = vmatprep.subr.mxu1 %v7089_v37  ;;  %10852 = vmatpush3.msra.mxu0 %v7090_v22 }
 0xb13   : > { %v11353_v48 = vpop.eup %11352  ;;  %10844 = vmatpush3.msra.mxu1 %v7089_v37  ;;  %10854 = vmatmul.mubr.msk.f32.vlgmr.msra.gmra.mrb[124].mxu0 %vm3530_vm6, %v13594_v54  ;;  %v7092_v32 = vmul.f32 %v11351_v61, %v13693_v13  ;;  %11360 = vrcp.f32 %v7073_v21 }
 0xb14   : > { %10846 = vmatmul.mubr.msk.f32.vlgmr.msra.gmra.mrb[110].mxu1 %vm3530_vm6, %v13587_v19  ;;  %10856 = vmatprep.mubr.msk.f32.mxu0 %vm3530_vm6, %v13599_v44  ;;  %v7091_v50 = vmul.f32 %v11353_v48, %v13695_v31 }
 0xb15   : > { %10867 = vmatprep.subr.mxu0 %v7092_v32  ;;  %10848 = vmatprep.mubr.msk.f32.mxu1 %vm3530_vm6, %v13592_v28 }
 0xb16   : > { %v11355_v14 = vpop.eup %11354  ;;  %10859 = vmatprep.subr.mxu1 %v7091_v50  ;;  %10868 = vmatpush3.msra.mxu0 %v7092_v32 }
 0xb17   : > { %v11357_v10 = vpop.eup %11356  ;;  %10857 = vmatmul.mubr.msk.f32.gmra.mrb[126].mxu0 %vm3530_vm6, %v13597_v60  ;;  %10860 = vmatpush3.msra.mxu1 %v7091_v50  ;;  %v7094_v54 = vmul.f32 %v11355_v14, %v13705_v41 }
 0xb18   : > { %10849 = vmatmul.mubr.msk.f32.gmra.mrb[112].mxu1 %vm3530_vm6, %v13589_v24  ;;  %10869 = vmatprep.mubr.msk.f32.mxu0 %vm3530_vm6, %v13603_v11  ;;  %v7093_v19 = vmul.f32 %v11357_v10, %v13707_v23  ;;  %v14166_v11 = vmov 0.0  }
 0xb19   : > { %10883 = vmatprep.subr.mxu0 %v7094_v54  ;;  %10861 = vmatprep.mubr.msk.f32.mxu1 %vm3530_vm6, %v13661_v55  ;;  %v8883_v55 = vld [vmem:[%s14046_s17 + $0x58] sm:$0xff] }
 0xb1a   : > { %v11359_v28 = vpop.eup %11358  ;;  %10875 = vmatprep.subr.mxu1 %v7093_v19 }
 0xb1b   : > { %10870 = vmatmul.mubr.msk.f32.vlgmr.msra.gmra.mrb[128].mxu0 %vm3530_vm6, %v13601_v3  ;;  %v7096_v60 = vmul.f32 %v11359_v28, %v13713_v17  ;;  %v14165_v3 = vmov 0.0|0.0  }
 0xb1c   : > { %10884 = vmatpush3.msra.mxu0 %v7094_v54  ;;  %10862 = vmatmul.mubr.msk.f32.vlgmr.msra.gmra.mrb[114].mxu1 %vm3530_vm6, %v13657_v33  ;;  %v8882_v33 = vld [vmem:[%s14046_s17 + $0x50] sm:$0xff] }
 0xb1d   : > { %v11361_v24 = vpop.eup %11360  ;;  %10876 = vmatpush3.msra.mxu1 %v7093_v19  ;;  %10899 = vmatprep.subr.mxu0 %v7096_v60 }
 0xb1e   : > { %10872 = vmatprep.mubr.msk.f32.mxu0 %vm3530_vm6, %v13607_v53  ;;  %v7095_v44 = vmul.f32 %v11361_v24, %v13717_v46  ;;  %10864 = vmatprep.mubr.msk.f32.mxu1 %vm3530_vm6, %v13667_v59  ;;  %v8872_v53 = vld [vmem:[%s14046_s17] sm:$0xff]  ;;  %v8885_v59 = vld [vmem:[%s14046_s17 + $0x68] sm:$0xff] }
 0xb1f   : > { %10873 = vmatmul.mubr.msk.f32.gmra.mrb[130].mxu0 %vm3530_vm6, %v13605_v47  ;;  %v8873_v47 = vld [vmem:[%s14046_s17 + $0x8] sm:$0xff]  ;;  %8933 = vperm.xlu0 %11226, %v8872_v53  }
 0xb20   : > { %10891 = vmatprep.subr.mxu1 %v7095_v44  ;;  %10865 = vmatmul.mubr.msk.f32.gmra.mrb[116].mxu1 %vm3530_vm6, %v13664_v1  ;;  %v8884_v1 = vld [vmem:[%s14046_s17 + $0x60] sm:$0xff] }
 0xb21   : > { %10885 = vmatprep.mubr.msk.f32.mxu0 %vm3530_vm6, %v13611_v9  ;;  %10877 = vmatprep.mubr.msk.f32.mxu1 %vm3530_vm6, %v13673_v49  ;;  %v8877_v9 = vld [vmem:[%s14046_s17 + $0x28] sm:$0xff]  ;;  %v8887_v49 = vld [vmem:[%s14046_s17 + $0x78] sm:$0xff] }
 0xb22   : > { %8938 = vperm.xlu1 %11227, %v8873_v47  }
 0xb23   : > { %10886 = vmatmul.mubr.msk.f32.vlgmr.msra.gmra.mrb[132].mxu0 %vm3530_vm6, %v13609_v4  ;;  %v8876_v4 = vld [vmem:[%s14046_s17 + $0x20] sm:$0xff]  ;;  %8962 = vperm.xlu0 %11226, %v8877_v9  }
 0xb24   : > { %10900 = vmatpush3.msra.mxu0 %v7096_v60  ;;  %10878 = vmatmul.mubr.msk.f32.vlgmr.msra.gmra.mrb[118].mxu1 %vm3530_vm6, %v13670_v39  ;;  %v8886_v39 = vld [vmem:[%s14046_s17 + $0x70] sm:$0xff] }
 0xb25   : > { %10892 = vmatpush3.msra.mxu1 %v7095_v44  ;;  %10880 = vmatprep.mubr.msk.f32.mxu1 %vm3530_vm6, %v13678_v27 }
 0xb26   : > { %10888 = vmatprep.mubr.msk.f32.mxu0 %vm3530_vm6, %v13615_v26  ;;  %11120 = vmatprep.subr.bf16.mxu0 %v14165_v3  ;;  %v8875_v26 = vld [vmem:[%s14046_s17 + $0x18] sm:$0xff] }
 0xb27   : > { %10889 = vmatmul.mubr.msk.f32.gmra.mrb[134].mxu0 %vm3530_vm6, %v13613_v63  ;;  %8957 = vperm.xlu1 %11227, %v8876_v4   ;;  %v8874_v63 = vld [vmem:[%s14046_s17 + $0x10] sm:$0xff] }
 0xb28   : > { %10881 = vmatmul.mubr.msk.f32.gmra.mrb[120].mxu1 %vm3530_vm6, %v13676_v16  ;;  %10901 = vmatprep.mubr.msk.f32.mxu0 %vm3530_vm6, %v13619_v25  ;;  %v8879_v25 = vld [vmem:[%s14046_s17 + $0x38] sm:$0xff]  ;;  %v8888_v16 = vld [vmem:[%s14046_s17 + $0x80] sm:$0xff] }
 0xb29   : > { %10893 = vmatprep.mubr.msk.f32.mxu1 %vm3530_vm6, %v13691_v5  ;;  %8948 = vperm.xlu0 %11226, %v8875_v26  }
 0xb2b   : > { %10902 = vmatmul.mubr.msk.f32.vlgmr.msra.gmra.mrb[136].mxu0 %vm3530_vm6, %v13617_v2  ;;  %8943 = vperm.xlu1 %11227, %v8874_v63   ;;  %v8878_v2 = vld [vmem:[%s14046_s17 + $0x30] sm:$0xff] }
 0xb2c   : > { %10894 = vmatmul.mubr.msk.f32.vlgmr.msra.gmra.mrb[122].mxu1 %vm3530_vm6, %v13689_v43  ;;  %10904 = vmatprep.mubr.msk.f32.mxu0 %vm3530_vm6, %v13623_v12  ;;  %v8881_v12 = vld [vmem:[%s14046_s17 + $0x48] sm:$0xff] }
 0xb2d   : > { %10896 = vmatprep.mubr.msk.f32.mxu1 %vm3530_vm6, %v13703_v58  ;;  %8972 = vperm.xlu0 %11226, %v8879_v25  }
 0xb2f   : > { %10905 = vmatmul.mubr.msk.f32.gmra.mrb[138].mxu0 %vm3530_vm6, %v13621_v8  ;;  %8967 = vperm.xlu1 %11227, %v8878_v2   ;;  %v8880_v8 = vld [vmem:[%s14046_s17 + $0x40] sm:$0xff] }
 0xb30   : > { %10897 = vmatmul.mubr.msk.f32.gmra.mrb[124].mxu1 %vm3530_vm6, %v13701_v62  ;;  %10943 = vmatprep.mubr.msk.f32.mxu0 %vm11467_vm3, %v14166_v11 }
 0xb31   : > { %8994 = vperm.xlu0 %11226, %v8881_v12  }
 0xb33   : > { %8989 = vperm.xlu1 %11227, %v8880_v8   ;;  %v8768_v8 = vpop.permute.xlu1 %8767 }
 0xb35   : > { %9004 = vperm.xlu0 %11226, %v8883_v55  }
 0xb37   : > { %8999 = vperm.xlu1 %11227, %v8882_v33  }
 0xb39   : > { %9014 = vperm.xlu0 %11226, %v8885_v59  }
 0xb3b   : > { %9009 = vperm.xlu1 %11227, %v8884_v1  }
 0xb3d   : > { %9024 = vperm.xlu0 %11226, %v8887_v49  }
 0xb3f   : > { %9019 = vperm.xlu1 %11227, %v8886_v39  }
 0xb43   : > { %9231 = vperm.xlu1 %11227, %v8888_v16  }
 0xbe6   : > { %v10855_v27 = vpop.f32.mrb[124].mxu0 }
 0xbe7   : > { %v10847_v43 = vpop.f32.mrb[110].mxu1  ;;  %v8722_v5 = vsel %vm697_vm0, %v10855_v27, 0.0  ;;  %v8105_v13 = vpop.f32.mrb[125].mxu0 }
 0xbe8   : > { %v8721_v31 = vsel %vm697_vm0, %v10847_v43, 0.0  ;;  %v8008_v62 = vpop.f32.mrb[111].mxu1  ;;  %v8707_v58 = vsel %vm697_vm0, %v8105_v13, 0.0 }
 0xbe9   : > { %v8723_v41 = vadd.f32 %v8722_v5, %v8721_v31  ;;  %v8706_v23 = vsel %vm697_vm0, %v8008_v62, 0.0 }
 0xbea   : > { %v8708_v17 = vadd.f32 %v8707_v58, %v8706_v23  ;;  %v10858_v46 = vpop.f32.mrb[126].mxu0 }
 0xbeb   : > { %v10850_v51 = vpop.f32.mrb[112].mxu1  ;;  %v8752_v42 = vsel %vm697_vm0, %v10858_v46, 0.0  ;;  %v8115_v35 = vpop.f32.mrb[127].mxu0 }
 0xbec   : > { %v8751_v30 = vsel %vm697_vm0, %v10850_v51, 0.0  ;;  %v8018_v15 = vpop.f32.mrb[113].mxu1  ;;  %v8737_v38 = vsel %vm697_vm0, %v8115_v35, 0.0  ;;  %v8776_v35 = vpop.permute.xlu1 %8775 }
 0xbed   : > { %v8753_v40 = vadd.f32 %v8752_v42, %v8751_v30  ;;  %v8736_v36 = vsel %vm697_vm0, %v8018_v15, 0.0 }
 0xbee   : > { %v8738_v0 = vadd.f32 %v8737_v38, %v8736_v36  ;;  %v10871_v18 = vpop.f32.mrb[128].mxu0  ;;  %v8772_v38 = vpop.permute.xlu0 %8771 }
 0xbef   : > { %v10863_v45 = vpop.f32.mrb[114].mxu1  ;;  %v8299_v56 = vpop.f32.mrb[129].mxu0  ;;  %v8726_v34 = vsel %vm697_vm0, %v10871_v18, 0.0 }
 0xbf0   : > { %v8724_v20 = vsel %vm697_vm0, %v10863_v45, 0.0  ;;  %v8202_v57 = vpop.f32.mrb[115].mxu1  ;;  %v8711_v37 = vsel %vm697_vm0, %v8299_v56, 0.0 }
 0xbf1   : > { %v8725_v29 = vadd.f32 %v8724_v20, %v8723_v41  ;;  %v8709_v7 = vsel %vm697_vm0, %v8202_v57, 0.0 }
 0xbf2   : > { %v8710_v6 = vadd.f32 %v8709_v7, %v8708_v17  ;;  %v10874_v22 = vpop.f32.mrb[130].mxu0 }
 0xbf3   : > { %v8727_v52 = vadd.f32 %v8726_v34, %v8725_v29  ;;  %v10866_v21 = vpop.f32.mrb[116].mxu1  ;;  %v8309_v61 = vpop.f32.mrb[131].mxu0  ;;  %v8756_v19 = vsel %vm697_vm0, %v10874_v22, 0.0 }
 0xbf4   : > { %v8712_v48 = vadd.f32 %v8711_v37, %v8710_v6  ;;  %v8754_v32 = vsel %vm697_vm0, %v10866_v21, 0.0  ;;  %v8212_v50 = vpop.f32.mrb[117].mxu1  ;;  %v8741_v24 = vsel %vm697_vm0, %v8309_v61, 0.0  ;;  %v14167_v37 = vld [vmem:[#allocation22_spill] sm:$0xff] }
 0xbf5   : > { %v8755_v14 = vadd.f32 %v8754_v32, %v8753_v40  ;;  %v8739_v10 = vsel %vm697_vm0, %v8212_v50, 0.0  ;;  %v14168_v32 = vld [vmem:[#allocation20_spill] sm:$0xff] }
 0xbf6   : > { %v8740_v54 = vadd.f32 %v8739_v10, %v8738_v0  ;;  %v10887_v28 = vpop.f32.mrb[132].mxu0  ;;  %v8780_v10 = vpop.permute.xlu1 %8779 }
 0xbf7   : > { %v8757_v60 = vadd.f32 %v8756_v19, %v8755_v14  ;;  %v10879_v44 = vpop.f32.mrb[118].mxu1  ;;  %v8493_v11 = vpop.f32.mrb[133].mxu0  ;;  %v8730_v2 = vsel %vm697_vm0, %v10887_v28, 0.0 }
 0xbf8   : > { %v8742_v47 = vadd.f32 %v8741_v24, %v8740_v54  ;;  %v8728_v53 = vsel %vm697_vm0, %v10879_v44, 0.0  ;;  %v8396_v4 = vpop.f32.mrb[119].mxu1  ;;  %v8715_v33 = vsel %vm697_vm0, %v8493_v11, 0.0  ;;  %v14169_v44 = vld [vmem:[#allocation24_spill] sm:$0xff] }
 0xbf9   : > { %v8729_v9 = vadd.f32 %v8728_v53, %v8727_v52  ;;  %v8713_v63 = vsel %vm697_vm0, %v8396_v4, 0.0 }
 0xbfa   : > { %v8714_v26 = vadd.f32 %v8713_v63, %v8712_v48  ;;  %v10890_v25 = vpop.f32.mrb[134].mxu0 }
 0xbfb   : > { %v8731_v12 = vadd.f32 %v8730_v2, %v8729_v9  ;;  %v10882_v55 = vpop.f32.mrb[120].mxu1  ;;  %v8503_v1 = vpop.f32.mrb[135].mxu0  ;;  %v8760_v5 = vsel %vm697_vm0, %v10890_v25, 0.0 }
 0xbfc   : > { %v8716_v59 = vadd.f32 %v8715_v33, %v8714_v26  ;;  %v8758_v39 = vsel %vm697_vm0, %v10882_v55, 0.0  ;;  %v8406_v49 = vpop.f32.mrb[121].mxu1  ;;  %v8745_v62 = vsel %vm697_vm0, %v8503_v1, 0.0 }
 0xbfd   : > { %v8759_v16 = vadd.f32 %v8758_v39, %v8757_v60  ;;  %v8743_v27 = vsel %vm697_vm0, %v8406_v49, 0.0 }
 0xbfe   : > { %v8744_v43 = vadd.f32 %v8743_v27, %v8742_v47  ;;  %v10903_v13 = vpop.f32.mrb[136].mxu0  ;;  %v14170_v47 = vld [vmem:[#allocation26_spill] sm:$0xff] }
 0xbff   : > { %v8761_v31 = vadd.f32 %v8760_v5, %v8759_v16  ;;  %v10895_v58 = vpop.f32.mrb[122].mxu1  ;;  %v8687_v41 = vpop.f32.mrb[137].mxu0  ;;  %v8734_v15 = vsel %vm697_vm0, %v10903_v13, 0.0 }
 0xc00   : > { %v8746_v23 = vadd.f32 %v8745_v62, %v8744_v43  ;;  %v8732_v17 = vsel %vm697_vm0, %v10895_v58, 0.0  ;;  %v8590_v46 = vpop.f32.mrb[123].mxu1  ;;  %v8719_v0 = vsel %vm697_vm0, %v8687_v41, 0.0 }
 0xc01   : > { %v8733_v51 = vadd.f32 %v8732_v17, %v8731_v12  ;;  %v8717_v42 = vsel %vm697_vm0, %v8590_v46, 0.0 }
 0xc02   : > { %v8718_v30 = vadd.f32 %v8717_v42, %v8716_v59  ;;  %v10906_v40 = vpop.f32.mrb[138].mxu0 }
 0xc03   : > { %v8735_v36 = vadd.f32 %v8734_v15, %v8733_v51  ;;  %v10898_v18 = vpop.f32.mrb[124].mxu1  ;;  %v8697_v45 = vpop.f32.mrb[139].mxu0  ;;  %v8764_v52 = vsel %vm697_vm0, %v10906_v40, 0.0 }
 0xc04   : > { %v8720_v56 = vadd.f32 %v8719_v0, %v8718_v30  ;;  %v8762_v20 = vsel %vm697_vm0, %v10898_v18, 0.0  ;;  %v8600_v57 = vpop.f32.mrb[125].mxu1  ;;  %v8749_v48 = vsel %vm697_vm0, %v8697_v45, 0.0 }
 0xc05   : > { %v8763_v29 = vadd.f32 %v8762_v20, %v8761_v31  ;;  %v8783_v7 = vadd.f32 %v8772_v38, %v8735_v36  ;;  %v8747_v6 = vsel %vm697_vm0, %v8600_v57, 0.0  ;;  %v8838_v38 = vpop.permute.xlu1 %8837 }
 0xc06   : > { %v8782_v34 = vadd.f32 %v8768_v8, %v8720_v56  ;;  %v8748_v22 = vadd.f32 %v8747_v6, %v8746_v23  ;;  %v8979_v8 = vld [vmem:[%s14044_s15] sm:$0xff]  ;;  %v8834_v56 = vpop.permute.xlu0 %8833 }
 0xc07   : > { %v8787_v21 = vadd.f32 %v8783_v7, %v14167_v37  ;;  %v8765_v61 = vadd.f32 %v8764_v52, %v8763_v29  ;;  %10915 = vmatprep.mubr.msk.f32.mxu1 %vm1424_vm2, %v8979_v8 }
 0xc08   : > { %v8786_v50 = vadd.f32 %v8782_v34, %v14168_v32  ;;  %v8750_v14 = vadd.f32 %v8749_v48, %v8748_v22 }
 0xc09   : > { %v8791_v54 = vsel %vm697_vm0, %v8787_v21, 0.0  ;;  %v8785_v19 = vadd.f32 %v8780_v10, %v8765_v61  ;;  %v8842_v45 = vpop.permute.xlu1 %8841 }
 0xc0a   : > { %v8790_v28 = vsel %vm697_vm0, %v8786_v50, 0.0  ;;  %v8784_v60 = vadd.f32 %v8776_v35, %v8750_v14  ;;  %v8854_v57 = vpop.permute.xlu0 %8853 }
 0xc0b   : > { %v8792_v24 = vadd.f32 %v8791_v54, %v8790_v28  ;;  %v8789_v53 = vadd.f32 %v8785_v19, %v14170_v47 }
 0xc0c   : > { %v8788_v11 = vadd.f32 %v8784_v60, %v14169_v44 }
 0xc0d   : > { %v8795_v63 = vsel %vm697_vm0, %v8789_v53, 0.0  ;;  %v8858_v20 = vpop.permute.xlu1 %8857 }
 0xc0e   : > { %v8793_v4 = vsel %vm697_vm0, %v8788_v11, 0.0  ;;  %v8862_v32 = vpop.permute.xlu0 %8861 }
 0xc0f   : > { %v8794_v9 = vadd.f32 %v8793_v4, %v8792_v24 }
 0xc11   : > { %v8796_v26 = vadd.f32 %v8795_v63, %v8794_v9  ;;  %v8846_v29 = vpop.permute.xlu1 %8845 }
 0xc13   : > { %v8797_v2 = vrot.slane %v8796_v26, 4 }
 0xc15   : > { %v8798_v25 = vadd.f32 %v8797_v2, %v8796_v26 }
 0xc17   : > { %v8799_v12 = vrot.slane %v8798_v25, 2 }
 0xc19   : > { %v8800_v33 = vadd.f32 %v8799_v12, %v8798_v25 }
 0xc1b   : > { %v8801_v55 = vrot.slane %v8800_v33, 1 }
 0xc1d   : > { %v8802_v1 = vadd.f32 %v8801_v55, %v8800_v33 }
 0xc1f   : > { %v8803_v59 = vmul.f32 0.03125, %v8802_v1 }
 0xc21   : > { %v8806_v39 = vsub.f32 %v8788_v11, %v8803_v59  ;;  %v8807_v49 = vsub.f32 %v8789_v53, %v8803_v59  ;;  %v8804_v16 = vsub.f32 %v8786_v50, %v8803_v59  ;;  %v8805_v27 = vsub.f32 %v8787_v21, %v8803_v59  ;;  %v8866_v50 = vpop.permute.xlu1 %8865 }
 0xc23   : > { %v8808_v43 = vmul.f32 %v8804_v16, %v8804_v16  ;;  %v8809_v5 = vmul.f32 %v8805_v27, %v8805_v27  ;;  %v8810_v13 = vmul.f32 %v8806_v39, %v8806_v39  ;;  %v8811_v31 = vmul.f32 %v8807_v49, %v8807_v49 }
 0xc25   : > { %v8812_v62 = vsel %vm697_vm0, %v8808_v43, 0.0  ;;  %v8813_v58 = vsel %vm697_vm0, %v8809_v5, 0.0  ;;  %v8815_v23 = vsel %vm697_vm0, %v8810_v13, 0.0  ;;  %v8817_v46 = vsel %vm697_vm0, %v8811_v31, 0.0 }
 0xc26   : > { %v8814_v41 = vadd.f32 %v8813_v58, %v8812_v62 }
 0xc28   : > { %v8816_v17 = vadd.f32 %v8815_v23, %v8814_v41 }
 0xc2a   : > { %v8818_v51 = vadd.f32 %v8817_v46, %v8816_v17 }
 0xc2c   : > { %v8819_v42 = vrot.slane %v8818_v51, 4 }
 0xc2e   : > { %v8820_v35 = vadd.f32 %v8819_v42, %v8818_v51 }
 0xc30   : > { %v8821_v30 = vrot.slane %v8820_v35, 2 }
 0xc32   : > { %v8822_v15 = vadd.f32 %v8821_v30, %v8820_v35  ;;  %v8939_v35 = vpop.permute.xlu1 %8938 }
 0xc34   : > { %v8823_v40 = vrot.slane %v8822_v15, 1 }
 0xc36   : > { %v8824_v36 = vadd.f32 %v8823_v40, %v8822_v15  ;;  %v8934_v15 = vpop.permute.xlu0 %8933  ;;  %v8958_v40 = vpop.permute.xlu1 %8957 }
 0xc38   : > { %v8825_v0 = vmul.f32 0.03125, %v8824_v36 }
 0xc3a   : > { %v8826_v18 = vadd.f32 1e-06, %v8825_v0  ;;  %v8963_v36 = vpop.permute.xlu0 %8962  ;;  %v8944_v0 = vpop.permute.xlu1 %8943 }
 0xc3c   : > { %11362 = vrsqrt.f32 %v8826_v18 }
 0xc3e   : > { %v8949_v18 = vpop.permute.xlu0 %8948 }
 0xc46   : > { %v11363_v7 = vpop.eup %11362 }
 0xc47   : > { %v8829_v6 = vmul.f32 %v11363_v7, %v8805_v27  ;;  %v8830_v34 = vmul.f32 %v11363_v7, %v8806_v39  ;;  %v8828_v22 = vmul.f32 %v11363_v7, %v8804_v16  ;;  %v8831_v52 = vmul.f32 %v11363_v7, %v8807_v49 }
 0xc49   : > { %v8849_v37 = vmul.f32 %v8838_v38, %v8829_v6  ;;  %v8850_v21 = vmul.f32 %v8842_v45, %v8830_v34  ;;  %v8848_v61 = vmul.f32 %v8834_v56, %v8828_v22  ;;  %v8851_v48 = vmul.f32 %v8846_v29, %v8831_v52  ;;  %v8968_v52 = vpop.permute.xlu1 %8967 }
 0xc4b   : > { %v8869_v14 = vadd.f32 %v8858_v20, %v8849_v37  ;;  %v8868_v10 = vadd.f32 %v8854_v57, %v8848_v61  ;;  %v8870_v54 = vadd.f32 %v8862_v32, %v8850_v21  ;;  %v8871_v60 = vadd.f32 %v8866_v50, %v8851_v48  ;;  %v8973_v37 = vpop.permute.xlu0 %8972 }
 0xc4d   : > { %v8890_v19 = vsel %vm697_vm0, %v8869_v14, 0.0  ;;  %v8889_v28 = vsel %vm697_vm0, %v8868_v10, 0.0  ;;  %v8892_v44 = vsel %vm697_vm0, %v8870_v54, 0.0  ;;  %v8894_v47 = vsel %vm697_vm0, %v8871_v60, 0.0 }
 0xc4e   : > { %v8891_v24 = vadd.f32 %v8890_v19, %v8889_v28  ;;  %v8982_v19 = vld [vmem:[%s14044_s15 + $0x18] sm:$0xff]  ;;  %v8983_v28 = vld [vmem:[%s14044_s15 + $0x20] sm:$0xff] }
 0xc50   : > { %v8893_v11 = vadd.f32 %v8892_v44, %v8891_v24  ;;  %v8985_v24 = vld [vmem:[%s14044_s15 + $0x30] sm:$0xff]  ;;  %v8986_v44 = vld [vmem:[%s14044_s15 + $0x38] sm:$0xff] }
 0xc52   : > { %v8895_v53 = vadd.f32 %v8894_v47, %v8893_v11  ;;  %v8995_v11 = vpop.permute.xlu0 %8994  ;;  %v8990_v47 = vpop.permute.xlu1 %8989 }
 0xc54   : > { %v8896_v4 = vrot.slane %v8895_v53, 4 }
 0xc56   : > { %v8897_v9 = vadd.f32 %v8896_v4, %v8895_v53  ;;  %v9005_v53 = vpop.permute.xlu0 %9004 }
 0xc58   : > { %v8898_v63 = vrot.slane %v8897_v9, 2 }
 0xc5a   : > { %v8899_v26 = vadd.f32 %v8898_v63, %v8897_v9  ;;  %v9000_v9 = vpop.permute.xlu1 %8999 }
 0xc5c   : > { %v8900_v2 = vrot.slane %v8899_v26, 1 }
 0xc5e   : > { %v8901_v25 = vadd.f32 %v8900_v2, %v8899_v26 }
 0xc60   : > { %v8902_v8 = vmul.f32 0.03125, %v8901_v25 }
 0xc62   : > { %v8903_v12 = vsub.f32 %v8868_v10, %v8902_v8  ;;  %v8905_v33 = vsub.f32 %v8870_v54, %v8902_v8  ;;  %v8906_v55 = vsub.f32 %v8871_v60, %v8902_v8  ;;  %v8904_v1 = vsub.f32 %v8869_v14, %v8902_v8  ;;  %v8980_v10 = vld [vmem:[%s14044_s15 + $0x8] sm:$0xff]  ;;  %v8981_v54 = vld [vmem:[%s14044_s15 + $0x10] sm:$0xff] }
 0xc63   : > { %v8984_v60 = vld [vmem:[%s14044_s15 + $0x28] sm:$0xff] }
 0xc64   : > { %v8907_v59 = vmul.f32 %v8903_v12, %v8903_v12  ;;  %v8908_v39 = vmul.f32 %v8904_v1, %v8904_v1  ;;  %v8909_v49 = vmul.f32 %v8905_v33, %v8905_v33  ;;  %v8910_v16 = vmul.f32 %v8906_v55, %v8906_v55 }
 0xc66   : > { %v8911_v27 = vsel %vm697_vm0, %v8907_v59, 0.0  ;;  %v8912_v43 = vsel %vm697_vm0, %v8908_v39, 0.0  ;;  %v8914_v13 = vsel %vm697_vm0, %v8909_v49, 0.0  ;;  %v8916_v62 = vsel %vm697_vm0, %v8910_v16, 0.0  ;;  %v9015_v59 = vpop.permute.xlu0 %9014  ;;  %v9010_v16 = vpop.permute.xlu1 %9009 }
 0xc67   : > { %v8913_v5 = vadd.f32 %v8912_v43, %v8911_v27 }
 0xc69   : > { %v8915_v31 = vadd.f32 %v8914_v13, %v8913_v5 }
 0xc6b   : > { %v8917_v58 = vadd.f32 %v8916_v62, %v8915_v31 }
 0xc6d   : > { %v8918_v41 = vrot.slane %v8917_v58, 4 }
 0xc6f   : > { %v8919_v23 = vadd.f32 %v8918_v41, %v8917_v58 }
 0xc71   : > { %v8920_v17 = vrot.slane %v8919_v23, 2 }
 0xc73   : > { %v8921_v46 = vadd.f32 %v8920_v17, %v8919_v23 }
 0xc75   : > { %v8922_v51 = vrot.slane %v8921_v46, 1 }
 0xc77   : > { %v8923_v42 = vadd.f32 %v8922_v51, %v8921_v46 }
 0xc79   : > { %v8924_v30 = vmul.f32 0.03125, %v8923_v42 }
 0xc7b   : > { %v8925_v38 = vadd.f32 1e-06, %v8924_v30 }
 0xc7d   : > { %11364 = vrsqrt.f32 %v8925_v38 }
 0xc87   : > { %v11365_v45 = vpop.eup %11364 }
 0xc88   : > { %v8928_v56 = vmul.f32 %v11365_v45, %v8904_v1  ;;  %v8927_v20 = vmul.f32 %v11365_v45, %v8903_v12  ;;  %v8929_v57 = vmul.f32 %v11365_v45, %v8905_v33  ;;  %v8930_v29 = vmul.f32 %v11365_v45, %v8906_v55 }
 0xc8a   : > { %v8952_v7 = vmul.f32 %v8939_v35, %v8928_v56  ;;  %v8951_v6 = vmul.f32 %v8934_v15, %v8927_v20  ;;  %v8953_v34 = vmul.f32 %v8944_v0, %v8929_v57  ;;  %v8954_v22 = vmul.f32 %v8949_v18, %v8930_v29  ;;  %v9025_v15 = vpop.permute.xlu0 %9024  ;;  %v9020_v18 = vpop.permute.xlu1 %9019 }
 0xc8c   : > { %v8975_v21 = vadd.f32 %v8958_v40, %v8951_v6  ;;  %v8976_v61 = vadd.f32 %v8963_v36, %v8952_v7  ;;  %v8977_v48 = vadd.f32 %v8968_v52, %v8953_v34  ;;  %v8978_v32 = vadd.f32 %v8973_v37, %v8954_v22 }
 0xc8e   : > { %v11112_v50 = vpack.c.bf16 %v8976_v61, %v8975_v21  ;;  %v11116_v14 = vpack.c.bf16 %v8978_v32, %v8977_v48 }
 0xc90   : > { %11113 = vmatprep.subr.bf16.mxu1 %v11112_v50 }
 0xc91   : > { %11115 = vmatpush3.bf16.msra.mxu1 %v11112_v50 }
 0xc92   : > { %11117 = vmatprep.subr.bf16.mxu1 %v11116_v14 }
 0xc95   : > { %11119 = vmatpush3.bf16.msra.mxu1 %v11116_v14 }
 0xc98   : > { %10916 = vmatmul.mubr.msk.f32.vlgmr.msra.gmra.mrb[126].mxu1 %vm1424_vm2, %v8980_v10 }
 0xc99   : > { %10918 = vmatprep.mubr.msk.f32.mxu1 %vm1424_vm2, %v8981_v54 }
 0xc9c   : > { %10919 = vmatmul.mubr.msk.f32.gmra.mrb[128].mxu1 %vm1424_vm2, %v8982_v19 }
 0xc9d   : > { %10921 = vmatprep.mubr.msk.f32.mxu1 %vm1424_vm2, %v8983_v28 }
 0xca0   : > { %10922 = vmatmul.mubr.msk.f32.gmra.mrb[130].mxu1 %vm1424_vm2, %v8984_v60 }
 0xca1   : > { %10924 = vmatprep.mubr.msk.f32.mxu1 %vm1424_vm2, %v8985_v24 }
 0xca4   : > { %10925 = vmatmul.mubr.msk.f32.gmra.mrb[132].mxu1 %vm1424_vm2, %v8986_v44 }
 0xd6b   : > { %v10917_v4 = vpop.f32.mrb[126].mxu1 }
 0xd6c   : > { %v13927_v63 = vadd.f32 %v10917_v4, %v8995_v11  ;;  %v9117_v26 = vpop.f32.mrb[127].mxu1 }
 0xd6d   : > { %v13929_v2 = vadd.f32 %v9117_v26, %v8990_v47 }
 0xd6e   : > { %v9165_v25 = vmul.f32 0.044715, %v13927_v63  ;;  %v9157_v4 = vmul.f32 0.5, %v13927_v63 }
 0xd6f   : > { %v9164_v8 = vmul.f32 0.044715, %v13929_v2  ;;  %v10920_v12 = vpop.f32.mrb[128].mxu1  ;;  %v9156_v26 = vmul.f32 0.5, %v13929_v2 }
 0xd70   : > { %v9173_v33 = vmul.f32 %v9165_v25, %v13927_v63  ;;  %v13934_v55 = vadd.f32 %v10920_v12, %v9005_v53  ;;  %v9127_v1 = vpop.f32.mrb[129].mxu1 }
 0xd71   : > { %v9172_v39 = vmul.f32 %v9164_v8, %v13929_v2  ;;  %v13937_v49 = vadd.f32 %v9127_v1, %v9000_v9 }
 0xd72   : > { %v9181_v27 = vmul.f32 %v9173_v33, %v13927_v63  ;;  %v9167_v43 = vmul.f32 0.044715, %v13934_v55 }
 0xd73   : > { %v9180_v5 = vmul.f32 %v9172_v39, %v13929_v2  ;;  %v9166_v13 = vmul.f32 0.044715, %v13937_v49  ;;  %v10923_v31 = vpop.f32.mrb[130].mxu1 }
 0xd74   : > { %v9189_v62 = vadd.f32 %v9181_v27, %v13927_v63  ;;  %v9175_v58 = vmul.f32 %v9167_v43, %v13934_v55  ;;  %v13945_v41 = vadd.f32 %v10923_v31, %v9015_v59  ;;  %v9137_v23 = vpop.f32.mrb[131].mxu1  ;;  %v9159_v59 = vmul.f32 0.5, %v13934_v55 }
 0xd75   : > { %v9188_v17 = vadd.f32 %v9180_v5, %v13929_v2  ;;  %v9174_v46 = vmul.f32 %v9166_v13, %v13937_v49  ;;  %v13949_v51 = vadd.f32 %v9137_v23, %v9010_v16  ;;  %v9158_v27 = vmul.f32 0.5, %v13937_v49 }
 0xd76   : > { %v9197_v42 = vmul.f32 0.7978846, %v9189_v62  ;;  %v9183_v35 = vmul.f32 %v9175_v58, %v13934_v55  ;;  %v9169_v30 = vmul.f32 0.044715, %v13945_v41  ;;  %v9161_v2 = vmul.f32 0.5, %v13945_v41 }
 0xd77   : > { %v9196_v38 = vmul.f32 0.7978846, %v9188_v17  ;;  %v9182_v40 = vmul.f32 %v9174_v46, %v13937_v49  ;;  %v9168_v36 = vmul.f32 0.044715, %v13949_v51  ;;  %v10926_v0 = vpop.f32.mrb[132].mxu1  ;;  %v9160_v23 = vmul.f32 0.5, %v13949_v51 }
 0xd78   : > { %11366 = vtanh.f32 %v9197_v42  ;;  %v9191_v45 = vadd.f32 %v9183_v35, %v13934_v55  ;;  %v9177_v56 = vmul.f32 %v9169_v30, %v13945_v41  ;;  %v9153_v20 = vadd.f32 %v10926_v0, %v9025_v15  ;;  %v9147_v57 = vpop.f32.mrb[133].mxu1  ;;  %v9228_v0 = vld [vmem:[%s14045_s16] sm:$0xff] }
 0xd79   : > { %11368 = vtanh.f32 %v9196_v38  ;;  %v9190_v29 = vadd.f32 %v9182_v40, %v13937_v49  ;;  %v9176_v7 = vmul.f32 %v9168_v36, %v13949_v51  ;;  %v9148_v6 = vadd.f32 %v9147_v57, %v9020_v18  ;;  %v9232_v18 = vpop.permute.xlu1 %9231 }
 0xd7a   : > { %v9199_v34 = vmul.f32 0.7978846, %v9191_v45  ;;  %v9185_v22 = vmul.f32 %v9177_v56, %v13945_v41  ;;  %v9171_v52 = vmul.f32 0.044715, %v9153_v20  ;;  %v9163_v35 = vmul.f32 0.5, %v9153_v20 }
 0xd7b   : > { %v9198_v37 = vmul.f32 0.7978846, %v9190_v29  ;;  %v9184_v21 = vmul.f32 %v9176_v7, %v13949_v51  ;;  %v9170_v61 = vmul.f32 0.044715, %v9148_v6  ;;  %v9162_v38 = vmul.f32 0.5, %v9148_v6 }
 0xd7c   : > { %11370 = vtanh.f32 %v9199_v34  ;;  %v9193_v48 = vadd.f32 %v9185_v22, %v13945_v41  ;;  %v9179_v32 = vmul.f32 %v9171_v52, %v9153_v20 }
 0xd7d   : > { %11372 = vtanh.f32 %v9198_v37  ;;  %v9192_v50 = vadd.f32 %v9184_v21, %v13949_v51  ;;  %v9178_v14 = vmul.f32 %v9170_v61, %v9148_v6 }
 0xd7e   : > { %v9201_v10 = vmul.f32 0.7978846, %v9193_v48  ;;  %v9187_v54 = vmul.f32 %v9179_v32, %v9153_v20 }
 0xd7f   : > { %v9200_v19 = vmul.f32 0.7978846, %v9192_v50  ;;  %v9186_v28 = vmul.f32 %v9178_v14, %v9148_v6 }
 0xd80   : > { %11374 = vtanh.f32 %v9201_v10  ;;  %v9195_v60 = vadd.f32 %v9187_v54, %v9153_v20 }
 0xd81   : > { %11376 = vtanh.f32 %v9200_v19  ;;  %v9194_v24 = vadd.f32 %v9186_v28, %v9148_v6 }
 0xd82   : > { %v11367_v44 = vpop.eup %11366  ;;  %v9203_v11 = vmul.f32 0.7978846, %v9195_v60 }
 0xd83   : > { %v11369_v47 = vpop.eup %11368  ;;  %v9202_v53 = vmul.f32 0.7978846, %v9194_v24  ;;  %v9213_v9 = vadd.f32 1.0, %v11367_v44 }
 0xd84   : > { %11378 = vtanh.f32 %v9203_v11  ;;  %v9212_v25 = vadd.f32 1.0, %v11369_v47 }
 0xd85   : > { %11380 = vtanh.f32 %v9202_v53  ;;  %v9221_v8 = vmul.f32 %v9213_v9, %v9157_v4 }
 0xd86   : > { %v11371_v12 = vpop.eup %11370  ;;  %v9220_v33 = vmul.f32 %v9212_v25, %v9156_v26 }
 0xd87   : > { %v11373_v1 = vpop.eup %11372  ;;  %v9215_v39 = vadd.f32 1.0, %v11371_v12 }
 0xd88   : > { %v11121_v16 = vpack.c.bf16 %v9221_v8, %v9220_v33  ;;  %v9214_v43 = vadd.f32 1.0, %v11373_v1 }
 0xd89   : > { %v9223_v5 = vmul.f32 %v9215_v39, %v9159_v59 }
 0xd8a   : > { %v11375_v13 = vpop.eup %11374  ;;  %11122 = vmatpush3.bf16.msra.mxu0 %v11121_v16  ;;  %v9222_v63 = vmul.f32 %v9214_v43, %v9158_v27 }
 0xd8b   : > { %v11377_v31 = vpop.eup %11376  ;;  %11123 = vmatprep.subr.bf16.mxu0 %v14165_v3  ;;  %v9217_v62 = vadd.f32 1.0, %v11375_v13 }
 0xd8c   : > { %v11124_v58 = vpack.c.bf16 %v9223_v5, %v9222_v63  ;;  %v9216_v17 = vadd.f32 1.0, %v11377_v31 }
 0xd8d   : > { %v9225_v55 = vmul.f32 %v9217_v62, %v9161_v2 }
 0xd8e   : > { %v11379_v46 = vpop.eup %11378  ;;  %11125 = vmatpush3.bf16.msra.mxu0 %v11124_v58  ;;  %v9224_v42 = vmul.f32 %v9216_v17, %v9160_v23 }
 0xd8f   : > { %v11381_v49 = vpop.eup %11380  ;;  %11126 = vmatprep.subr.bf16.mxu0 %v14165_v3  ;;  %v9219_v30 = vadd.f32 1.0, %v11379_v46 }
 0xd90   : > { %v11127_v15 = vpack.c.bf16 %v9225_v55, %v9224_v42  ;;  %v9218_v40 = vadd.f32 1.0, %v11381_v49 }
 0xd91   : > { %v9227_v41 = vmul.f32 %v9219_v30, %v9163_v35 }
 0xd92   : > { %11128 = vmatpush3.bf16.msra.mxu0 %v11127_v15  ;;  %v9226_v36 = vmul.f32 %v9218_v40, %v9162_v38 }
 0xd93   : > { %11129 = vmatprep.subr.bf16.mxu0 %v14165_v3 }
 0xd94   : > { %v11130_v51 = vpack.c.bf16 %v9227_v41, %v9226_v36 }
 0xd96   : > { %11131 = vmatpush3.bf16.msra.mxu0 %v11130_v51 }
 0xd99   : > { %10944 = vmatmul.mubr.msk.f32.vlgmr.msra.gmra.mrb[140].mxu0 %vm961_vm1, %v9228_v0 }
 0xe6c   : > { %v9303_v45 = vpop.f32.mrb[140].mxu0 }
 0xe6d   : > { %v9304_v56 = vadd.f32 %v9303_v45, %v9232_v18  ;;  %v10945_v20 = vpop.f32.mrb[141].mxu0 }
 0xe6f   : > { %9307 = vst.msk [vmem:[%s631_s25] sm:$0xff] %vm697_vm0, %v9304_v56 }
 0xe70   : > { %11395 = shalt.err (!%p11392_p5)
}
 0xe71   : > { %s11396_s0 = scalar_lea.hbm %s13981_s23, 128  ;;  %s11400_s25 = scalar_lea.hbm %s14171_s20, 256 }
 0xe72   : > { %p11397_p6 = scmp.ne.s32.totalorder %s13981_s23, %s11396_s0  ;;  %p11401_p10 = scmp.lt.u32.totalorder %s13981_s23, %s14171_s20 }
 0xe73   : > { %p11402_p11 = scmp.lt.u32.totalorder %s11400_s25, %s11396_s0  ;;  %p11404_p13 = scmp.lt.u32.totalorder %s11396_s0, %s13981_s23 }
 0xe74   : > { %p11398_p7 = pnand %p11397_p6, %p11607_p4 }
 0xe75   : > { %p11403_p12 = por %p11402_p11, %p11401_p10 }
 0xe76   : > { %p11399_p9 = pneg %p11398_p7 }
 0xe77   : > { %p11405_p0 = por %p11404_p13, %p11403_p12 }
 0xe79   : > { %p11406_p1 = pnand %p11405_p0, %p11399_p9 }
 0xe7b   : > { %11409 = shalt.err (!%p11406_p1)
}
 0xe7c   : > { %11132 = dma.vmem_to_hbm [thread:$0]  (%p11607_p4), %s13983_s19, 128, %s13981_s23, %s9309_s22  }
 0xe7d PF: > { %s14172_s30 = sld [smem:[#allocation8_spill]]  ;;  %s14173_s21 = sld [smem:[#allocation5_spill]] }
 0xe83   : > { %p11138_p2 = scmp.ge.s32.totalorder %s14172_s30, 2  ;;  %s9335_s27 = sand.u32 1, %s14173_s21  }
 0xe84   : > { %s9336_s18 = scalar_lea.sflag [#allocation3], %s9335_s27 }
 0xe85   : > { %p11135_p3 = pnand %p11138_p2, %p11614_p8 }
 0xe87   : > { %11435 = dma.done.wait (!%p11135_p3), %s9336_s18, 128  }
 0xe88   : > { %11437 = vsyncadd (!%p11135_p3), %s9336_s18, 4294967168  ;;  %s31_s19 = sadd.s32 1, %s14172_s30   ;;  %s14175_s0 = sld [smem:[#allocation6_spill]] }
 0xe89   : > { %p28_p5 = scmp.ge.s32.totalorder %s31_s19, 4   ;;  %s14176_s29 = sld [smem:[#allocation11_spill]] }
 0xe8a   : > { %s14177_s30 = sld [smem:[#allocation7_spill]]  ;;  %s14178_s2 = sld [smem:[#allocation9_spill]] }
 0xe8b   : > { %s14179_s27 = smov %s11444_s28  ;;  %30 = sbr.rel (!%p28_p5) target bundleno = 9 (0x9), region = 142 }
 0xe8e   : > { %s14180_s28 = smov %s14175_s0 }
 0xe90   : > { %s14181_s0 = smov %s14178_s2 }
 0xe92   :  { %9341 = vsyncpa [#allocation3], 1 }
 0xe93   :  { %9343 = vsyncpa [#allocation3 + $0x1], 1 }

</bundles_post_ra>
